<compile_context>
chip_gen: v5e
topology: v5e:2x2
jax: 0.10.0
libtpu: 0.0.40
codegen_flags: <defaults>
</compile_context>

<pallas_src>
import numpy as np
import jax
import jax.numpy as jnp
from jax.experimental import pallas as pl
from jax.experimental.pallas import tpu as pltpu

# ------------------------------- configuration -------------------------------
DIM = 32            # embedding channels C
H = W = 8           # input_resolution
DEPTH = 2           # block 0: shift=0 (W-MSA), block 1: shift=ws//2 (SW-MSA)
NUM_HEADS = 4
WINDOW_SIZE = 4     # min(input_resolution)=8 > 4, so window/shift logic unchanged
MLP_RATIO = 4.0
BATCH = 2
LN_EPS = 1e-5       # PyTorch nn.LayerNorm default

HEAD_DIM = DIM // NUM_HEADS                      # 8
N_TOK = WINDOW_SIZE * WINDOW_SIZE                # 16 tokens / window
L = H * W                                        # 64 tokens / image
BL = BATCH * L                                   # 128
HIDDEN = int(DIM * MLP_RATIO)                    # 128
SHIFTS = tuple(0 if i % 2 == 0 else WINDOW_SIZE // 2 for i in range(DEPTH))
NEG_INF = -1e9                                   # cross-window / masked pairs


# --------------------------- host-side mask building --------------------------
def relative_position_index(ws):
    coords = np.stack(np.meshgrid(np.arange(ws), np.arange(ws), indexing="ij"))
    cf = coords.reshape(2, -1)
    rc = cf[:, :, None] - cf[:, None, :]
    rc = rc.transpose(1, 2, 0).astype(np.int64)
    rc[:, :, 0] += ws - 1
    rc[:, :, 1] += ws - 1
    rc[:, :, 0] *= 2 * ws - 1
    return rc.sum(-1)  # (N, N)


def _window_partition_np(x, ws):
    B, Hh, Ww, C = x.shape
    x = x.reshape(B, Hh // ws, ws, Ww // ws, ws, C)
    return x.transpose(0, 1, 3, 2, 4, 5).reshape(-1, ws * ws, C)


def create_shift_mask(ws, shift, Hh, Ww):
    img = np.zeros((1, Hh, Ww, 1), np.float32)
    cnt = 0
    for hs in (slice(0, -ws), slice(-ws, -shift), slice(-shift, None)):
        for wsl in (slice(0, -ws), slice(-ws, -shift), slice(-shift, None)):
            img[:, hs, wsl, :] = cnt
            cnt += 1
    mw = _window_partition_np(img, ws).reshape(-1, ws * ws)          # (nW, N)
    am = mw[:, None, :] - mw[:, :, None]                             # (nW, N, N)
    return np.where(am != 0, -100.0, 0.0).astype(np.float32)


def build_full_bias(rel_table_np, shift):
    """Additive attention table over the UN-permuted token slab of one image.

    Returns (nH, L, L): pairs inside the same (shifted) window get the
    relative-position bias (+ Swin's -100 shift mask); all other pairs get
    NEG_INF, so full-slab softmax == per-window softmax."""
    N = N_TOK
    rpi = relative_position_index(WINDOW_SIZE).reshape(-1)
    bias = rel_table_np[rpi].reshape(N, N, NUM_HEADS).transpose(2, 0, 1)   # (nH,N,N)
    nWw = W // WINDOW_SIZE
    if shift > 0:
        smask = create_shift_mask(WINDOW_SIZE, shift, H, W)                # (nW,N,N)
    else:
        smask = np.zeros(((H // WINDOW_SIZE) * nWw, N, N), np.float32)
    win = np.zeros(L, np.int64)
    loc = np.zeros(L, np.int64)
    for h0 in range(H):
        for w0 in range(W):
            i = h0 * W + w0
            hs, ws_ = (h0 - shift) % H, (w0 - shift) % W                   # shifted pos
            win[i] = (hs // WINDOW_SIZE) * nWw + (ws_ // WINDOW_SIZE)
            loc[i] = (hs % WINDOW_SIZE) * WINDOW_SIZE + (ws_ % WINDOW_SIZE)
    full = np.full((NUM_HEADS, L, L), NEG_INF, np.float32)
    for i in range(L):
        for j in range(L):
            if win[i] == win[j]:
                full[:, i, j] = bias[:, loc[i], loc[j]] + smask[win[i], loc[i], loc[j]]
    return full  # (nH, L, L)


# ------------------------------- Pallas kernel -------------------------------
def _layernorm(x, g, b):
    mu = jnp.mean(x, axis=-1, keepdims=True)
    var = jnp.mean(jnp.square(x - mu), axis=-1, keepdims=True)
    return (x - mu) * jax.lax.rsqrt(var + LN_EPS) * g + b


_SQRT_2_OVER_PI = 0.7978845608028654


def _gelu_tanh(x):
    # TODO(synk): PyTorch nn.GELU() is erf-based; the tanh approximation (EUP
    # transcendental, frees the f32 VALU on v5e) differs by ~1e-3 abs.
    return 0.5 * x * (1.0 + jnp.tanh(_SQRT_2_OVER_PI * (x + 0.044715 * x * x * x)))


def swin_encoder_kernel(x_ref,
                        ln1g_ref, ln1b_ref, wqkv_ref, bqkv_ref,
                        wproj_ref, bproj_ref, ln2g_ref, ln2b_ref,
                        w1_ref, b1_ref, w2_ref, b2_ref,
                        bias_ref,
                        o_ref):
    C, Dh = DIM, HEAD_DIM
    x = x_ref[...]                                        # (L, C) f32 — one image

    for blk in range(DEPTH):                              # both Swin blocks fused
        # ---- norm1 + fused qkv (1/sqrt(Dh) pre-folded into q weights) ----
        xn = _layernorm(x, ln1g_ref[blk], ln1b_ref[blk])
        qkv = jnp.dot(xn.astype(jnp.bfloat16), wqkv_ref[blk],
                      preferred_element_type=jnp.float32) + bqkv_ref[blk]   # (L, 3C)
        qkv = qkv.astype(jnp.bfloat16)

        # ---- full-slab masked attention: shift + window structure folded into
        #      the precomputed additive bias table (no permutation copies) ----
        head_outs = []
        for h in range(NUM_HEADS):                        # static unroll
            qh = qkv[:, h * Dh:(h + 1) * Dh]              # (L, Dh) bf16
            kh = qkv[:, C + h * Dh:C + (h + 1) * Dh]
            vh = qkv[:, 2 * C + h * Dh:2 * C + (h + 1) * Dh]
            sc = jax.lax.dot_general(qh, kh, (((1,), (1,)), ((), ())),
                                     preferred_element_type=jnp.float32)   # (L, L)
            sc = sc + bias_ref[blk * NUM_HEADS + h]       # rel-pos bias / -100 / -1e9
            m = jnp.max(sc, axis=-1, keepdims=True)
            e = jnp.exp(sc - m)
            p = e * pl.reciprocal(jnp.sum(e, axis=-1, keepdims=True), approx=True)
            head_outs.append(jnp.dot(p.astype(jnp.bfloat16), vh,
                                     preferred_element_type=jnp.float32))  # (L, Dh)
        attn = jnp.concatenate(head_outs, axis=-1)        # (L, C)

        # ---- output projection + residual 1 ----
        proj = jnp.dot(attn.astype(jnp.bfloat16), wproj_ref[blk],
                       preferred_element_type=jnp.float32) + bproj_ref[blk]
        x1 = x + proj

        # ---- norm2 + MLP(GELU) + residual 2 ----
        x2n = _layernorm(x1, ln2g_ref[blk], ln2b_ref[blk])
        hmid = jnp.dot(x2n.astype(jnp.bfloat16), w1_ref[blk],
                       preferred_element_type=jnp.float32) + b1_ref[blk]    # (L, Hd)
        hmid = _gelu_tanh(hmid)
        y = jnp.dot(hmid.astype(jnp.bfloat16), w2_ref[blk],
                    preferred_element_type=jnp.float32) + b2_ref[blk]       # (L, C)
        x = x1 + y

    # TODO(synk): output is (L, C=32)-wide (masked lane stores); a lane-dense
    # (C, L) transposed layout would only pay off at larger DIM / L.
    o_ref[...] = x


def _inv_spec(shape):
    """Grid-invariant full-array block."""
    nd = len(shape)

    def idx(b):
        return (0,) * nd

    return pl.BlockSpec(shape, idx)


def swin_encoder_forward(x, kp, bias_full):
    B, Lx, C = x.shape
    xf = x.reshape(B * Lx, C)
    weights = [kp["ln1_g"], kp["ln1_b"], kp["wqkv"], kp["bqkv"],
               kp["wproj"], kp["bproj"], kp["ln2_g"], kp["ln2_b"],
               kp["w1"], kp["b1"], kp["w2"], kp["b2"], bias_full]
    in_specs = ([pl.BlockSpec((Lx, C), lambda b: (b, 0))]
                + [_inv_spec(w.shape) for w in weights])

    flops = 2 * DEPTH * B * Lx * (3 * C * C + 2 * Lx * C + C * C + 2 * C * HIDDEN)
    transcendentals = DEPTH * B * Lx * (NUM_HEADS * Lx + HIDDEN)
    bytes_accessed = int(sum(int(np.prod(w.shape)) * w.dtype.itemsize for w in weights)
                         + 2 * xf.size * 4)

    out = pl.pallas_call(
        swin_encoder_kernel,
        out_shape=jax.ShapeDtypeStruct((B * Lx, C), jnp.float32),
        grid=(B,),                                        # one image per program
        in_specs=in_specs,
        out_specs=pl.BlockSpec((Lx, C), lambda b: (b, 0)),
        compiler_params=pltpu.CompilerParams(
            dimension_semantics=("parallel",)),           # shards over v7x's 2 TCs
        cost_estimate=pl.CostEstimate(flops=flops,
                                      transcendentals=transcendentals,
                                      bytes_accessed=bytes_accessed),
    )(xf, *weights)
    return out.reshape(B, Lx, C)


# --------------------------- parameter preparation ---------------------------
def init_block_params(key, dim, num_heads, window_size, hidden_dim):
    ks = jax.random.split(key, 13)
    s = 0.05
    return {
        "ln1_g": 1.0 + 0.02 * jax.random.normal(ks[0], (1, dim), jnp.float32),
        "ln1_b": 0.02 * jax.random.normal(ks[1], (1, dim), jnp.float32),
        "wqkv": s * jax.random.normal(ks[2], (dim, 3 * dim), jnp.float32),
        "bqkv": 0.02 * jax.random.normal(ks[3], (1, 3 * dim), jnp.float32),
        "rel_table": 0.02 * jax.random.normal(
            ks[4], ((2 * window_size - 1) ** 2, num_heads), jnp.float32),
        "wproj": s * jax.random.normal(ks[5], (dim, dim), jnp.float32),
        "bproj": 0.02 * jax.random.normal(ks[6], (1, dim), jnp.float32),
        "ln2_g": 1.0 + 0.02 * jax.random.normal(ks[7], (1, dim), jnp.float32),
        "ln2_b": 0.02 * jax.random.normal(ks[8], (1, dim), jnp.float32),
        "w1": s * jax.random.normal(ks[9], (dim, hidden_dim), jnp.float32),
        "b1": 0.02 * jax.random.normal(ks[10], (1, hidden_dim), jnp.float32),
        "w2": s * jax.random.normal(ks[11], (hidden_dim, dim), jnp.float32),
        "b2": 0.02 * jax.random.normal(ks[12], (1, dim), jnp.float32),
    }


def stack_kernel_params(params, num_heads):
    """Stack per-block params over depth, fold 1/sqrt(Dh) into the q columns,
    pre-cast MXU weights to bf16 (LN/softmax/biases stay f32)."""
    C = params[0]["wqkv"].shape[0]
    scale = (C // num_heads) ** -0.5

    def st(name):
        return jnp.stack([p[name] for p in params])

    scale_vec = jnp.concatenate(
        [jnp.full((C,), scale, jnp.float32), jnp.ones((2 * C,), jnp.float32)])
    wqkv = st("wqkv") * scale_vec[None, None, :]
    bqkv = st("bqkv") * scale_vec[None, None, :]
    return {
        "ln1_g": st("ln1_g"), "ln1_b": st("ln1_b"),
        "wqkv": wqkv.astype(jnp.bfloat16), "bqkv": bqkv,
        "wproj": st("wproj").astype(jnp.bfloat16), "bproj": st("bproj"),
        "ln2_g": st("ln2_g"), "ln2_b": st("ln2_b"),
        "w1": st("w1").astype(jnp.bfloat16), "b1": st("b1"),
        "w2": st("w2").astype(jnp.bfloat16), "b2": st("b2"),
    }


# ----------------------------- pure-JAX reference -----------------------------
def window_partition(x, ws):
    B, Hh, Ww, C = x.shape
    x = x.reshape(B, Hh // ws, ws, Ww // ws, ws, C)
    return jnp.transpose(x, (0, 1, 3, 2, 4, 5)).reshape(-1, ws * ws, C)


def window_reverse(wins, ws, Hh, Ww, B):
    C = wins.shape[-1]
    x = wins.reshape(B, Hh // ws, Ww // ws, ws, ws, C)
    return jnp.transpose(x, (0, 1, 3, 2, 4, 5)).reshape(B, Hh, Ww, C)


def build_attn_bias(rel_table, shift, ws, Hh, Ww, B, nH):
    """Per-window-instance bias (+ shift mask) for the reference: (B*nW,nH,N,N)."""
    N = ws * ws
    rpi = relative_position_index(ws).reshape(-1)
    bias = rel_table[rpi].reshape(N, N, nH).transpose(2, 0, 1)        # (nH, N, N)
    nW = (Hh // ws) * (Ww // ws)
    full = jnp.broadcast_to(bias[None], (nW, nH, N, N))
    if shift > 0:
        mask = jnp.asarray(create_shift_mask(ws, shift, Hh, Ww))      # (nW, N, N)
        full = full + mask[:, None, :, :]
    return jnp.tile(full, (B, 1, 1, 1))


def _layernorm_ref(x, g, b):
    mu = x.mean(-1, keepdims=True)
    var = ((x - mu) ** 2).mean(-1, keepdims=True)
    return (x - mu) / jnp.sqrt(var + LN_EPS) * g + b


def swin_block_ref(x, p, bias_mask, shift, ws, Hh, Ww, nH):
    B, Lx, C = x.shape
    Dh = C // nH
    skip = x
    xn = _layernorm_ref(x, p["ln1_g"], p["ln1_b"])
    x4 = xn.reshape(B, Hh, Ww, C)
    if shift > 0:
        x4 = jnp.roll(x4, (-shift, -shift), axis=(1, 2))
    xw = window_partition(x4, ws)
    Bw, N, _ = xw.shape
    qkv = xw @ p["wqkv"] + p["bqkv"]
    q = qkv[..., :C].reshape(Bw, N, nH, Dh).transpose(0, 2, 1, 3)
    k = qkv[..., C:2 * C].reshape(Bw, N, nH, Dh).transpose(0, 2, 1, 3)
    v = qkv[..., 2 * C:].reshape(Bw, N, nH, Dh).transpose(0, 2, 1, 3)
    s = (q * Dh ** -0.5) @ jnp.swapaxes(k, -1, -2) + bias_mask
    attn = jax.nn.softmax(s, axis=-1)
    o = (attn @ v).transpose(0, 2, 1, 3).reshape(Bw, N, C)
    o = o @ p["wproj"] + p["bproj"]
    x4 = window_reverse(o, ws, Hh, Ww, B)
    if shift > 0:
        x4 = jnp.roll(x4, (shift, shift), axis=(1, 2))
    x = skip + x4.reshape(B, Lx, C)
    xn2 = _layernorm_ref(x, p["ln2_g"], p["ln2_b"])
    hmid = jax.nn.gelu(xn2 @ p["w1"] + p["b1"], approximate=False)
    y = hmid @ p["w2"] + p["b2"]
    return x + y


# ------------------------------------ main ------------------------------------
if __name__ == "__main__":
    key = jax.random.PRNGKey(0)
    kx, kp = jax.random.split(key)
    x = jax.random.normal(kx, (BATCH, H * W, DIM), jnp.float32)       # (B, L, C)

    pkeys = jax.random.split(kp, DEPTH)
    params = [init_block_params(pkeys[i], DIM, NUM_HEADS, WINDOW_SIZE, HIDDEN)
              for i in range(DEPTH)]

    kparams = stack_kernel_params(params, NUM_HEADS)
    # fused additive attention table over the un-permuted slab: (DEPTH*nH, L, L)
    bias_full = jnp.asarray(np.concatenate(
        [build_full_bias(np.asarray(params[i]["rel_table"]), SHIFTS[i])
         for i in range(DEPTH)], axis=0))

    @jax.jit
    def forward(inp):
        return swin_encoder_forward(inp, kparams, bias_full)

    out = jax.block_until_ready(forward(x))

    # correctness check against a pure-JAX (f32, exact erf-GELU) reference of the
    # PyTorch forward
    biases_ref = [build_attn_bias(params[i]["rel_table"], SHIFTS[i], WINDOW_SIZE,
                                  H, W, BATCH, NUM_HEADS) for i in range(DEPTH)]
    ref = x
    for i in range(DEPTH):
        ref = swin_block_ref(ref, params[i], biases_ref[i], SHIFTS[i],
                             WINDOW_SIZE, H, W, NUM_HEADS)
    ref = jax.block_until_ready(ref)

    assert out.shape == (BATCH, H * W, DIM)
    assert not bool(jnp.any(jnp.isnan(out)))
    max_err = float(jnp.max(jnp.abs(out - ref)))
    assert max_err < 5e-2, f"max abs err {max_err}"
    print("KERNEL_OK")
</pallas_src>

<mosaic_0001>
module attributes {stable_mosaic.version = 11 : i64} {
  func.func @swin_encoder_kernel(%arg0: i32, %arg1: memref<64x32xf32, #tpu.memory_space<vmem>>, %arg2: memref<2x1x32xf32, #tpu.memory_space<vmem>>, %arg3: memref<2x1x32xf32, #tpu.memory_space<vmem>>, %arg4: memref<2x32x96xbf16, #tpu.memory_space<vmem>>, %arg5: memref<2x1x96xf32, #tpu.memory_space<vmem>>, %arg6: memref<2x32x32xbf16, #tpu.memory_space<vmem>>, %arg7: memref<2x1x32xf32, #tpu.memory_space<vmem>>, %arg8: memref<2x1x32xf32, #tpu.memory_space<vmem>>, %arg9: memref<2x1x32xf32, #tpu.memory_space<vmem>>, %arg10: memref<2x32x128xbf16, #tpu.memory_space<vmem>>, %arg11: memref<2x1x128xf32, #tpu.memory_space<vmem>>, %arg12: memref<2x128x32xbf16, #tpu.memory_space<vmem>>, %arg13: memref<2x1x32xf32, #tpu.memory_space<vmem>>, %arg14: memref<8x64x64xf32, #tpu.memory_space<vmem>>, %arg15: memref<64x32xf32, #tpu.memory_space<vmem>>) attributes {dimension_semantics = [#tpu.dimension_semantics<parallel>], iteration_bounds = array<i64: 2>, scalar_prefetch = 0 : i64, scratch_operands = 0 : i64, tpu.core_type = #tpu.core_type<tc>, window_params = [{transform_indices = @transform_0, window_bounds = array<i64: 64, 32>}, {pipeline_mode = #tpu.pipeline_mode<synchronous>, transform_indices = @transform_1, window_bounds = array<i64: 2, 1, 32>}, {pipeline_mode = #tpu.pipeline_mode<synchronous>, transform_indices = @transform_2, window_bounds = array<i64: 2, 1, 32>}, {pipeline_mode = #tpu.pipeline_mode<synchronous>, transform_indices = @transform_3, window_bounds = array<i64: 2, 32, 96>}, {pipeline_mode = #tpu.pipeline_mode<synchronous>, transform_indices = @transform_4, window_bounds = array<i64: 2, 1, 96>}, {pipeline_mode = #tpu.pipeline_mode<synchronous>, transform_indices = @transform_5, window_bounds = array<i64: 2, 32, 32>}, {pipeline_mode = #tpu.pipeline_mode<synchronous>, transform_indices = @transform_6, window_bounds = array<i64: 2, 1, 32>}, {pipeline_mode = #tpu.pipeline_mode<synchronous>, transform_indices = @transform_7, window_bounds = array<i64: 2, 1, 32>}, {pipeline_mode = #tpu.pipeline_mode<synchronous>, transform_indices = @transform_8, window_bounds = array<i64: 2, 1, 32>}, {pipeline_mode = #tpu.pipeline_mode<synchronous>, transform_indices = @transform_9, window_bounds = array<i64: 2, 32, 128>}, {pipeline_mode = #tpu.pipeline_mode<synchronous>, transform_indices = @transform_10, window_bounds = array<i64: 2, 1, 128>}, {pipeline_mode = #tpu.pipeline_mode<synchronous>, transform_indices = @transform_11, window_bounds = array<i64: 2, 128, 32>}, {pipeline_mode = #tpu.pipeline_mode<synchronous>, transform_indices = @transform_12, window_bounds = array<i64: 2, 1, 32>}, {pipeline_mode = #tpu.pipeline_mode<synchronous>, transform_indices = @transform_13, window_bounds = array<i64: 8, 64, 64>}, {transform_indices = @transform_14, window_bounds = array<i64: 64, 32>}]} {
    %c0 = arith.constant 0 : index
    %c0_0 = arith.constant 0 : index
    %0 = vector.load %arg1[%c0, %c0_0] : memref<64x32xf32, #tpu.memory_space<vmem>>, vector<64x32xf32>
    %c0_1 = arith.constant 0 : index
    %c0_2 = arith.constant 0 : index
    %c0_3 = arith.constant 0 : index
    %1 = vector.load %arg2[%c0_1, %c0_2, %c0_3] : memref<2x1x32xf32, #tpu.memory_space<vmem>>, vector<1x1x32xf32>
    %2 = vector.shape_cast %1 : vector<1x1x32xf32> to vector<1x32xf32>
    %c0_4 = arith.constant 0 : index
    %c0_5 = arith.constant 0 : index
    %c0_6 = arith.constant 0 : index
    %3 = vector.load %arg3[%c0_4, %c0_5, %c0_6] : memref<2x1x32xf32, #tpu.memory_space<vmem>>, vector<1x1x32xf32>
    %4 = vector.shape_cast %3 : vector<1x1x32xf32> to vector<1x32xf32>
    %cst = arith.constant dense<0.000000e+00> : vector<64xf32>
    %5 = vector.multi_reduction <add>, %0, %cst [1] : vector<64x32xf32> to vector<64xf32>
    %6 = vector.shape_cast %5 : vector<64xf32> to vector<64x1xf32>
    %cst_7 = arith.constant 3.200000e+01 : f32
    %7 = vector.broadcast %cst_7 : f32 to vector<64x1xf32>
    %8 = arith.divf %6, %7 : vector<64x1xf32>
    %9 = vector.broadcast %8 : vector<64x1xf32> to vector<64x32xf32>
    %10 = arith.subf %0, %9 : vector<64x32xf32>
    %11 = arith.mulf %10, %10 : vector<64x32xf32>
    %cst_8 = arith.constant dense<0.000000e+00> : vector<64xf32>
    %12 = vector.multi_reduction <add>, %11, %cst_8 [1] : vector<64x32xf32> to vector<64xf32>
    %13 = vector.shape_cast %12 : vector<64xf32> to vector<64x1xf32>
    %cst_9 = arith.constant 3.200000e+01 : f32
    %14 = vector.broadcast %cst_9 : f32 to vector<64x1xf32>
    %15 = arith.divf %13, %14 : vector<64x1xf32>
    %16 = vector.broadcast %8 : vector<64x1xf32> to vector<64x32xf32>
    %17 = arith.subf %0, %16 : vector<64x32xf32>
    %cst_10 = arith.constant 9.99999974E-6 : f32
    %18 = vector.broadcast %cst_10 : f32 to vector<64x1xf32>
    %19 = arith.addf %15, %18 : vector<64x1xf32>
    %20 = math.rsqrt %19 : vector<64x1xf32>
    %21 = vector.broadcast %20 : vector<64x1xf32> to vector<64x32xf32>
    %22 = arith.mulf %17, %21 : vector<64x32xf32>
    %23 = vector.broadcast %2 : vector<1x32xf32> to vector<64x32xf32>
    %24 = arith.mulf %22, %23 : vector<64x32xf32>
    %25 = vector.broadcast %4 : vector<1x32xf32> to vector<64x32xf32>
    %26 = arith.addf %24, %25 : vector<64x32xf32>
    %27 = arith.truncf %26 : vector<64x32xf32> to vector<64x32xbf16>
    %c0_11 = arith.constant 0 : index
    %c0_12 = arith.constant 0 : index
    %c0_13 = arith.constant 0 : index
    %28 = vector.load %arg4[%c0_11, %c0_12, %c0_13] : memref<2x32x96xbf16, #tpu.memory_space<vmem>>, vector<1x32x96xbf16>
    %29 = vector.shape_cast %28 : vector<1x32x96xbf16> to vector<32x96xbf16>
    %cst_14 = arith.constant dense<0.000000e+00> : vector<64x96xf32>
    %30 = tpu.matmul %27, %29, %cst_14 {dimension_numbers = #tpu.dot_dimension_numbers<[1], [0], [0], [1], [0, 0, 1, 1], [], []>} : vector<64x32xbf16>, vector<32x96xbf16>, vector<64x96xf32> -> vector<64x96xf32>
    %c0_15 = arith.constant 0 : index
    %c0_16 = arith.constant 0 : index
    %c0_17 = arith.constant 0 : index
    %31 = vector.load %arg5[%c0_15, %c0_16, %c0_17] : memref<2x1x96xf32, #tpu.memory_space<vmem>>, vector<1x1x96xf32>
    %32 = vector.shape_cast %31 : vector<1x1x96xf32> to vector<1x96xf32>
    %33 = vector.broadcast %32 : vector<1x96xf32> to vector<64x96xf32>
    %34 = arith.addf %30, %33 : vector<64x96xf32>
    %35 = arith.truncf %34 : vector<64x96xf32> to vector<64x96xbf16>
    %36 = vector.extract_strided_slice %35 {offsets = [0, 0], sizes = [64, 8], strides = [1, 1]} : vector<64x96xbf16> to vector<64x8xbf16>
    %37 = vector.extract_strided_slice %35 {offsets = [0, 32], sizes = [64, 8], strides = [1, 1]} : vector<64x96xbf16> to vector<64x8xbf16>
    %38 = vector.extract_strided_slice %35 {offsets = [0, 64], sizes = [64, 8], strides = [1, 1]} : vector<64x96xbf16> to vector<64x8xbf16>
    %cst_18 = arith.constant dense<0.000000e+00> : vector<64x64xf32>
    %39 = tpu.matmul %36, %37, %cst_18 {dimension_numbers = #tpu.dot_dimension_numbers<[1], [1], [0], [0], [0, 0, 1, 0], [], []>} : vector<64x8xbf16>, vector<64x8xbf16>, vector<64x64xf32> -> vector<64x64xf32>
    %c0_19 = arith.constant 0 : index
    %c0_20 = arith.constant 0 : index
    %c0_21 = arith.constant 0 : index
    %40 = vector.load %arg14[%c0_19, %c0_20, %c0_21] : memref<8x64x64xf32, #tpu.memory_space<vmem>>, vector<1x64x64xf32>
    %41 = vector.shape_cast %40 : vector<1x64x64xf32> to vector<64x64xf32>
    %42 = arith.addf %39, %41 : vector<64x64xf32>
    %cst_22 = arith.constant dense<0xFF800000> : vector<64xf32>
    %43 = vector.multi_reduction <maximumf>, %42, %cst_22 [1] : vector<64x64xf32> to vector<64xf32>
    %44 = vector.shape_cast %43 : vector<64xf32> to vector<64x1xf32>
    %45 = vector.broadcast %44 : vector<64x1xf32> to vector<64x64xf32>
    %46 = arith.subf %42, %45 : vector<64x64xf32>
    %47 = math.exp %46 : vector<64x64xf32>
    %cst_23 = arith.constant dense<0.000000e+00> : vector<64xf32>
    %48 = vector.multi_reduction <add>, %47, %cst_23 [1] : vector<64x64xf32> to vector<64xf32>
    %49 = vector.shape_cast %48 : vector<64xf32> to vector<64x1xf32>
    %50 = tpu.reciprocal %49 {approx = true} : vector<64x1xf32> -> vector<64x1xf32>
    %51 = vector.broadcast %50 : vector<64x1xf32> to vector<64x64xf32>
    %52 = arith.mulf %47, %51 : vector<64x64xf32>
    %53 = arith.truncf %52 : vector<64x64xf32> to vector<64x64xbf16>
    %cst_24 = arith.constant dense<0.000000e+00> : vector<64x8xf32>
    %54 = tpu.matmul %53, %38, %cst_24 {dimension_numbers = #tpu.dot_dimension_numbers<[1], [0], [0], [1], [0, 0, 1, 1], [], []>} : vector<64x64xbf16>, vector<64x8xbf16>, vector<64x8xf32> -> vector<64x8xf32>
    %55 = vector.extract_strided_slice %35 {offsets = [0, 8], sizes = [64, 8], strides = [1, 1]} : vector<64x96xbf16> to vector<64x8xbf16>
    %56 = vector.extract_strided_slice %35 {offsets = [0, 40], sizes = [64, 8], strides = [1, 1]} : vector<64x96xbf16> to vector<64x8xbf16>
    %57 = vector.extract_strided_slice %35 {offsets = [0, 72], sizes = [64, 8], strides = [1, 1]} : vector<64x96xbf16> to vector<64x8xbf16>
    %cst_25 = arith.constant dense<0.000000e+00> : vector<64x64xf32>
    %58 = tpu.matmul %55, %56, %cst_25 {dimension_numbers = #tpu.dot_dimension_numbers<[1], [1], [0], [0], [0, 0, 1, 0], [], []>} : vector<64x8xbf16>, vector<64x8xbf16>, vector<64x64xf32> -> vector<64x64xf32>
    %c1 = arith.constant 1 : index
    %c0_26 = arith.constant 0 : index
    %c0_27 = arith.constant 0 : index
    %59 = vector.load %arg14[%c1, %c0_26, %c0_27] : memref<8x64x64xf32, #tpu.memory_space<vmem>>, vector<1x64x64xf32>
    %60 = vector.shape_cast %59 : vector<1x64x64xf32> to vector<64x64xf32>
    %61 = arith.addf %58, %60 : vector<64x64xf32>
    %cst_28 = arith.constant dense<0xFF800000> : vector<64xf32>
    %62 = vector.multi_reduction <maximumf>, %61, %cst_28 [1] : vector<64x64xf32> to vector<64xf32>
    %63 = vector.shape_cast %62 : vector<64xf32> to vector<64x1xf32>
    %64 = vector.broadcast %63 : vector<64x1xf32> to vector<64x64xf32>
    %65 = arith.subf %61, %64 : vector<64x64xf32>
    %66 = math.exp %65 : vector<64x64xf32>
    %cst_29 = arith.constant dense<0.000000e+00> : vector<64xf32>
    %67 = vector.multi_reduction <add>, %66, %cst_29 [1] : vector<64x64xf32> to vector<64xf32>
    %68 = vector.shape_cast %67 : vector<64xf32> to vector<64x1xf32>
    %69 = tpu.reciprocal %68 {approx = true} : vector<64x1xf32> -> vector<64x1xf32>
    %70 = vector.broadcast %69 : vector<64x1xf32> to vector<64x64xf32>
    %71 = arith.mulf %66, %70 : vector<64x64xf32>
    %72 = arith.truncf %71 : vector<64x64xf32> to vector<64x64xbf16>
    %cst_30 = arith.constant dense<0.000000e+00> : vector<64x8xf32>
    %73 = tpu.matmul %72, %57, %cst_30 {dimension_numbers = #tpu.dot_dimension_numbers<[1], [0], [0], [1], [0, 0, 1, 1], [], []>} : vector<64x64xbf16>, vector<64x8xbf16>, vector<64x8xf32> -> vector<64x8xf32>
    %74 = vector.extract_strided_slice %35 {offsets = [0, 16], sizes = [64, 8], strides = [1, 1]} : vector<64x96xbf16> to vector<64x8xbf16>
    %75 = vector.extract_strided_slice %35 {offsets = [0, 48], sizes = [64, 8], strides = [1, 1]} : vector<64x96xbf16> to vector<64x8xbf16>
    %76 = vector.extract_strided_slice %35 {offsets = [0, 80], sizes = [64, 8], strides = [1, 1]} : vector<64x96xbf16> to vector<64x8xbf16>
    %cst_31 = arith.constant dense<0.000000e+00> : vector<64x64xf32>
    %77 = tpu.matmul %74, %75, %cst_31 {dimension_numbers = #tpu.dot_dimension_numbers<[1], [1], [0], [0], [0, 0, 1, 0], [], []>} : vector<64x8xbf16>, vector<64x8xbf16>, vector<64x64xf32> -> vector<64x64xf32>
    %c2 = arith.constant 2 : index
    %c0_32 = arith.constant 0 : index
    %c0_33 = arith.constant 0 : index
    %78 = vector.load %arg14[%c2, %c0_32, %c0_33] : memref<8x64x64xf32, #tpu.memory_space<vmem>>, vector<1x64x64xf32>
    %79 = vector.shape_cast %78 : vector<1x64x64xf32> to vector<64x64xf32>
    %80 = arith.addf %77, %79 : vector<64x64xf32>
    %cst_34 = arith.constant dense<0xFF800000> : vector<64xf32>
    %81 = vector.multi_reduction <maximumf>, %80, %cst_34 [1] : vector<64x64xf32> to vector<64xf32>
    %82 = vector.shape_cast %81 : vector<64xf32> to vector<64x1xf32>
    %83 = vector.broadcast %82 : vector<64x1xf32> to vector<64x64xf32>
    %84 = arith.subf %80, %83 : vector<64x64xf32>
    %85 = math.exp %84 : vector<64x64xf32>
    %cst_35 = arith.constant dense<0.000000e+00> : vector<64xf32>
    %86 = vector.multi_reduction <add>, %85, %cst_35 [1] : vector<64x64xf32> to vector<64xf32>
    %87 = vector.shape_cast %86 : vector<64xf32> to vector<64x1xf32>
    %88 = tpu.reciprocal %87 {approx = true} : vector<64x1xf32> -> vector<64x1xf32>
    %89 = vector.broadcast %88 : vector<64x1xf32> to vector<64x64xf32>
    %90 = arith.mulf %85, %89 : vector<64x64xf32>
    %91 = arith.truncf %90 : vector<64x64xf32> to vector<64x64xbf16>
    %cst_36 = arith.constant dense<0.000000e+00> : vector<64x8xf32>
    %92 = tpu.matmul %91, %76, %cst_36 {dimension_numbers = #tpu.dot_dimension_numbers<[1], [0], [0], [1], [0, 0, 1, 1], [], []>} : vector<64x64xbf16>, vector<64x8xbf16>, vector<64x8xf32> -> vector<64x8xf32>
    %93 = vector.extract_strided_slice %35 {offsets = [0, 24], sizes = [64, 8], strides = [1, 1]} : vector<64x96xbf16> to vector<64x8xbf16>
    %94 = vector.extract_strided_slice %35 {offsets = [0, 56], sizes = [64, 8], strides = [1, 1]} : vector<64x96xbf16> to vector<64x8xbf16>
    %95 = vector.extract_strided_slice %35 {offsets = [0, 88], sizes = [64, 8], strides = [1, 1]} : vector<64x96xbf16> to vector<64x8xbf16>
    %cst_37 = arith.constant dense<0.000000e+00> : vector<64x64xf32>
    %96 = tpu.matmul %93, %94, %cst_37 {dimension_numbers = #tpu.dot_dimension_numbers<[1], [1], [0], [0], [0, 0, 1, 0], [], []>} : vector<64x8xbf16>, vector<64x8xbf16>, vector<64x64xf32> -> vector<64x64xf32>
    %c3 = arith.constant 3 : index
    %c0_38 = arith.constant 0 : index
    %c0_39 = arith.constant 0 : index
    %97 = vector.load %arg14[%c3, %c0_38, %c0_39] : memref<8x64x64xf32, #tpu.memory_space<vmem>>, vector<1x64x64xf32>
    %98 = vector.shape_cast %97 : vector<1x64x64xf32> to vector<64x64xf32>
    %99 = arith.addf %96, %98 : vector<64x64xf32>
    %cst_40 = arith.constant dense<0xFF800000> : vector<64xf32>
    %100 = vector.multi_reduction <maximumf>, %99, %cst_40 [1] : vector<64x64xf32> to vector<64xf32>
    %101 = vector.shape_cast %100 : vector<64xf32> to vector<64x1xf32>
    %102 = vector.broadcast %101 : vector<64x1xf32> to vector<64x64xf32>
    %103 = arith.subf %99, %102 : vector<64x64xf32>
    %104 = math.exp %103 : vector<64x64xf32>
    %cst_41 = arith.constant dense<0.000000e+00> : vector<64xf32>
    %105 = vector.multi_reduction <add>, %104, %cst_41 [1] : vector<64x64xf32> to vector<64xf32>
    %106 = vector.shape_cast %105 : vector<64xf32> to vector<64x1xf32>
    %107 = tpu.reciprocal %106 {approx = true} : vector<64x1xf32> -> vector<64x1xf32>
    %108 = vector.broadcast %107 : vector<64x1xf32> to vector<64x64xf32>
    %109 = arith.mulf %104, %108 : vector<64x64xf32>
    %110 = arith.truncf %109 : vector<64x64xf32> to vector<64x64xbf16>
    %cst_42 = arith.constant dense<0.000000e+00> : vector<64x8xf32>
    %111 = tpu.matmul %110, %95, %cst_42 {dimension_numbers = #tpu.dot_dimension_numbers<[1], [0], [0], [1], [0, 0, 1, 1], [], []>} : vector<64x64xbf16>, vector<64x8xbf16>, vector<64x8xf32> -> vector<64x8xf32>
    %112 = tpu.concatenate %54, %73, %92, %111 in 1 : vector<64x8xf32>, vector<64x8xf32>, vector<64x8xf32>, vector<64x8xf32> -> vector<64x32xf32>
    %113 = arith.truncf %112 : vector<64x32xf32> to vector<64x32xbf16>
    %c0_43 = arith.constant 0 : index
    %c0_44 = arith.constant 0 : index
    %c0_45 = arith.constant 0 : index
    %114 = vector.load %arg6[%c0_43, %c0_44, %c0_45] : memref<2x32x32xbf16, #tpu.memory_space<vmem>>, vector<1x32x32xbf16>
    %115 = vector.shape_cast %114 : vector<1x32x32xbf16> to vector<32x32xbf16>
    %cst_46 = arith.constant dense<0.000000e+00> : vector<64x32xf32>
    %116 = tpu.matmul %113, %115, %cst_46 {dimension_numbers = #tpu.dot_dimension_numbers<[1], [0], [0], [1], [0, 0, 1, 1], [], []>} : vector<64x32xbf16>, vector<32x32xbf16>, vector<64x32xf32> -> vector<64x32xf32>
    %c0_47 = arith.constant 0 : index
    %c0_48 = arith.constant 0 : index
    %c0_49 = arith.constant 0 : index
    %117 = vector.load %arg7[%c0_47, %c0_48, %c0_49] : memref<2x1x32xf32, #tpu.memory_space<vmem>>, vector<1x1x32xf32>
    %118 = vector.shape_cast %117 : vector<1x1x32xf32> to vector<1x32xf32>
    %119 = vector.broadcast %118 : vector<1x32xf32> to vector<64x32xf32>
    %120 = arith.addf %116, %119 : vector<64x32xf32>
    %121 = arith.addf %0, %120 : vector<64x32xf32>
    %c0_50 = arith.constant 0 : index
    %c0_51 = arith.constant 0 : index
    %c0_52 = arith.constant 0 : index
    %122 = vector.load %arg8[%c0_50, %c0_51, %c0_52] : memref<2x1x32xf32, #tpu.memory_space<vmem>>, vector<1x1x32xf32>
    %123 = vector.shape_cast %122 : vector<1x1x32xf32> to vector<1x32xf32>
    %c0_53 = arith.constant 0 : index
    %c0_54 = arith.constant 0 : index
    %c0_55 = arith.constant 0 : index
    %124 = vector.load %arg9[%c0_53, %c0_54, %c0_55] : memref<2x1x32xf32, #tpu.memory_space<vmem>>, vector<1x1x32xf32>
    %125 = vector.shape_cast %124 : vector<1x1x32xf32> to vector<1x32xf32>
    %cst_56 = arith.constant dense<0.000000e+00> : vector<64xf32>
    %126 = vector.multi_reduction <add>, %121, %cst_56 [1] : vector<64x32xf32> to vector<64xf32>
    %127 = vector.shape_cast %126 : vector<64xf32> to vector<64x1xf32>
    %cst_57 = arith.constant 3.200000e+01 : f32
    %128 = vector.broadcast %cst_57 : f32 to vector<64x1xf32>
    %129 = arith.divf %127, %128 : vector<64x1xf32>
    %130 = vector.broadcast %129 : vector<64x1xf32> to vector<64x32xf32>
    %131 = arith.subf %121, %130 : vector<64x32xf32>
    %132 = arith.mulf %131, %131 : vector<64x32xf32>
    %cst_58 = arith.constant dense<0.000000e+00> : vector<64xf32>
    %133 = vector.multi_reduction <add>, %132, %cst_58 [1] : vector<64x32xf32> to vector<64xf32>
    %134 = vector.shape_cast %133 : vector<64xf32> to vector<64x1xf32>
    %cst_59 = arith.constant 3.200000e+01 : f32
    %135 = vector.broadcast %cst_59 : f32 to vector<64x1xf32>
    %136 = arith.divf %134, %135 : vector<64x1xf32>
    %137 = vector.broadcast %129 : vector<64x1xf32> to vector<64x32xf32>
    %138 = arith.subf %121, %137 : vector<64x32xf32>
    %cst_60 = arith.constant 9.99999974E-6 : f32
    %139 = vector.broadcast %cst_60 : f32 to vector<64x1xf32>
    %140 = arith.addf %136, %139 : vector<64x1xf32>
    %141 = math.rsqrt %140 : vector<64x1xf32>
    %142 = vector.broadcast %141 : vector<64x1xf32> to vector<64x32xf32>
    %143 = arith.mulf %138, %142 : vector<64x32xf32>
    %144 = vector.broadcast %123 : vector<1x32xf32> to vector<64x32xf32>
    %145 = arith.mulf %143, %144 : vector<64x32xf32>
    %146 = vector.broadcast %125 : vector<1x32xf32> to vector<64x32xf32>
    %147 = arith.addf %145, %146 : vector<64x32xf32>
    %148 = arith.truncf %147 : vector<64x32xf32> to vector<64x32xbf16>
    %c0_61 = arith.constant 0 : index
    %c0_62 = arith.constant 0 : index
    %c0_63 = arith.constant 0 : index
    %149 = vector.load %arg10[%c0_61, %c0_62, %c0_63] : memref<2x32x128xbf16, #tpu.memory_space<vmem>>, vector<1x32x128xbf16>
    %150 = vector.shape_cast %149 : vector<1x32x128xbf16> to vector<32x128xbf16>
    %cst_64 = arith.constant dense<0.000000e+00> : vector<64x128xf32>
    %151 = tpu.matmul %148, %150, %cst_64 {dimension_numbers = #tpu.dot_dimension_numbers<[1], [0], [0], [1], [0, 0, 1, 1], [], []>} : vector<64x32xbf16>, vector<32x128xbf16>, vector<64x128xf32> -> vector<64x128xf32>
    %c0_65 = arith.constant 0 : index
    %c0_66 = arith.constant 0 : index
    %c0_67 = arith.constant 0 : index
    %152 = vector.load %arg11[%c0_65, %c0_66, %c0_67] : memref<2x1x128xf32, #tpu.memory_space<vmem>>, vector<1x1x128xf32>
    %153 = vector.shape_cast %152 : vector<1x1x128xf32> to vector<1x128xf32>
    %154 = vector.broadcast %153 : vector<1x128xf32> to vector<64x128xf32>
    %155 = arith.addf %151, %154 : vector<64x128xf32>
    %cst_68 = arith.constant 5.000000e-01 : f32
    %156 = vector.broadcast %cst_68 : f32 to vector<64x128xf32>
    %157 = arith.mulf %156, %155 : vector<64x128xf32>
    %cst_69 = arith.constant 4.471500e-02 : f32
    %158 = vector.broadcast %cst_69 : f32 to vector<64x128xf32>
    %159 = arith.mulf %158, %155 : vector<64x128xf32>
    %160 = arith.mulf %159, %155 : vector<64x128xf32>
    %161 = arith.mulf %160, %155 : vector<64x128xf32>
    %162 = arith.addf %155, %161 : vector<64x128xf32>
    %cst_70 = arith.constant 0.797884583 : f32
    %163 = vector.broadcast %cst_70 : f32 to vector<64x128xf32>
    %164 = arith.mulf %163, %162 : vector<64x128xf32>
    %165 = math.tanh %164 : vector<64x128xf32>
    %cst_71 = arith.constant 1.000000e+00 : f32
    %166 = vector.broadcast %cst_71 : f32 to vector<64x128xf32>
    %167 = arith.addf %166, %165 : vector<64x128xf32>
    %168 = arith.mulf %157, %167 : vector<64x128xf32>
    %169 = arith.truncf %168 : vector<64x128xf32> to vector<64x128xbf16>
    %c0_72 = arith.constant 0 : index
    %c0_73 = arith.constant 0 : index
    %c0_74 = arith.constant 0 : index
    %170 = vector.load %arg12[%c0_72, %c0_73, %c0_74] : memref<2x128x32xbf16, #tpu.memory_space<vmem>>, vector<1x128x32xbf16>
    %171 = vector.shape_cast %170 : vector<1x128x32xbf16> to vector<128x32xbf16>
    %cst_75 = arith.constant dense<0.000000e+00> : vector<64x32xf32>
    %172 = tpu.matmul %169, %171, %cst_75 {dimension_numbers = #tpu.dot_dimension_numbers<[1], [0], [0], [1], [0, 0, 1, 1], [], []>} : vector<64x128xbf16>, vector<128x32xbf16>, vector<64x32xf32> -> vector<64x32xf32>
    %c0_76 = arith.constant 0 : index
    %c0_77 = arith.constant 0 : index
    %c0_78 = arith.constant 0 : index
    %173 = vector.load %arg13[%c0_76, %c0_77, %c0_78] : memref<2x1x32xf32, #tpu.memory_space<vmem>>, vector<1x1x32xf32>
    %174 = vector.shape_cast %173 : vector<1x1x32xf32> to vector<1x32xf32>
    %175 = vector.broadcast %174 : vector<1x32xf32> to vector<64x32xf32>
    %176 = arith.addf %172, %175 : vector<64x32xf32>
    %177 = arith.addf %121, %176 : vector<64x32xf32>
    %c1_79 = arith.constant 1 : index
    %c0_80 = arith.constant 0 : index
    %c0_81 = arith.constant 0 : index
    %178 = vector.load %arg2[%c1_79, %c0_80, %c0_81] : memref<2x1x32xf32, #tpu.memory_space<vmem>>, vector<1x1x32xf32>
    %179 = vector.shape_cast %178 : vector<1x1x32xf32> to vector<1x32xf32>
    %c1_82 = arith.constant 1 : index
    %c0_83 = arith.constant 0 : index
    %c0_84 = arith.constant 0 : index
    %180 = vector.load %arg3[%c1_82, %c0_83, %c0_84] : memref<2x1x32xf32, #tpu.memory_space<vmem>>, vector<1x1x32xf32>
    %181 = vector.shape_cast %180 : vector<1x1x32xf32> to vector<1x32xf32>
    %cst_85 = arith.constant dense<0.000000e+00> : vector<64xf32>
    %182 = vector.multi_reduction <add>, %177, %cst_85 [1] : vector<64x32xf32> to vector<64xf32>
    %183 = vector.shape_cast %182 : vector<64xf32> to vector<64x1xf32>
    %cst_86 = arith.constant 3.200000e+01 : f32
    %184 = vector.broadcast %cst_86 : f32 to vector<64x1xf32>
    %185 = arith.divf %183, %184 : vector<64x1xf32>
    %186 = vector.broadcast %185 : vector<64x1xf32> to vector<64x32xf32>
    %187 = arith.subf %177, %186 : vector<64x32xf32>
    %188 = arith.mulf %187, %187 : vector<64x32xf32>
    %cst_87 = arith.constant dense<0.000000e+00> : vector<64xf32>
    %189 = vector.multi_reduction <add>, %188, %cst_87 [1] : vector<64x32xf32> to vector<64xf32>
    %190 = vector.shape_cast %189 : vector<64xf32> to vector<64x1xf32>
    %cst_88 = arith.constant 3.200000e+01 : f32
    %191 = vector.broadcast %cst_88 : f32 to vector<64x1xf32>
    %192 = arith.divf %190, %191 : vector<64x1xf32>
    %193 = vector.broadcast %185 : vector<64x1xf32> to vector<64x32xf32>
    %194 = arith.subf %177, %193 : vector<64x32xf32>
    %cst_89 = arith.constant 9.99999974E-6 : f32
    %195 = vector.broadcast %cst_89 : f32 to vector<64x1xf32>
    %196 = arith.addf %192, %195 : vector<64x1xf32>
    %197 = math.rsqrt %196 : vector<64x1xf32>
    %198 = vector.broadcast %197 : vector<64x1xf32> to vector<64x32xf32>
    %199 = arith.mulf %194, %198 : vector<64x32xf32>
    %200 = vector.broadcast %179 : vector<1x32xf32> to vector<64x32xf32>
    %201 = arith.mulf %199, %200 : vector<64x32xf32>
    %202 = vector.broadcast %181 : vector<1x32xf32> to vector<64x32xf32>
    %203 = arith.addf %201, %202 : vector<64x32xf32>
    %204 = arith.truncf %203 : vector<64x32xf32> to vector<64x32xbf16>
    %c1_90 = arith.constant 1 : index
    %c0_91 = arith.constant 0 : index
    %c0_92 = arith.constant 0 : index
    %205 = vector.load %arg4[%c1_90, %c0_91, %c0_92] : memref<2x32x96xbf16, #tpu.memory_space<vmem>>, vector<1x32x96xbf16>
    %206 = vector.shape_cast %205 : vector<1x32x96xbf16> to vector<32x96xbf16>
    %cst_93 = arith.constant dense<0.000000e+00> : vector<64x96xf32>
    %207 = tpu.matmul %204, %206, %cst_93 {dimension_numbers = #tpu.dot_dimension_numbers<[1], [0], [0], [1], [0, 0, 1, 1], [], []>} : vector<64x32xbf16>, vector<32x96xbf16>, vector<64x96xf32> -> vector<64x96xf32>
    %c1_94 = arith.constant 1 : index
    %c0_95 = arith.constant 0 : index
    %c0_96 = arith.constant 0 : index
    %208 = vector.load %arg5[%c1_94, %c0_95, %c0_96] : memref<2x1x96xf32, #tpu.memory_space<vmem>>, vector<1x1x96xf32>
    %209 = vector.shape_cast %208 : vector<1x1x96xf32> to vector<1x96xf32>
    %210 = vector.broadcast %209 : vector<1x96xf32> to vector<64x96xf32>
    %211 = arith.addf %207, %210 : vector<64x96xf32>
    %212 = arith.truncf %211 : vector<64x96xf32> to vector<64x96xbf16>
    %213 = vector.extract_strided_slice %212 {offsets = [0, 0], sizes = [64, 8], strides = [1, 1]} : vector<64x96xbf16> to vector<64x8xbf16>
    %214 = vector.extract_strided_slice %212 {offsets = [0, 32], sizes = [64, 8], strides = [1, 1]} : vector<64x96xbf16> to vector<64x8xbf16>
    %215 = vector.extract_strided_slice %212 {offsets = [0, 64], sizes = [64, 8], strides = [1, 1]} : vector<64x96xbf16> to vector<64x8xbf16>
    %cst_97 = arith.constant dense<0.000000e+00> : vector<64x64xf32>
    %216 = tpu.matmul %213, %214, %cst_97 {dimension_numbers = #tpu.dot_dimension_numbers<[1], [1], [0], [0], [0, 0, 1, 0], [], []>} : vector<64x8xbf16>, vector<64x8xbf16>, vector<64x64xf32> -> vector<64x64xf32>
    %c4 = arith.constant 4 : index
    %c0_98 = arith.constant 0 : index
    %c0_99 = arith.constant 0 : index
    %217 = vector.load %arg14[%c4, %c0_98, %c0_99] : memref<8x64x64xf32, #tpu.memory_space<vmem>>, vector<1x64x64xf32>
    %218 = vector.shape_cast %217 : vector<1x64x64xf32> to vector<64x64xf32>
    %219 = arith.addf %216, %218 : vector<64x64xf32>
    %cst_100 = arith.constant dense<0xFF800000> : vector<64xf32>
    %220 = vector.multi_reduction <maximumf>, %219, %cst_100 [1] : vector<64x64xf32> to vector<64xf32>
    %221 = vector.shape_cast %220 : vector<64xf32> to vector<64x1xf32>
    %222 = vector.broadcast %221 : vector<64x1xf32> to vector<64x64xf32>
    %223 = arith.subf %219, %222 : vector<64x64xf32>
    %224 = math.exp %223 : vector<64x64xf32>
    %cst_101 = arith.constant dense<0.000000e+00> : vector<64xf32>
    %225 = vector.multi_reduction <add>, %224, %cst_101 [1] : vector<64x64xf32> to vector<64xf32>
    %226 = vector.shape_cast %225 : vector<64xf32> to vector<64x1xf32>
    %227 = tpu.reciprocal %226 {approx = true} : vector<64x1xf32> -> vector<64x1xf32>
    %228 = vector.broadcast %227 : vector<64x1xf32> to vector<64x64xf32>
    %229 = arith.mulf %224, %228 : vector<64x64xf32>
    %230 = arith.truncf %229 : vector<64x64xf32> to vector<64x64xbf16>
    %cst_102 = arith.constant dense<0.000000e+00> : vector<64x8xf32>
    %231 = tpu.matmul %230, %215, %cst_102 {dimension_numbers = #tpu.dot_dimension_numbers<[1], [0], [0], [1], [0, 0, 1, 1], [], []>} : vector<64x64xbf16>, vector<64x8xbf16>, vector<64x8xf32> -> vector<64x8xf32>
    %232 = vector.extract_strided_slice %212 {offsets = [0, 8], sizes = [64, 8], strides = [1, 1]} : vector<64x96xbf16> to vector<64x8xbf16>
    %233 = vector.extract_strided_slice %212 {offsets = [0, 40], sizes = [64, 8], strides = [1, 1]} : vector<64x96xbf16> to vector<64x8xbf16>
    %234 = vector.extract_strided_slice %212 {offsets = [0, 72], sizes = [64, 8], strides = [1, 1]} : vector<64x96xbf16> to vector<64x8xbf16>
    %cst_103 = arith.constant dense<0.000000e+00> : vector<64x64xf32>
    %235 = tpu.matmul %232, %233, %cst_103 {dimension_numbers = #tpu.dot_dimension_numbers<[1], [1], [0], [0], [0, 0, 1, 0], [], []>} : vector<64x8xbf16>, vector<64x8xbf16>, vector<64x64xf32> -> vector<64x64xf32>
    %c5 = arith.constant 5 : index
    %c0_104 = arith.constant 0 : index
    %c0_105 = arith.constant 0 : index
    %236 = vector.load %arg14[%c5, %c0_104, %c0_105] : memref<8x64x64xf32, #tpu.memory_space<vmem>>, vector<1x64x64xf32>
    %237 = vector.shape_cast %236 : vector<1x64x64xf32> to vector<64x64xf32>
    %238 = arith.addf %235, %237 : vector<64x64xf32>
    %cst_106 = arith.constant dense<0xFF800000> : vector<64xf32>
    %239 = vector.multi_reduction <maximumf>, %238, %cst_106 [1] : vector<64x64xf32> to vector<64xf32>
    %240 = vector.shape_cast %239 : vector<64xf32> to vector<64x1xf32>
    %241 = vector.broadcast %240 : vector<64x1xf32> to vector<64x64xf32>
    %242 = arith.subf %238, %241 : vector<64x64xf32>
    %243 = math.exp %242 : vector<64x64xf32>
    %cst_107 = arith.constant dense<0.000000e+00> : vector<64xf32>
    %244 = vector.multi_reduction <add>, %243, %cst_107 [1] : vector<64x64xf32> to vector<64xf32>
    %245 = vector.shape_cast %244 : vector<64xf32> to vector<64x1xf32>
    %246 = tpu.reciprocal %245 {approx = true} : vector<64x1xf32> -> vector<64x1xf32>
    %247 = vector.broadcast %246 : vector<64x1xf32> to vector<64x64xf32>
    %248 = arith.mulf %243, %247 : vector<64x64xf32>
    %249 = arith.truncf %248 : vector<64x64xf32> to vector<64x64xbf16>
    %cst_108 = arith.constant dense<0.000000e+00> : vector<64x8xf32>
    %250 = tpu.matmul %249, %234, %cst_108 {dimension_numbers = #tpu.dot_dimension_numbers<[1], [0], [0], [1], [0, 0, 1, 1], [], []>} : vector<64x64xbf16>, vector<64x8xbf16>, vector<64x8xf32> -> vector<64x8xf32>
    %251 = vector.extract_strided_slice %212 {offsets = [0, 16], sizes = [64, 8], strides = [1, 1]} : vector<64x96xbf16> to vector<64x8xbf16>
    %252 = vector.extract_strided_slice %212 {offsets = [0, 48], sizes = [64, 8], strides = [1, 1]} : vector<64x96xbf16> to vector<64x8xbf16>
    %253 = vector.extract_strided_slice %212 {offsets = [0, 80], sizes = [64, 8], strides = [1, 1]} : vector<64x96xbf16> to vector<64x8xbf16>
    %cst_109 = arith.constant dense<0.000000e+00> : vector<64x64xf32>
    %254 = tpu.matmul %251, %252, %cst_109 {dimension_numbers = #tpu.dot_dimension_numbers<[1], [1], [0], [0], [0, 0, 1, 0], [], []>} : vector<64x8xbf16>, vector<64x8xbf16>, vector<64x64xf32> -> vector<64x64xf32>
    %c6 = arith.constant 6 : index
    %c0_110 = arith.constant 0 : index
    %c0_111 = arith.constant 0 : index
    %255 = vector.load %arg14[%c6, %c0_110, %c0_111] : memref<8x64x64xf32, #tpu.memory_space<vmem>>, vector<1x64x64xf32>
    %256 = vector.shape_cast %255 : vector<1x64x64xf32> to vector<64x64xf32>
    %257 = arith.addf %254, %256 : vector<64x64xf32>
    %cst_112 = arith.constant dense<0xFF800000> : vector<64xf32>
    %258 = vector.multi_reduction <maximumf>, %257, %cst_112 [1] : vector<64x64xf32> to vector<64xf32>
    %259 = vector.shape_cast %258 : vector<64xf32> to vector<64x1xf32>
    %260 = vector.broadcast %259 : vector<64x1xf32> to vector<64x64xf32>
    %261 = arith.subf %257, %260 : vector<64x64xf32>
    %262 = math.exp %261 : vector<64x64xf32>
    %cst_113 = arith.constant dense<0.000000e+00> : vector<64xf32>
    %263 = vector.multi_reduction <add>, %262, %cst_113 [1] : vector<64x64xf32> to vector<64xf32>
    %264 = vector.shape_cast %263 : vector<64xf32> to vector<64x1xf32>
    %265 = tpu.reciprocal %264 {approx = true} : vector<64x1xf32> -> vector<64x1xf32>
    %266 = vector.broadcast %265 : vector<64x1xf32> to vector<64x64xf32>
    %267 = arith.mulf %262, %266 : vector<64x64xf32>
    %268 = arith.truncf %267 : vector<64x64xf32> to vector<64x64xbf16>
    %cst_114 = arith.constant dense<0.000000e+00> : vector<64x8xf32>
    %269 = tpu.matmul %268, %253, %cst_114 {dimension_numbers = #tpu.dot_dimension_numbers<[1], [0], [0], [1], [0, 0, 1, 1], [], []>} : vector<64x64xbf16>, vector<64x8xbf16>, vector<64x8xf32> -> vector<64x8xf32>
    %270 = vector.extract_strided_slice %212 {offsets = [0, 24], sizes = [64, 8], strides = [1, 1]} : vector<64x96xbf16> to vector<64x8xbf16>
    %271 = vector.extract_strided_slice %212 {offsets = [0, 56], sizes = [64, 8], strides = [1, 1]} : vector<64x96xbf16> to vector<64x8xbf16>
    %272 = vector.extract_strided_slice %212 {offsets = [0, 88], sizes = [64, 8], strides = [1, 1]} : vector<64x96xbf16> to vector<64x8xbf16>
    %cst_115 = arith.constant dense<0.000000e+00> : vector<64x64xf32>
    %273 = tpu.matmul %270, %271, %cst_115 {dimension_numbers = #tpu.dot_dimension_numbers<[1], [1], [0], [0], [0, 0, 1, 0], [], []>} : vector<64x8xbf16>, vector<64x8xbf16>, vector<64x64xf32> -> vector<64x64xf32>
    %c7 = arith.constant 7 : index
    %c0_116 = arith.constant 0 : index
    %c0_117 = arith.constant 0 : index
    %274 = vector.load %arg14[%c7, %c0_116, %c0_117] : memref<8x64x64xf32, #tpu.memory_space<vmem>>, vector<1x64x64xf32>
    %275 = vector.shape_cast %274 : vector<1x64x64xf32> to vector<64x64xf32>
    %276 = arith.addf %273, %275 : vector<64x64xf32>
    %cst_118 = arith.constant dense<0xFF800000> : vector<64xf32>
    %277 = vector.multi_reduction <maximumf>, %276, %cst_118 [1] : vector<64x64xf32> to vector<64xf32>
    %278 = vector.shape_cast %277 : vector<64xf32> to vector<64x1xf32>
    %279 = vector.broadcast %278 : vector<64x1xf32> to vector<64x64xf32>
    %280 = arith.subf %276, %279 : vector<64x64xf32>
    %281 = math.exp %280 : vector<64x64xf32>
    %cst_119 = arith.constant dense<0.000000e+00> : vector<64xf32>
    %282 = vector.multi_reduction <add>, %281, %cst_119 [1] : vector<64x64xf32> to vector<64xf32>
    %283 = vector.shape_cast %282 : vector<64xf32> to vector<64x1xf32>
    %284 = tpu.reciprocal %283 {approx = true} : vector<64x1xf32> -> vector<64x1xf32>
    %285 = vector.broadcast %284 : vector<64x1xf32> to vector<64x64xf32>
    %286 = arith.mulf %281, %285 : vector<64x64xf32>
    %287 = arith.truncf %286 : vector<64x64xf32> to vector<64x64xbf16>
    %cst_120 = arith.constant dense<0.000000e+00> : vector<64x8xf32>
    %288 = tpu.matmul %287, %272, %cst_120 {dimension_numbers = #tpu.dot_dimension_numbers<[1], [0], [0], [1], [0, 0, 1, 1], [], []>} : vector<64x64xbf16>, vector<64x8xbf16>, vector<64x8xf32> -> vector<64x8xf32>
    %289 = tpu.concatenate %231, %250, %269, %288 in 1 : vector<64x8xf32>, vector<64x8xf32>, vector<64x8xf32>, vector<64x8xf32> -> vector<64x32xf32>
    %290 = arith.truncf %289 : vector<64x32xf32> to vector<64x32xbf16>
    %c1_121 = arith.constant 1 : index
    %c0_122 = arith.constant 0 : index
    %c0_123 = arith.constant 0 : index
    %291 = vector.load %arg6[%c1_121, %c0_122, %c0_123] : memref<2x32x32xbf16, #tpu.memory_space<vmem>>, vector<1x32x32xbf16>
    %292 = vector.shape_cast %291 : vector<1x32x32xbf16> to vector<32x32xbf16>
    %cst_124 = arith.constant dense<0.000000e+00> : vector<64x32xf32>
    %293 = tpu.matmul %290, %292, %cst_124 {dimension_numbers = #tpu.dot_dimension_numbers<[1], [0], [0], [1], [0, 0, 1, 1], [], []>} : vector<64x32xbf16>, vector<32x32xbf16>, vector<64x32xf32> -> vector<64x32xf32>
    %c1_125 = arith.constant 1 : index
    %c0_126 = arith.constant 0 : index
    %c0_127 = arith.constant 0 : index
    %294 = vector.load %arg7[%c1_125, %c0_126, %c0_127] : memref<2x1x32xf32, #tpu.memory_space<vmem>>, vector<1x1x32xf32>
    %295 = vector.shape_cast %294 : vector<1x1x32xf32> to vector<1x32xf32>
    %296 = vector.broadcast %295 : vector<1x32xf32> to vector<64x32xf32>
    %297 = arith.addf %293, %296 : vector<64x32xf32>
    %298 = arith.addf %177, %297 : vector<64x32xf32>
    %c1_128 = arith.constant 1 : index
    %c0_129 = arith.constant 0 : index
    %c0_130 = arith.constant 0 : index
    %299 = vector.load %arg8[%c1_128, %c0_129, %c0_130] : memref<2x1x32xf32, #tpu.memory_space<vmem>>, vector<1x1x32xf32>
    %300 = vector.shape_cast %299 : vector<1x1x32xf32> to vector<1x32xf32>
    %c1_131 = arith.constant 1 : index
    %c0_132 = arith.constant 0 : index
    %c0_133 = arith.constant 0 : index
    %301 = vector.load %arg9[%c1_131, %c0_132, %c0_133] : memref<2x1x32xf32, #tpu.memory_space<vmem>>, vector<1x1x32xf32>
    %302 = vector.shape_cast %301 : vector<1x1x32xf32> to vector<1x32xf32>
    %cst_134 = arith.constant dense<0.000000e+00> : vector<64xf32>
    %303 = vector.multi_reduction <add>, %298, %cst_134 [1] : vector<64x32xf32> to vector<64xf32>
    %304 = vector.shape_cast %303 : vector<64xf32> to vector<64x1xf32>
    %cst_135 = arith.constant 3.200000e+01 : f32
    %305 = vector.broadcast %cst_135 : f32 to vector<64x1xf32>
    %306 = arith.divf %304, %305 : vector<64x1xf32>
    %307 = vector.broadcast %306 : vector<64x1xf32> to vector<64x32xf32>
    %308 = arith.subf %298, %307 : vector<64x32xf32>
    %309 = arith.mulf %308, %308 : vector<64x32xf32>
    %cst_136 = arith.constant dense<0.000000e+00> : vector<64xf32>
    %310 = vector.multi_reduction <add>, %309, %cst_136 [1] : vector<64x32xf32> to vector<64xf32>
    %311 = vector.shape_cast %310 : vector<64xf32> to vector<64x1xf32>
    %cst_137 = arith.constant 3.200000e+01 : f32
    %312 = vector.broadcast %cst_137 : f32 to vector<64x1xf32>
    %313 = arith.divf %311, %312 : vector<64x1xf32>
    %314 = vector.broadcast %306 : vector<64x1xf32> to vector<64x32xf32>
    %315 = arith.subf %298, %314 : vector<64x32xf32>
    %cst_138 = arith.constant 9.99999974E-6 : f32
    %316 = vector.broadcast %cst_138 : f32 to vector<64x1xf32>
    %317 = arith.addf %313, %316 : vector<64x1xf32>
    %318 = math.rsqrt %317 : vector<64x1xf32>
    %319 = vector.broadcast %318 : vector<64x1xf32> to vector<64x32xf32>
    %320 = arith.mulf %315, %319 : vector<64x32xf32>
    %321 = vector.broadcast %300 : vector<1x32xf32> to vector<64x32xf32>
    %322 = arith.mulf %320, %321 : vector<64x32xf32>
    %323 = vector.broadcast %302 : vector<1x32xf32> to vector<64x32xf32>
    %324 = arith.addf %322, %323 : vector<64x32xf32>
    %325 = arith.truncf %324 : vector<64x32xf32> to vector<64x32xbf16>
    %c1_139 = arith.constant 1 : index
    %c0_140 = arith.constant 0 : index
    %c0_141 = arith.constant 0 : index
    %326 = vector.load %arg10[%c1_139, %c0_140, %c0_141] : memref<2x32x128xbf16, #tpu.memory_space<vmem>>, vector<1x32x128xbf16>
    %327 = vector.shape_cast %326 : vector<1x32x128xbf16> to vector<32x128xbf16>
    %cst_142 = arith.constant dense<0.000000e+00> : vector<64x128xf32>
    %328 = tpu.matmul %325, %327, %cst_142 {dimension_numbers = #tpu.dot_dimension_numbers<[1], [0], [0], [1], [0, 0, 1, 1], [], []>} : vector<64x32xbf16>, vector<32x128xbf16>, vector<64x128xf32> -> vector<64x128xf32>
    %c1_143 = arith.constant 1 : index
    %c0_144 = arith.constant 0 : index
    %c0_145 = arith.constant 0 : index
    %329 = vector.load %arg11[%c1_143, %c0_144, %c0_145] : memref<2x1x128xf32, #tpu.memory_space<vmem>>, vector<1x1x128xf32>
    %330 = vector.shape_cast %329 : vector<1x1x128xf32> to vector<1x128xf32>
    %331 = vector.broadcast %330 : vector<1x128xf32> to vector<64x128xf32>
    %332 = arith.addf %328, %331 : vector<64x128xf32>
    %cst_146 = arith.constant 5.000000e-01 : f32
    %333 = vector.broadcast %cst_146 : f32 to vector<64x128xf32>
    %334 = arith.mulf %333, %332 : vector<64x128xf32>
    %cst_147 = arith.constant 4.471500e-02 : f32
    %335 = vector.broadcast %cst_147 : f32 to vector<64x128xf32>
    %336 = arith.mulf %335, %332 : vector<64x128xf32>
    %337 = arith.mulf %336, %332 : vector<64x128xf32>
    %338 = arith.mulf %337, %332 : vector<64x128xf32>
    %339 = arith.addf %332, %338 : vector<64x128xf32>
    %cst_148 = arith.constant 0.797884583 : f32
    %340 = vector.broadcast %cst_148 : f32 to vector<64x128xf32>
    %341 = arith.mulf %340, %339 : vector<64x128xf32>
    %342 = math.tanh %341 : vector<64x128xf32>
    %cst_149 = arith.constant 1.000000e+00 : f32
    %343 = vector.broadcast %cst_149 : f32 to vector<64x128xf32>
    %344 = arith.addf %343, %342 : vector<64x128xf32>
    %345 = arith.mulf %334, %344 : vector<64x128xf32>
    %346 = arith.truncf %345 : vector<64x128xf32> to vector<64x128xbf16>
    %c1_150 = arith.constant 1 : index
    %c0_151 = arith.constant 0 : index
    %c0_152 = arith.constant 0 : index
    %347 = vector.load %arg12[%c1_150, %c0_151, %c0_152] : memref<2x128x32xbf16, #tpu.memory_space<vmem>>, vector<1x128x32xbf16>
    %348 = vector.shape_cast %347 : vector<1x128x32xbf16> to vector<128x32xbf16>
    %cst_153 = arith.constant dense<0.000000e+00> : vector<64x32xf32>
    %349 = tpu.matmul %346, %348, %cst_153 {dimension_numbers = #tpu.dot_dimension_numbers<[1], [0], [0], [1], [0, 0, 1, 1], [], []>} : vector<64x128xbf16>, vector<128x32xbf16>, vector<64x32xf32> -> vector<64x32xf32>
    %c1_154 = arith.constant 1 : index
    %c0_155 = arith.constant 0 : index
    %c0_156 = arith.constant 0 : index
    %350 = vector.load %arg13[%c1_154, %c0_155, %c0_156] : memref<2x1x32xf32, #tpu.memory_space<vmem>>, vector<1x1x32xf32>
    %351 = vector.shape_cast %350 : vector<1x1x32xf32> to vector<1x32xf32>
    %352 = vector.broadcast %351 : vector<1x32xf32> to vector<64x32xf32>
    %353 = arith.addf %349, %352 : vector<64x32xf32>
    %354 = arith.addf %298, %353 : vector<64x32xf32>
    %c0_157 = arith.constant 0 : index
    %c0_158 = arith.constant 0 : index
    %355 = vector.load %arg15[%c0_157, %c0_158] : memref<64x32xf32, #tpu.memory_space<vmem>>, vector<64x32xf32>
    tpu.vector_store %arg15[%c0_157, %c0_158], %354 {strides = array<i32>} : memref<64x32xf32, #tpu.memory_space<vmem>>, vector<64x32xf32>,
    return
  }
  func.func @transform_0(%arg0: i32) -> (i32, i32) {
    %c0_i32 = arith.constant 0 : i32
    %c0_i32_0 = arith.constant 0 : i32
    return %arg0, %c0_i32 : i32, i32
  }
  func.func @transform_1(%arg0: i32) -> (i32, i32, i32) {
    %c0_i32 = arith.constant 0 : i32
    %c0_i32_0 = arith.constant 0 : i32
    %c0_i32_1 = arith.constant 0 : i32
    %c0_i32_2 = arith.constant 0 : i32
    return %c0_i32, %c0_i32_0, %c0_i32_1 : i32, i32, i32
  }
  func.func @transform_2(%arg0: i32) -> (i32, i32, i32) {
    %c0_i32 = arith.constant 0 : i32
    %c0_i32_0 = arith.constant 0 : i32
    %c0_i32_1 = arith.constant 0 : i32
    %c0_i32_2 = arith.constant 0 : i32
    return %c0_i32, %c0_i32_0, %c0_i32_1 : i32, i32, i32
  }
  func.func @transform_3(%arg0: i32) -> (i32, i32, i32) {
    %c0_i32 = arith.constant 0 : i32
    %c0_i32_0 = arith.constant 0 : i32
    %c0_i32_1 = arith.constant 0 : i32
    %c0_i32_2 = arith.constant 0 : i32
    return %c0_i32, %c0_i32_0, %c0_i32_1 : i32, i32, i32
  }
  func.func @transform_4(%arg0: i32) -> (i32, i32, i32) {
    %c0_i32 = arith.constant 0 : i32
    %c0_i32_0 = arith.constant 0 : i32
    %c0_i32_1 = arith.constant 0 : i32
    %c0_i32_2 = arith.constant 0 : i32
    return %c0_i32, %c0_i32_0, %c0_i32_1 : i32, i32, i32
  }
  func.func @transform_5(%arg0: i32) -> (i32, i32, i32) {
    %c0_i32 = arith.constant 0 : i32
    %c0_i32_0 = arith.constant 0 : i32
    %c0_i32_1 = arith.constant 0 : i32
    %c0_i32_2 = arith.constant 0 : i32
    return %c0_i32, %c0_i32_0, %c0_i32_1 : i32, i32, i32
  }
  func.func @transform_6(%arg0: i32) -> (i32, i32, i32) {
    %c0_i32 = arith.constant 0 : i32
    %c0_i32_0 = arith.constant 0 : i32
    %c0_i32_1 = arith.constant 0 : i32
    %c0_i32_2 = arith.constant 0 : i32
    return %c0_i32, %c0_i32_0, %c0_i32_1 : i32, i32, i32
  }
  func.func @transform_7(%arg0: i32) -> (i32, i32, i32) {
    %c0_i32 = arith.constant 0 : i32
    %c0_i32_0 = arith.constant 0 : i32
    %c0_i32_1 = arith.constant 0 : i32
    %c0_i32_2 = arith.constant 0 : i32
    return %c0_i32, %c0_i32_0, %c0_i32_1 : i32, i32, i32
  }
  func.func @transform_8(%arg0: i32) -> (i32, i32, i32) {
    %c0_i32 = arith.constant 0 : i32
    %c0_i32_0 = arith.constant 0 : i32
    %c0_i32_1 = arith.constant 0 : i32
    %c0_i32_2 = arith.constant 0 : i32
    return %c0_i32, %c0_i32_0, %c0_i32_1 : i32, i32, i32
  }
  func.func @transform_9(%arg0: i32) -> (i32, i32, i32) {
    %c0_i32 = arith.constant 0 : i32
    %c0_i32_0 = arith.constant 0 : i32
    %c0_i32_1 = arith.constant 0 : i32
    %c0_i32_2 = arith.constant 0 : i32
    return %c0_i32, %c0_i32_0, %c0_i32_1 : i32, i32, i32
  }
  func.func @transform_10(%arg0: i32) -> (i32, i32, i32) {
    %c0_i32 = arith.constant 0 : i32
    %c0_i32_0 = arith.constant 0 : i32
    %c0_i32_1 = arith.constant 0 : i32
    %c0_i32_2 = arith.constant 0 : i32
    return %c0_i32, %c0_i32_0, %c0_i32_1 : i32, i32, i32
  }
  func.func @transform_11(%arg0: i32) -> (i32, i32, i32) {
    %c0_i32 = arith.constant 0 : i32
    %c0_i32_0 = arith.constant 0 : i32
    %c0_i32_1 = arith.constant 0 : i32
    %c0_i32_2 = arith.constant 0 : i32
    return %c0_i32, %c0_i32_0, %c0_i32_1 : i32, i32, i32
  }
  func.func @transform_12(%arg0: i32) -> (i32, i32, i32) {
    %c0_i32 = arith.constant 0 : i32
    %c0_i32_0 = arith.constant 0 : i32
    %c0_i32_1 = arith.constant 0 : i32
    %c0_i32_2 = arith.constant 0 : i32
    return %c0_i32, %c0_i32_0, %c0_i32_1 : i32, i32, i32
  }
  func.func @transform_13(%arg0: i32) -> (i32, i32, i32) {
    %c0_i32 = arith.constant 0 : i32
    %c0_i32_0 = arith.constant 0 : i32
    %c0_i32_1 = arith.constant 0 : i32
    %c0_i32_2 = arith.constant 0 : i32
    return %c0_i32, %c0_i32_0, %c0_i32_1 : i32, i32, i32
  }
  func.func @transform_14(%arg0: i32) -> (i32, i32) {
    %c0_i32 = arith.constant 0 : i32
    %c0_i32_0 = arith.constant 0 : i32
    return %arg0, %c0_i32 : i32, i32
  }
}

</mosaic_0001>

<bundles_post_ra>
// kernel: forward.1
= control target key start
LH: loop header
LB: loop body
LE: loop exit
PB: predicated region body
PF: predicated region fallthrough
CT: control target
= control target key end

     0   :  { %s7321_s0 = inlined_call_operand.vmem [shape: f32[128,32], index: 0, kind: input, shape index: {}]   ;;  %s7322_s1 = inlined_call_operand.hbm [shape: f32[2,1,32], index: 1, kind: input, shape index: {}]   ;;  %s7323_s2 = inlined_call_operand.hbm [shape: f32[2,1,32], index: 2, kind: input, shape index: {}]   ;;  %s7324_s3 = inlined_call_operand.hbm [shape: bf16[2,32,96], index: 3, kind: input, shape index: {}]   ;;  %s7325_s4 = inlined_call_operand.hbm [shape: f32[2,1,96], index: 4, kind: input, shape index: {}]   ;;  %s7326_s5 = inlined_call_operand.vmem [shape: bf16[2,32,32], index: 5, kind: input, shape index: {}]   ;;  %s7327_s6 = inlined_call_operand.vmem [shape: f32[2,1,32], index: 6, kind: input, shape index: {}]   ;;  %s7328_s7 = inlined_call_operand.vmem [shape: f32[2,1,32], index: 7, kind: input, shape index: {}]   ;;  %s7329_s8 = inlined_call_operand.vmem [shape: f32[2,1,32], index: 8, kind: input, shape index: {}]   ;;  %s7330_s9 = inlined_call_operand.vmem [shape: bf16[2,32,128], index: 9, kind: input, shape index: {}]   ;;  %s7331_s10 = inlined_call_operand.vmem [shape: f32[2,1,128], index: 10, kind: input, shape index: {}]   ;;  %s7332_s11 = inlined_call_operand.vmem [shape: bf16[2,128,32], index: 11, kind: input, shape index: {}]   ;;  %s7333_s12 = inlined_call_operand.vmem [shape: f32[2,1,32], index: 12, kind: input, shape index: {}]   ;;  %s7334_s13 = inlined_call_operand.hbm [shape: f32[8,64,64], index: 13, kind: input, shape index: {}]   ;;  %s7335_s14 = inlined_call_operand.vmem [shape: f32[128,32], index: 14, kind: output, shape index: {}]  }
   0x1   :  { %7343 = sst [smem:[#allocation14_spill]] %s7322_s1 }
   0x2   :  { %7344 = sst [smem:[#allocation15_spill]] %s7323_s2 }
   0x3   :  { %7345 = sst [smem:[#allocation16_spill]] %s7325_s4 }
   0x4   :  { %7346 = sst [smem:[#allocation17_spill]] %s7335_s14 }
   0x5   :  { %19 = vsyncpa [#allocation3], 0 }
   0x6   :  { %20 = vsyncpa [#allocation5], 0 }
   0x7   :  { %21 = vsyncpa [#allocation8], 0  ;;  %s5459_s29 = smov 0  }
   0x8 LB: > { %s7336_s30 = sadd.s32 4294967295, %s5356_s29   ;;  %p4334_p0 = scmp.ge.s32.totalorder %s5356_s29, 1  ;;  %s5356_s29 = sphi %s5459_s29, %s27_s29  }
   0x9   : > { %p357_p1 = scmp.lt.s32.totalorder %s5356_s29, 3  ;;  %p5469_p2 = scmp.eq.s32.totalorder %s7336_s30, 0 }
   0xa   : > { %s7348_s2 = sld [smem:[#allocation15_spill]]  ;;  %s5358_s23 = smov [#allocation4]  }
   0xb   : > { %p5476_p3 = pnand %p4334_p0, %p357_p1  ;;  %s7350_s4 = sld [smem:[#allocation16_spill]] }
   0xc   : > { %s384_s24 = sshll.u32 %s5358_s23, 4  ;;  %s5359_s26 = smov [#allocation7]   ;;  %s385_s24 = int_to_ptr.vmem [resolvable:$true] %s384_s24 }
   0xd   : > { %p4630_p4 = pneg %p5476_p3  ;;  %s412_s27 = sshll.u32 %s5359_s26, 4  ;;  %s413_s27 = int_to_ptr.vmem [resolvable:$true] %s412_s27 }
   0xe   : > { %s7352_s1 = sld [smem:[#allocation14_spill]]  ;;  %s5360_s20 = smov 16  }
   0xf   : > { %p5487_p5 = pnand %p5469_p2, %p4630_p4  ;;  %s5361_s21 = smov 1  }
  0x10   : > { %s382_s18 = sshll.u32 %s7348_s2, 4  ;;  %s5362_s23 = smov [#allocation2]   ;;  %s383_s18 = int_to_ptr.hbm [resolvable:$true] %s382_s18 }
  0x11   : > { %s410_s22 = sshll.u32 %s7350_s4, 4  ;;  %s370_s30 = sshll.u32 %s5362_s23, 4  ;;  %s411_s22 = int_to_ptr.hbm [resolvable:$true] %s410_s22  ;;  %s371_s30 = int_to_ptr.vmem [resolvable:$true] %s370_s30 }
  0x12   : > { %4636 = dma.hbm_to_vmem [thread:$0]  (!%p5487_p5), %s383_s18, 32, %s385_s24, [#allocation5], %s5360_s20, %s5360_s20, %s5361_s21  }
  0x13   : > { %4642 = dma.hbm_to_vmem [thread:$0]  (!%p5487_p5), %s411_s22, 32, %s413_s27, [#allocation8], %s5360_s20, %s5360_s20, %s5361_s21  }
  0x14   : > { %s368_s17 = sshll.u32 %s7352_s1, 4  ;;  %s396_s14 = sshll.u32 %s7324_s3, 4  ;;  %s369_s17 = int_to_ptr.hbm [resolvable:$true] %s368_s17  ;;  %s397_s14 = int_to_ptr.hbm [resolvable:$true] %s396_s14 }
  0x15   : > { %4633 = dma.hbm_to_vmem [thread:$0]  (!%p5487_p5), %s369_s17, 32, %s371_s30, [#allocation3], %s5360_s20, %s5360_s20, %s5361_s21  }
  0x16   : > { %s5363_s26 = smov [#allocation6]   ;;  %s448_s18 = sshll.u32 %s7334_s13, 4  ;;  %s449_s18 = int_to_ptr.hbm [resolvable:$true] %s448_s18 }
  0x17   : > { %s398_s28 = sshll.u32 %s5363_s26, 4  ;;  %s5364_s22 = smov 64   ;;  %s399_s28 = int_to_ptr.vmem [resolvable:$true] %s398_s28 }
  0x18   : > { %s5365_s24 = smov 4   ;;  %s5366_s27 = smov [#allocation9]  }
  0x19   : > { %4639 = dma.hbm_to_vmem [thread:$0]  (!%p5487_p5), %s397_s14, 512, %s399_s28, [#allocation5], %s5364_s22, %s5364_s22, %s5365_s24  }
  0x1a   : > { %s450_s2 = sshll.u32 %s5366_s27, 4  ;;  %s5367_s4 = smov 128   ;;  %s451_s2 = int_to_ptr.vmem [resolvable:$true] %s450_s2 }
  0x1b   : > { %s5368_s23 = smov 8   ;;  %475 = sbr.rel (%p5476_p3) target bundleno = 4965 (0x1365), region = 76 }
  0x1c   : > { %4645 = dma.hbm_to_vmem [thread:$0]  (!%p5487_p5), %s449_s18, 8192, %s451_s2, [#allocation8], %s5367_s4, %s5367_s4, %s5368_s23  }
  0x20   : > { %5343 = dma.done.wait (%p5469_p2), [#allocation3], 32  }
  0x21   : > { %5345 = vsyncadd (%p5469_p2), [#allocation3], 4294967264 }
  0x22   : > { %5347 = dma.done.wait (%p5469_p2), [#allocation5], 544  }
  0x23   : > { %5349 = vsyncadd (%p5469_p2), [#allocation5], 4294966752 }
  0x24   : > { %5351 = dma.done.wait (%p5469_p2), [#allocation8], 8224  }
  0x25   : > { %5353 = vsyncadd (%p5469_p2), [#allocation8], 4294959072  ;;  %s7353_s1 = sadd.s32 4294967295, %s5356_s29   ;;  %vm565_vm0 = vcmask 261120   ;;  %v5369_v14 = vmov 32.0   ;;  %v4583_v58 = vld [vmem:[#allocation6 + $0x8] sm:$0xff] }
  0x26   : > { %s4347_s14 = sshll.u32 %s7353_s1, 3  ;;  %4826 = vrcp.f32 %v5369_v14  ;;  %813 = vmatpush.bf16.msra.mxu0 %v4583_v58  ;;  %v4582_v62 = vld [vmem:[#allocation6] sm:$0xff]  ;;  %s5370_s15 = smov 96  }
  0x27   : > { %p543_p6 = scmp.lt.s32.totalorder %s4347_s14, 15  ;;  %s5371_s20 = smov 88  }
  0x28   : > { %s5372_s21 = smov 120   ;;  %s5373_s26 = smov 64  }
  0x29   : > { %s7363_s14 = smov (!%p543_p6, %s4347_s14), 15  ;;  %s5374_s28 = smov 80  }
  0x2a   : > { %s7337_s30 = sshll.u32 %s7363_s14, 3  ;;  %814 = vmatpush.bf16.msra.mxu0 %v4582_v62  ;;  %s5375_s16 = smov 72  }
  0x2b   : > { %s5534_s17 = scalar_lea.vmem %s7321_s0, %s7337_s30  ;;  %s5376_s18 = smov 112  }
  0x2c   : > { %v559_v0 = vld [vmem:[%s5534_s17 + $0x20] sm:$0xff]  ;;  %v557_v1 = vld [vmem:[%s5534_s17 + $0x10] sm:$0xff]  ;;  %v560_v6 = vld [vmem:[%s5534_s17 + $0x28] sm:$0xff]  ;;  %v4827_v15 = vpop.eup %4826  ;;  %s5377_s22 = smov 104   ;;  %s5378_s24 = smov 56  }
  0x2d   : > { %v555_v2 = vld [vmem:[%s5534_s17] sm:$0xff]  ;;  %v578_v3 = vsel %vm565_vm0, %v559_v0, 0.0  ;;  %v572_v4 = vsel %vm565_vm0, %v557_v1, 0.0  ;;  %v558_v7 = vld [vmem:[%s5534_s17 + $0x18] sm:$0xff]  ;;  %v556_v8 = vld [vmem:[%s5534_s17 + $0x8] sm:$0xff]  ;;  %v581_v9 = vsel %vm565_vm0, %v560_v6, 0.0  ;;  %vm595_vm1 = vweird.f32 %v4827_v15 }
  0x2e   : > { %v566_v5 = vsel %vm565_vm0, %v555_v2, 0.0  ;;  %579 = vadd.xlane.f32.xlu2 %v578_v3  ;;  %573 = vadd.xlane.f32.xlu1 %v572_v4  ;;  %v575_v10 = vsel %vm565_vm0, %v558_v7, 0.0  ;;  %v569_v11 = vsel %vm565_vm0, %v556_v8, 0.0  ;;  %v561_v12 = vld [vmem:[%s5534_s17 + $0x30] sm:$0xff]  ;;  %v591_v16 = vmul.f32 32.0, %v4827_v15  ;;  %v562_v36 = vld [vmem:[%s5534_s17 + $0x38] sm:$0xff] }
  0x2f   : > { %567 = vadd.xlane.f32.xlu0 %v566_v5  ;;  %v584_v13 = vsel %vm565_vm0, %v561_v12, 0.0  ;;  %v587_v41 = vsel %vm565_vm0, %v562_v36, 0.0  ;;  %s5379_s27 = smov 48   ;;  %s5380_s2 = smov 40  }
  0x30   : > { %v592_v17 = vsub.f32 1.0, %v591_v16  ;;  %s5381_s4 = smov 8   ;;  %s7340_s23 = smov 16  }
  0x31   : > { %s7338_s1 = smov 24  }
  0x32   : > { %v593_v18 = vmul.f32 %v4827_v15, %v592_v17 }
  0x34   : > { %v594_v19 = vadd.f32 %v4827_v15, %v593_v18 }
  0x36   : > { %582 = vadd.xlane.f32.xlu2 %v581_v9  ;;  %576 = vadd.xlane.f32.xlu1 %v575_v10  ;;  %v5550_v20 = vsel %vm595_vm1, %v4827_v15, %v594_v19 }
  0x37   : > { %570 = vadd.xlane.f32.xlu0 %v569_v11 }
  0x3e   : > { %585 = vadd.xlane.f32.xlu2 %v584_v13 }
  0xa1   : > { %v580_v21 = vpop.xlane.xlu2 %579  ;;  %v574_v22 = vpop.xlane.xlu1 %573 }
  0xa2   : > { %v568_v23 = vpop.xlane.xlu0 %567  ;;  %v601_v32 = vmul.f32 %v5550_v20, %v580_v21  ;;  %v599_v33 = vmul.f32 %v5550_v20, %v574_v22 }
  0xa3   : > { %v597_v24 = vmul.f32 %v5550_v20, %v568_v23 }
  0xa4   : > { %v5569_v39 = vsub.f32 %v559_v0, %v601_v32  ;;  %v5571_v40 = vsub.f32 %v557_v1, %v599_v33 }
  0xa5   : > { %v5553_v25 = vsub.f32 %v555_v2, %v597_v24 }
  0xa6   : > { %v617_v48 = vmul.f32 %v5569_v39, %v5569_v39  ;;  %v615_v49 = vmul.f32 %v5571_v40, %v5571_v40 }
  0xa7   : > { %v613_v26 = vmul.f32 %v5553_v25, %v5553_v25 }
  0xa8   : > { %v633_v53 = vsel %vm565_vm0, %v617_v48, 0.0  ;;  %v627_v54 = vsel %vm565_vm0, %v615_v49, 0.0 }
  0xa9   : > { %v583_v27 = vpop.xlane.xlu2 %582  ;;  %v577_v28 = vpop.xlane.xlu1 %576  ;;  %v621_v29 = vsel %vm565_vm0, %v613_v26, 0.0 }
  0xaa   : > { %v600_v30 = vmul.f32 %v5550_v20, %v577_v28  ;;  %622 = vadd.xlane.f32.xlu0 %v621_v29  ;;  %v571_v31 = vpop.xlane.xlu0 %570  ;;  %v602_v47 = vmul.f32 %v5550_v20, %v583_v27 }
  0xab   : > { %v598_v34 = vmul.f32 %v5550_v20, %v571_v31 }
  0xac   : > { %v5562_v35 = vsub.f32 %v558_v7, %v600_v30  ;;  %v5588_v52 = vsub.f32 %v560_v6, %v602_v47 }
  0xad   : > { %v5565_v37 = vsub.f32 %v556_v8, %v598_v34 }
  0xae   : > { %v616_v38 = vmul.f32 %v5562_v35, %v5562_v35  ;;  %v618_v56 = vmul.f32 %v5588_v52, %v5588_v52 }
  0xaf   : > { %v614_v42 = vmul.f32 %v5565_v37, %v5565_v37 }
  0xb0   : > { %v630_v43 = vsel %vm565_vm0, %v616_v38, 0.0  ;;  %v636_v57 = vsel %vm565_vm0, %v618_v56, 0.0 }
  0xb1   : > { %v586_v44 = vpop.xlane.xlu2 %585  ;;  %631 = vadd.xlane.f32.xlu2 %v630_v43  ;;  %v624_v45 = vsel %vm565_vm0, %v614_v42, 0.0 }
  0xb2   : > { %v603_v46 = vmul.f32 %v5550_v20, %v586_v44  ;;  %588 = vadd.xlane.f32.xlu0 %v587_v41  ;;  %625 = vadd.xlane.f32.xlu1 %v624_v45  ;;  %v5623_v45 = vld [vmem:[#allocation2] ss:$0 sm:$0xff] }
  0xb4   : > { %v5584_v50 = vsub.f32 %v561_v12, %v603_v46 }
  0xb6   : > { %v619_v51 = vmul.f32 %v5584_v50, %v5584_v50 }
  0xb8   : > { %v639_v55 = vsel %vm565_vm0, %v619_v51, 0.0 }
  0xb9   : > { %640 = vadd.xlane.f32.xlu2 %v639_v55 }
  0xba   : > { %634 = vadd.xlane.f32.xlu0 %v633_v53  ;;  %628 = vadd.xlane.f32.xlu1 %v627_v54  ;;  %v5627_v54 = vld [vmem:[#allocation4] ss:$0 sm:$0xff] }
  0xc2   : > { %637 = vadd.xlane.f32.xlu1 %v636_v57 }
 0x11d   : > { %v623_v59 = vpop.xlane.xlu0 %622 }
 0x11e   : > { %v645_v60 = vmul.f32 %v623_v59, %v5550_v20 }
 0x120   : > { %v653_v61 = vadd.f32 1e-05, %v645_v60 }
 0x122   : > { %4828 = vrsqrt.f32 %v653_v61  ;;  %vm667_vm3 = vweird.f32 %v653_v61 }
 0x124   : > { %v632_v63 = vpop.xlane.xlu2 %631 }
 0x125   : > { %v648_v0 = vmul.f32 %v632_v63, %v5550_v20  ;;  %v626_v1 = vpop.xlane.xlu1 %625  ;;  %v589_v2 = vpop.xlane.xlu0 %588 }
 0x126   : > { %v646_v3 = vmul.f32 %v626_v1, %v5550_v20  ;;  %v604_v4 = vmul.f32 %v5550_v20, %v589_v2 }
 0x127   : > { %v5600_v5 = vadd.f32 1e-05, %v648_v0 }
 0x128   : > { %v4829_v6 = vpop.eup %4828  ;;  %v654_v7 = vadd.f32 1e-05, %v646_v3  ;;  %v5602_v8 = vsub.f32 %v562_v36, %v604_v4 }
 0x129   : > { %v662_v9 = vmul.f32 %v4829_v6, %v653_v61  ;;  %4830 = vrsqrt.f32 %v5600_v5  ;;  %vm668_vm2 = vweird.f32 %v4829_v6  ;;  %vm697_vm10 = vweird.f32 %v5600_v5 }
 0x12a   : > { %4832 = vrsqrt.f32 %v654_v7  ;;  %v620_v10 = vmul.f32 %v5602_v8, %v5602_v8  ;;  %vm5614_vm4 = vmor %vm667_vm3, %vm668_vm2  ;;  %vm677_vm5 = vweird.f32 %v654_v7 }
 0x12b   : > { %v663_v11 = vmul.f32 %v4829_v6, %v662_v9 }
 0x12c   : > { %v642_v12 = vsel %vm565_vm0, %v620_v10, 0.0  ;;  %v641_v28 = vpop.xlane.xlu2 %640 }
 0x12d   : > { %v664_v13 = vmul.f32 0.5, %v663_v11  ;;  %v629_v14 = vpop.xlane.xlu1 %628  ;;  %643 = vadd.xlane.f32.xlu0 %v642_v12  ;;  %v635_v16 = vpop.xlane.xlu0 %634 }
 0x12e   : > { %v647_v15 = vmul.f32 %v629_v14, %v5550_v20  ;;  %v649_v23 = vmul.f32 %v635_v16, %v5550_v20 }
 0x12f   : > { %v5609_v17 = vpop.eup %4830  ;;  %v665_v18 = vsub.f32 1.5, %v664_v13 }
 0x130   : > { %v4833_v19 = vpop.eup %4832  ;;  %v655_v21 = vadd.f32 1e-05, %v647_v15  ;;  %v692_v26 = vmul.f32 %v5609_v17, %v5600_v5  ;;  %v657_v30 = vadd.f32 1e-05, %v649_v23  ;;  %vm698_vm11 = vweird.f32 %v5609_v17 }
 0x131   : > { %v672_v22 = vmul.f32 %v4833_v19, %v654_v7  ;;  %v666_v24 = vmul.f32 %v4829_v6, %v665_v18  ;;  %vm678_vm6 = vweird.f32 %v4833_v19  ;;  %vm699_vm13 = vmor %vm697_vm10, %vm698_vm11  ;;  %vm880_vm11 = vcmask 64512  }
 0x132   : > { %4834 = vrsqrt.f32 %v655_v21  ;;  %v693_v33 = vmul.f32 %v5609_v17, %v692_v26  ;;  %vm679_vm7 = vmor %vm677_vm5, %vm678_vm6  ;;  %vm687_vm8 = vweird.f32 %v655_v21  ;;  %vm707_vm1 = vweird.f32 %v657_v30 }
 0x133   : > { %v673_v27 = vmul.f32 %v4833_v19, %v672_v22  ;;  %v670_v32 = vsel %vm5614_vm4, %v4829_v6, %v666_v24  ;;  %4836 = vrsqrt.f32 %v657_v30 }
 0x134   : > { %v741_v44 = vmul.f32 %v670_v32, %v5553_v25  ;;  %v694_v46 = vmul.f32 0.5, %v693_v33 }
 0x135   : > { %v674_v29 = vmul.f32 0.5, %v673_v27  ;;  %v638_v31 = vpop.xlane.xlu1 %637 }
 0x136   : > { %v650_v34 = vmul.f32 %v638_v31, %v5550_v20  ;;  %v752_v53 = vmul.f32 %v5623_v45, %v741_v44  ;;  %v695_v55 = vsub.f32 1.5, %v694_v46 }
 0x137   : > { %v675_v36 = vsub.f32 1.5, %v674_v29  ;;  %v651_v29 = vmul.f32 %v641_v28, %v5550_v20 }
 0x138   : > { %v4835_v38 = vpop.eup %4834  ;;  %v658_v41 = vadd.f32 1e-05, %v650_v34  ;;  %v763_v60 = vadd.f32 %v5627_v54, %v752_v53  ;;  %v696_v61 = vmul.f32 %v5609_v17, %v695_v55 }
 0x139   : > { %v676_v42 = vmul.f32 %v4833_v19, %v675_v36  ;;  %v682_v43 = vmul.f32 %v4835_v38, %v655_v21  ;;  %vm688_vm9 = vweird.f32 %v4835_v38  ;;  %v4837_v57 = vpop.eup %4836 }
 0x13a   : > { %4838 = vrsqrt.f32 %v658_v41  ;;  %vm689_vm12 = vmor %vm687_vm8, %vm688_vm9  ;;  %v702_v62 = vmul.f32 %v4837_v57, %v657_v30  ;;  %v700_v3 = vsel %vm699_vm13, %v5609_v17, %v696_v61  ;;  %vm717_vm14 = vweird.f32 %v658_v41  ;;  %v4812_v61 = vld [vmem:[#allocation7] ss:$0 sm:$0xff] }
 0x13b   : > { %v680_v47 = vsel %vm679_vm7, %v4833_v19, %v676_v42  ;;  %v683_v48 = vmul.f32 %v4835_v38, %v682_v43  ;;  %v744_v7 = vmul.f32 %v700_v3, %v5562_v35  ;;  %vm708_vm2 = vweird.f32 %v4837_v57 }
 0x13c   : > { %v742_v49 = vmul.f32 %v680_v47, %v5565_v37  ;;  %v703_v4 = vmul.f32 %v4837_v57, %v702_v62  ;;  %vm709_vm4 = vmor %vm707_vm1, %vm708_vm2  ;;  %v659_v30 = vadd.f32 1e-05, %v651_v29  ;;  %vm1853_vm13 = vcmask 130048  }
 0x13d   : > { %v684_v51 = vmul.f32 0.5, %v683_v48  ;;  %v755_v12 = vmul.f32 %v5623_v45, %v744_v7 }
 0x13e   : > { %v753_v56 = vmul.f32 %v5623_v45, %v742_v49  ;;  %v704_v9 = vmul.f32 0.5, %v703_v4  ;;  %4840 = vrsqrt.f32 %v659_v30  ;;  %vm727_vm5 = vweird.f32 %v659_v30 }
 0x13f   : > { %v685_v25 = vsub.f32 1.5, %v684_v51 }
 0x140   : > { %v764_v58 = vadd.f32 %v5627_v54, %v753_v56  ;;  %v4839_v59 = vpop.eup %4838  ;;  %v705_v13 = vsub.f32 1.5, %v704_v9 }
 0x141   : > { %v686_v37 = vmul.f32 %v4835_v38, %v685_v25  ;;  %v712_v63 = vmul.f32 %v4839_v59, %v658_v41  ;;  %vm718_vm15 = vweird.f32 %v4839_v59 }
 0x142   : > { %v771_v0 = vpack.c.bf16 %v764_v58, %v763_v60  ;;  %vm719_vm3 = vmor %vm717_vm14, %vm718_vm15  ;;  %v706_v16 = vmul.f32 %v4837_v57, %v705_v13  ;;  %vm1862_vm14 = vcmask 195584  }
 0x143   : > { %v690_v1 = vsel %vm689_vm12, %v4835_v38, %v686_v37  ;;  %v713_v2 = vmul.f32 %v4839_v59, %v712_v63  ;;  %vm934_vm12 = vcmask 523264  }
 0x144   : > { %4359 = vmatmul.msk.bf16.vlgmr.msra.gmra.mxu0 %vm565_vm0, %v771_v0  ;;  %v743_v5 = vmul.f32 %v690_v1, %v5571_v40  ;;  %v766_v40 = vadd.f32 %v5627_v54, %v755_v12  ;;  %v710_v18 = vsel %vm709_vm4, %v4837_v57, %v706_v16  ;;  %v4841_v31 = vpop.eup %4840 }
 0x145   : > { %v714_v6 = vmul.f32 0.5, %v713_v2  ;;  %v745_v21 = vmul.f32 %v710_v18, %v5569_v39  ;;  %vm728_vm6 = vweird.f32 %v4841_v31 }
 0x146   : > { %v754_v10 = vmul.f32 %v5623_v45, %v743_v5  ;;  %vm729_vm7 = vmor %vm727_vm5, %vm728_vm6 }
 0x147   : > { %v715_v11 = vsub.f32 1.5, %v714_v6  ;;  %v756_v23 = vmul.f32 %v5623_v45, %v745_v21 }
 0x148   : > { %v765_v14 = vadd.f32 %v5627_v54, %v754_v10 }
 0x149   : > { %v716_v15 = vmul.f32 %v4839_v59, %v715_v11  ;;  %v767_v26 = vadd.f32 %v5627_v54, %v756_v23 }
 0x14a   : > { %v772_v35 = vpack.c.bf16 %v766_v40, %v765_v14 }
 0x14b   : > { %v720_v17 = vsel %vm719_vm3, %v4839_v59, %v716_v15 }
 0x14c   : > { %v746_v19 = vmul.f32 %v720_v17, %v5588_v52  ;;  %v722_v52 = vmul.f32 %v4841_v31, %v659_v30 }
 0x14e   : > { %v757_v22 = vmul.f32 %v5623_v45, %v746_v19  ;;  %v723_v32 = vmul.f32 %v4841_v31, %v722_v52 }
 0x150   : > { %v768_v24 = vadd.f32 %v5627_v54, %v757_v22  ;;  %v724_v36 = vmul.f32 0.5, %v723_v32 }
 0x152   : > { %v773_v27 = vpack.c.bf16 %v768_v24, %v767_v26  ;;  %v725_v38 = vsub.f32 1.5, %v724_v36 }
 0x154   : > { %4360 = vmatmul.msk.bf16.gmra.mxu0 %vm565_vm0, %v772_v35  ;;  %v726_v42 = vmul.f32 %v4841_v31, %v725_v38 }
 0x156   : > { %v730_v46 = vsel %vm729_vm7, %v4841_v31, %v726_v42 }
 0x157   : > { %v747_v49 = vmul.f32 %v730_v46, %v5584_v50 }
 0x159   : > { %v758_v56 = vmul.f32 %v5623_v45, %v747_v49 }
 0x15b   : > { %v769_v25 = vadd.f32 %v5627_v54, %v758_v56 }
 0x164   : > { %4361 = vmatmul.msk.bf16.gmra.mxu0 %vm565_vm0, %v773_v27 }
 0x1a0   : > { %v644_v39 = vpop.xlane.xlu0 %643 }
 0x1a1   : > { %v652_v33 = vmul.f32 %v644_v39, %v5550_v20 }
 0x1a3   : > { %v660_v34 = vadd.f32 1e-05, %v652_v33 }
 0x1a5   : > { %4842 = vrsqrt.f32 %v660_v34  ;;  %vm737_vm9 = vweird.f32 %v660_v34 }
 0x1ab   : > { %v4843_v41 = vpop.eup %4842 }
 0x1ac   : > { %v732_v43 = vmul.f32 %v4843_v41, %v660_v34  ;;  %vm738_vm8 = vweird.f32 %v4843_v41 }
 0x1ad   : > { %vm739_vm10 = vmor %vm737_vm9, %vm738_vm8 }
 0x1ae   : > { %v733_v44 = vmul.f32 %v4843_v41, %v732_v43 }
 0x1b0   : > { %v734_v47 = vmul.f32 0.5, %v733_v44 }
 0x1b2   : > { %v735_v48 = vsub.f32 1.5, %v734_v47 }
 0x1b4   : > { %v736_v51 = vmul.f32 %v4843_v41, %v735_v48 }
 0x1b6   : > { %v740_v53 = vsel %vm739_vm10, %v4843_v41, %v736_v51 }
 0x1b7   : > { %v748_v55 = vmul.f32 %v740_v53, %v5602_v8 }
 0x1b9   : > { %v759_v57 = vmul.f32 %v5623_v45, %v748_v55 }
 0x1bb   : > { %v770_v58 = vadd.f32 %v5627_v54, %v759_v57 }
 0x1bd   : > { %v774_v59 = vpack.c.bf16 %v770_v58, %v769_v25 }
 0x1bf   : > { %4362 = vmatmul.msk.bf16.gmra.mxu0 %vm565_vm0, %v774_v59 }
 0x1c1   : > { %v816_v37 = vpop.f32.mrf.mxu0 }
 0x1c2   : > { %v817_v11 = vadd.f32 %v4812_v61, %v816_v37 }
 0x1c4   : > { %v836_v40 = vpack.c.bf16 %v817_v11, %v817_v11 }
 0x1c6   : > { %v860_v35 = vunpack.c.l.b16 %v836_v40 }
 0x1c9   : > { %v818_v60 = vpop.f32.mrf.mxu0 }
 0x1ca   : > { %v819_v9 = vadd.f32 %v4812_v61, %v818_v60 }
 0x1cc   : > { %v837_v14 = vpack.c.bf16 %v819_v9, %v819_v9  ;;  %v845_v9 = vld [vmem:[#allocation9 + $0x8] sm:$0xff] }
 0x1ce   : > { %v861_v16 = vunpack.c.l.b16 %v837_v14 }
 0x1d0   : > { %v5670_v17 = vpack.c.b16 %v861_v16, %v860_v35 }
 0x1d1   : > { %v821_v50 = vpop.f32.mrf.mxu0 }
 0x1d2   : > { %v822_v62 = vadd.f32 %v4812_v61, %v821_v50 }
 0x1d4   : > { %v838_v0 = vpack.c.bf16 %v822_v62, %v822_v62 }
 0x1d6   : > { %v862_v2 = vunpack.c.l.b16 %v838_v0 }
 0x1d9   : > { %v823_v63 = vpop.f32.mrf.mxu0 }
 0x1da   : > { %v824_v1 = vadd.f32 %v4812_v61, %v823_v63 }
 0x1dc   : > { %v839_v8 = vpack.c.bf16 %v824_v1, %v824_v1 }
 0x1de   : > { %v863_v3 = vunpack.c.l.b16 %v839_v8 }
 0x1e0   : > { %v5660_v4 = vpack.c.b16 %v863_v3, %v862_v2 }
 0x1e1   : > { %v826_v45 = vpop.f32.mrf.mxu0 }
 0x1e2   : > { %874 = vrot.lane.b32.xlu0 %v5660_v4, %s5370_s15  ;;  %v827_v54 = vadd.f32 %v4812_v61, %v826_v45 }
 0x1e4   : > { %v840_v6 = vpack.c.bf16 %v827_v54, %v827_v54  ;;  %v844_v54 = vld [vmem:[#allocation9] sm:$0xff] }
 0x1e6   : > { %v864_v12 = vunpack.c.l.b16 %v840_v6 }
 0x1e9   : > { %v828_v5 = vpop.f32.mrf.mxu0 }
 0x1ea   : > { %v829_v7 = vadd.f32 %v4812_v61, %v828_v5 }
 0x1ec   : > { %v841_v10 = vpack.c.bf16 %v829_v7, %v829_v7 }
 0x1ee   : > { %v865_v13 = vunpack.c.l.b16 %v841_v10 }
 0x1f0   : > { %v5664_v15 = vpack.c.b16 %v865_v13, %v864_v12  ;;  %v846_v13 = vld [vmem:[#allocation9 + $0x10] sm:$0xff] }
 0x1f2   : > { %1101 = vrot.lane.b32.xlu0 %v5664_v15, %s5371_s20  ;;  %876 = vrot.lane.b32.xlu2 %v5664_v15, %s5370_s15 }
 0x1fa   : > { %1099 = vrot.lane.b32.xlu0 %v5660_v4, %s5371_s20  ;;  %872 = vrot.lane.b32.xlu2 %v5670_v17, %s5370_s15 }
 0x202   : > { %1091 = vrot.lane.b32.xlu0 %v5660_v4, %s5372_s21  ;;  %1031 = vrot.lane.b32.xlu2 %v5664_v15, %s5373_s26 }
 0x20a   : > { %1324 = vrot.lane.b32.xlu0 %v5664_v15, %s5374_s28  ;;  %1029 = vrot.lane.b32.xlu2 %v5660_v4, %s5373_s26 }
 0x212   : > { %1547 = vrot.lane.b32.xlu0 %v5664_v15, %s5375_s16  ;;  %1097 = vrot.lane.b32.xlu2 %v5670_v17, %s5371_s20 }
 0x21a   : > { %1322 = vrot.lane.b32.xlu0 %v5660_v4, %s5374_s28  ;;  %1089 = vrot.lane.b32.xlu2 %v5670_v17, %s5372_s21 }
 0x222   : > { %1545 = vrot.lane.b32.xlu0 %v5660_v4, %s5375_s16 }
 0x22a   : > { %1320 = vrot.lane.b32.xlu0 %v5670_v17, %s5374_s28 }
 0x23c   : > { %v831_v18 = vpop.f32.mrf.mxu0 }
 0x23d   : > { %v832_v19 = vadd.f32 %v4812_v61, %v831_v18  ;;  %v848_v18 = vld [vmem:[#allocation9 + $0x20] sm:$0xff] }
 0x23f   : > { %v842_v22 = vpack.c.bf16 %v832_v19, %v832_v19 }
 0x241   : > { %v866_v26 = vunpack.c.l.b16 %v842_v22 }
 0x244   : > { %v833_v21 = vpop.f32.mrf.mxu0 }
 0x245   : > { %v834_v23 = vadd.f32 %v4812_v61, %v833_v21 }
 0x247   : > { %v843_v24 = vpack.c.bf16 %v834_v23, %v834_v23  ;;  %v849_v23 = vld [vmem:[#allocation9 + $0x28] sm:$0xff] }
 0x249   : > { %v867_v27 = vunpack.c.l.b16 %v843_v24 }
 0x24b   : > { %v5696_v28 = vpack.c.b16 %v867_v27, %v866_v26 }
 0x24c   : > { %v877_v29 = vpop.permute.xlu2 %876 }
 0x24d   : > { %1549 = vrot.lane.b32.xlu0 %v5696_v28, %s5375_s16  ;;  %1033 = vrot.lane.b32.xlu2 %v5696_v28, %s5373_s26  ;;  %v900_v49 = vsel %vm880_vm11, %v877_v29, 0  ;;  %v850_v29 = vld [vmem:[#allocation9 + $0x30] sm:$0xff] }
 0x24e   : > { %878 = vrot.lane.b32.xlu1 %v5696_v28, %s5370_s15 }
 0x254   : > { %v873_v30 = vpop.permute.xlu2 %872  ;;  %v875_v32 = vpop.permute.xlu0 %874 }
 0x255   : > { %1312 = vrot.lane.b32.xlu0 %v5670_v17, %s5376_s18  ;;  %1326 = vrot.lane.b32.xlu2 %v5696_v28, %s5374_s28  ;;  %v897_v56 = vsel %vm880_vm11, %v875_v32, 0  ;;  %v894_v59 = vsel %vm880_vm11, %v873_v30, 0  ;;  %v851_v32 = vld [vmem:[#allocation9 + $0x38] sm:$0xff] }
 0x256   : > { %1027 = vrot.lane.b32.xlu1 %v5670_v17, %s5373_s26 }
 0x25c   : > { %v1032_v31 = vpop.permute.xlu2 %1031 }
 0x25d   : > { %1314 = vrot.lane.b32.xlu0 %v5660_v4, %s5376_s18  ;;  %1095 = vrot.lane.b32.xlu2 %v5696_v28, %s5372_s21 }
 0x25e   : > { %1093 = vrot.lane.b32.xlu1 %v5664_v15, %s5372_s21 }
 0x264   : > { %v1030_v52 = vpop.permute.xlu2 %1029  ;;  %v1102_v33 = vpop.permute.xlu0 %1101 }
 0x265   : > { %1316 = vrot.lane.b32.xlu0 %v5664_v15, %s5376_s18  ;;  %1535 = vrot.lane.b32.xlu2 %v5670_v17, %s5377_s22  ;;  %v1124_v61 = vsel %vm880_vm11, %v1102_v33, 0 }
 0x266   : > { %1103 = vrot.lane.b32.xlu1 %v5696_v28, %s5371_s20 }
 0x26c   : > { %v1098_v39 = vpop.permute.xlu2 %1097  ;;  %v1100_v36 = vpop.permute.xlu0 %1099 }
 0x26d   : > { %1537 = vrot.lane.b32.xlu2 %v5660_v4, %s5377_s22  ;;  %v1121_v63 = vsel %vm880_vm11, %v1100_v36, 0  ;;  %v1118_v1 = vsel %vm880_vm11, %v1098_v39, 0  ;;  %v847_v36 = vld [vmem:[#allocation9 + $0x18] sm:$0xff] }
 0x274   : > { %v1090_v34 = vpop.permute.xlu2 %1089  ;;  %v1092_v41 = vpop.permute.xlu0 %1091 }
 0x27c   : > { %v1325_v42 = vpop.permute.xlu0 %1324 }
 0x27d   : > { %v1347_v57 = vsel %vm880_vm11, %v1325_v42, 0 }
 0x284   : > { %v1548_v44 = vpop.permute.xlu0 %1547 }
 0x285   : > { %v1570_v2 = vsel %vm880_vm11, %v1548_v44, 0 }
 0x28c   : > { %v1323_v53 = vpop.permute.xlu0 %1322 }
 0x28d   : > { %v1344_v60 = vsel %vm880_vm11, %v1323_v53, 0 }
 0x294   : > { %v1546_v25 = vpop.permute.xlu0 %1545 }
 0x295   : > { %v1567_v3 = vsel %vm880_vm11, %v1546_v25, 0 }
 0x29c   : > { %v1321_v50 = vpop.permute.xlu0 %1320 }
 0x29d   : > { %v1341_v62 = vsel %vm880_vm11, %v1321_v50, 0 }
 0x2a7   : > { %v1034_v38 = vpop.permute.xlu2 %1033 }
 0x2a8   : > { %1055 = vmatpush.bf16.msra.mxu2 %v1034_v38 }
 0x2ac   : > { %1056 = vmatpush.bf16.msra.mxu2 %v1032_v31 }
 0x2af   : > { %v1327_v47 = vpop.permute.xlu2 %1326 }
 0x2b0   : > { %1057 = vmatpush.bf16.msra.mxu2 %v1030_v52  ;;  %v1350_v51 = vsel %vm880_vm11, %v1327_v47, 0 }
 0x2b7   : > { %v1096_v45 = vpop.permute.xlu2 %1095 }
 0x2bf   : > { %v1550_v0 = vpop.permute.xlu0 %1549  ;;  %v1536_v44 = vpop.permute.xlu2 %1535 }
 0x2c0   : > { %v879_v43 = vpop.permute.xlu1 %878  ;;  %v1573_v8 = vsel %vm880_vm11, %v1550_v0, 0 }
 0x2c1   : > { %v903_v46 = vsel %vm880_vm11, %v879_v43, 0 }
 0x2c2   : > { %909 = vmatpush.bf16.xpose.msra.mxu1 %v903_v46 }
 0x2c7   : > { %v5770_v42 = vpop.permute.xlu0 %1312 }
 0x2c8   : > { %v1028_v48 = vpop.permute.xlu1 %1027 }
 0x2c9   : > { %1058 = vmatpush.bf16.msra.mxu2 %v1028_v48 }
 0x2ca   : > { %910 = vmatpush.bf16.xpose.msra.mxu1 %v900_v49 }
 0x2cd   : > { %1356 = vmatpush.bf16.xpose.msrb.mxu2 %v1350_v51  ;;  %v1538_v51 = vpop.permute.xlu2 %1537 }
 0x2cf   : > { %v5772_v43 = vpop.permute.xlu0 %1314 }
 0x2d0   : > { %v1094_v55 = vpop.permute.xlu1 %1093 }
 0x2d2   : > { %911 = vmatpush.bf16.xpose.msra.mxu1 %v897_v56 }
 0x2d5   : > { %1357 = vmatpush.bf16.xpose.msrb.mxu2 %v1347_v57 }
 0x2d7   : > { %v5774_v46 = vpop.permute.xlu0 %1316 }
 0x2d8   : > { %v1104_v58 = vpop.permute.xlu1 %1103 }
 0x2d9   : > { %v1127_v37 = vsel %vm880_vm11, %v1104_v58, 0 }
 0x2da   : > { %912 = vmatpush.bf16.xpose.msra.mxu1 %v894_v59  ;;  %1133 = vmatpush.bf16.xpose.msra.mxu3 %v1127_v37 }
 0x2dd   : > { %1358 = vmatpush.bf16.xpose.msrb.mxu2 %v1344_v60 }
 0x2e1   : > { %4363 = vmatmul.msk.bf16.vlgmr.msra.gmra.mxu1 %vm880_vm11, %v5670_v17 }
 0x2e2   : > { %1134 = vmatpush.bf16.xpose.msra.mxu3 %v1124_v61 }
 0x2e5   : > { %1359 = vmatpush.bf16.xpose.msrb.mxu2 %v1341_v62 }
 0x2ea   : > { %1135 = vmatpush.bf16.xpose.msra.mxu3 %v1121_v63 }
 0x2f1   : > { %4364 = vmatmul.msk.bf16.gmra.mxu1 %vm880_vm11, %v5660_v4 }
 0x2f2   : > { %1136 = vmatpush.bf16.xpose.msra.mxu3 %v1118_v1 }
 0x2f9   : > { %4371 = vmatmul.msk.bf16.vlgmr.msra.gmra.mxu3 %vm880_vm11, %v1090_v34 }
 0x2fa   : > { %1579 = vmatpush.bf16.xpose.msrb.mxu3 %v1573_v8 }
 0x301   : > { %4365 = vmatmul.msk.bf16.gmra.mxu1 %vm880_vm11, %v5664_v15 }
 0x302   : > { %1580 = vmatpush.bf16.xpose.msrb.mxu3 %v1570_v2 }
 0x309   : > { %4372 = vmatmul.msk.bf16.gmra.mxu3 %vm880_vm11, %v1092_v41 }
 0x30a   : > { %1581 = vmatpush.bf16.xpose.msrb.mxu3 %v1567_v3 }
 0x311   : > { %4366 = vmatmul.msk.bf16.gmra.mxu1 %vm880_vm11, %v5696_v28 }
 0x319   : > { %4373 = vmatmul.msk.bf16.gmra.mxu3 %vm880_vm11, %v1094_v55 }
 0x329   : > { %4374 = vmatmul.msk.bf16.gmra.mxu3 %vm880_vm11, %v1096_v45 }
 0x35e   : > { %v914_v5 = vpop.f32.mrf.mxu1 }
 0x35f   : > { %v915_v6 = vadd.f32 %v914_v5, %v844_v54 }
 0x361   : > { %v935_v7 = vsel %vm934_vm12, %v915_v6, -inf }
 0x362   : > { %936 = vmax.xlane.f32.xlu1 %v935_v7 }
 0x366   : > { %v916_v10 = vpop.f32.mrf.mxu1 }
 0x367   : > { %v917_v11 = vadd.f32 %v916_v10, %v845_v9 }
 0x369   : > { %v938_v12 = vsel %vm934_vm12, %v917_v11, -inf }
 0x36a   : > { %939 = vmax.xlane.f32.xlu0 %v938_v12 }
 0x36e   : > { %v919_v14 = vpop.f32.mrf.mxu1 }
 0x36f   : > { %v920_v40 = vadd.f32 %v919_v14, %v846_v13 }
 0x371   : > { %v941_v16 = vsel %vm934_vm12, %v920_v40, -inf }
 0x372   : > { %942 = vmax.xlane.f32.xlu2 %v941_v16 }
 0x376   : > { %v921_v35 = vpop.f32.mrf.mxu1 }
 0x377   : > { %v922_v38 = vadd.f32 %v921_v35, %v847_v36  ;;  %v1082_v36 = vld [vmem:[#allocation9 + $0x48] sm:$0xff] }
 0x379   : > { %v944_v41 = vsel %vm934_vm12, %v922_v38, -inf }
 0x37b   : > { %1543 = vrot.lane.b32.xlu1 %v5670_v17, %s5375_s16 }
 0x37c   : > { %v5794_v54 = vpop.f32.mrf.mxu3 }
 0x37e   : > { %v924_v19 = vpop.f32.mrf.mxu1 }
 0x37f   : > { %v925_v21 = vadd.f32 %v924_v19, %v848_v18 }
 0x381   : > { %v947_v22 = vsel %vm934_vm12, %v925_v21, -inf }
 0x382   : > { %948 = vmax.xlane.f32.xlu0 %v947_v22  ;;  %v1083_v22 = vld [vmem:[#allocation9 + $0x50] sm:$0xff] }
 0x384   : > { %v1140_v5 = vpop.f32.mrf.mxu3 }
 0x386   : > { %v926_v24 = vpop.f32.mrf.mxu1 }
 0x387   : > { %v5757_v26 = vadd.f32 %v926_v24, %v849_v23 }
 0x389   : > { %v950_v27 = vsel %vm934_vm12, %v5757_v26, -inf }
 0x38a   : > { %951 = vmax.xlane.f32.xlu2 %v950_v27 }
 0x38c   : > { %v1143_v9 = vpop.f32.mrf.mxu3 }
 0x38d   : > { %v5812_v24 = vadd.f32 %v1143_v9, %v1083_v22 }
 0x38e   : > { %v929_v30 = vpop.f32.mrf.mxu1 }
 0x38f   : > { %v5761_v31 = vadd.f32 %v929_v30, %v850_v29  ;;  %v1164_v29 = vsel %vm934_vm12, %v5812_v24, -inf  ;;  %v1086_v30 = vld [vmem:[#allocation9 + $0x68] sm:$0xff] }
 0x391   : > { %v953_v52 = vsel %vm934_vm12, %v5761_v31, -inf }
 0x392   : > { %954 = vmax.xlane.f32.xlu2 %v953_v52 }
 0x396   : > { %v931_v39 = vpop.f32.mrf.mxu1 }
 0x397   : > { %v5765_v33 = vadd.f32 %v931_v39, %v851_v32 }
 0x399   : > { %v956_v34 = vsel %vm934_vm12, %v5765_v33, -inf }
 0x39a   : > { %957 = vmax.xlane.f32.xlu2 %v956_v34 }
 0x3a5   : > { %945 = vmax.xlane.f32.xlu1 %v944_v41 }
 0x3d5   : > { %v937_v47 = vpop.xlane.xlu1 %936 }
 0x3d6   : > { %v959_v48 = vsub.f32 %v915_v6, %v937_v47  ;;  %v1085_v47 = vld [vmem:[#allocation9 + $0x60] sm:$0xff] }
 0x3d8   : > { %v967_v49 = vmul.f32 1.442695, %v959_v48 }
 0x3da   : > { %4844 = vpow2.f32 %v967_v49 }
 0x3dd   : > { %v940_v53 = vpop.xlane.xlu0 %939 }
 0x3de   : > { %v960_v55 = vsub.f32 %v917_v11, %v940_v53 }
 0x3e0   : > { %v5776_v56 = vpop.eup %4844  ;;  %v969_v57 = vmul.f32 1.442695, %v960_v55 }
 0x3e1   : > { %v983_v25 = vsel %vm934_vm12, %v5776_v56, 0.0 }
 0x3e2   : > { %4846 = vpow2.f32 %v969_v57  ;;  %984 = vadd.xlane.f32.xlu1 %v983_v25 }
 0x3e5   : > { %v943_v58 = vpop.xlane.xlu2 %942 }
 0x3e6   : > { %v961_v59 = vsub.f32 %v920_v40, %v943_v58  ;;  %v5804_v40 = vpop.f32.mrf.mxu3 }
 0x3e8   : > { %v5780_v37 = vpop.eup %4846  ;;  %v971_v60 = vmul.f32 1.442695, %v961_v59 }
 0x3e9   : > { %v986_v50 = vsel %vm934_vm12, %v5780_v37, 0.0 }
 0x3ea   : > { %4848 = vpow2.f32 %v971_v60  ;;  %987 = vadd.xlane.f32.xlu0 %v986_v50  ;;  %v1081_v60 = vld [vmem:[#allocation9 + $0x40] sm:$0xff] }
 0x3ed   : > { %v1544_v61 = vpop.permute.xlu1 %1543 }
 0x3ee   : > { %v1564_v62 = vsel %vm880_vm11, %v1544_v61, 0  ;;  %v1148_v19 = vpop.f32.mrf.mxu3  ;;  %v5845_v61 = vadd.f32 %v5794_v54, %v1081_v60 }
 0x3ef   : > { %1582 = vmatpush.bf16.xpose.msrb.mxu3 %v1564_v62  ;;  %v5831_v48 = vadd.f32 %v1148_v19, %v1085_v47 }
 0x3f0   : > { %v5785_v63 = vpop.eup %4848 }
 0x3f1   : > { %v989_v0 = vsel %vm934_vm12, %v5785_v63, 0.0  ;;  %v1170_v49 = vsel %vm934_vm12, %v5831_v48, -inf }
 0x3f2   : > { %990 = vadd.xlane.f32.xlu0 %v989_v0 }
 0x3f5   : > { %v949_v1 = vpop.xlane.xlu0 %948 }
 0x3f6   : > { %v963_v8 = vsub.f32 %v925_v21, %v949_v1  ;;  %4387 = vmatmul.msk.bf16.vlgmr.msrb.gmra.mxu3 %vm880_vm11, %v1536_v44  ;;  %v1150_v52 = vpop.f32.mrf.mxu3 }
 0x3f7   : > { %v5817_v32 = vadd.f32 %v1150_v52, %v1086_v30 }
 0x3f8   : > { %v975_v2 = vmul.f32 1.442695, %v963_v8 }
 0x3f9   : > { %v1173_v39 = vsel %vm934_vm12, %v5817_v32, -inf }
 0x3fa   : > { %4850 = vpow2.f32 %v975_v2 }
 0x3fd   : > { %v952_v10 = vpop.xlane.xlu2 %951 }
 0x3fe   : > { %v964_v12 = vsub.f32 %v5757_v26, %v952_v10  ;;  %v1153_v41 = vpop.f32.mrf.mxu3 }
 0x400   : > { %v5790_v3 = vpop.eup %4850  ;;  %v977_v13 = vmul.f32 1.442695, %v964_v12 }
 0x401   : > { %v995_v45 = vsel %vm934_vm12, %v5790_v3, 0.0 }
 0x402   : > { %996 = vadd.xlane.f32.xlu1 %v995_v45 }
 0x405   : > { %v955_v35 = vpop.xlane.xlu2 %954 }
 0x406   : > { %4388 = vmatmul.msk.bf16.gmra.mxu3 %vm880_vm11, %v1538_v51  ;;  %1541 = vrot.lane.b32.xlu0 %v5696_v28, %s5377_s22  ;;  %v1088_v51 = vld [vmem:[#allocation9 + $0x78] sm:$0xff]  ;;  %v1155_v53 = vpop.f32.mrf.mxu3  ;;  %v965_v25 = vsub.f32 %v5761_v31, %v955_v35  ;;  %v1158_v31 = vsel %vm934_vm12, %v5845_v61, -inf }
 0x407   : > { %v5837_v55 = vadd.f32 %v1155_v53, %v1088_v51 }
 0x408   : > { %v979_v50 = vmul.f32 1.442695, %v965_v25 }
 0x409   : > { %v1179_v58 = vsel %vm934_vm12, %v5837_v55, -inf }
 0x40d   : > { %v958_v23 = vpop.xlane.xlu2 %957 }
 0x40e   : > { %v966_v26 = vsub.f32 %v5765_v33, %v958_v23 }
 0x410   : > { %v981_v27 = vmul.f32 1.442695, %v966_v26 }
 0x418   : > { %v946_v6 = vpop.xlane.xlu1 %945 }
 0x419   : > { %v962_v7 = vsub.f32 %v922_v38, %v946_v6  ;;  %v5827_v38 = vadd.f32 %v1140_v5, %v1082_v36  ;;  %v1084_v5 = vld [vmem:[#allocation9 + $0x58] sm:$0xff] }
 0x41a   : > { %v5857_v6 = vadd.f32 %v5804_v40, %v1084_v5 }
 0x41b   : > { %v973_v11 = vmul.f32 1.442695, %v962_v7  ;;  %1318 = vrot.lane.b32.xlu1 %v5696_v28, %s5376_s18  ;;  %v1161_v44 = vsel %vm934_vm12, %v5827_v38, -inf }
 0x41c   : > { %v1167_v7 = vsel %vm934_vm12, %v5857_v6, -inf }
 0x41d   : > { %4852 = vpow2.f32 %v973_v11  ;;  %v1528_v11 = vld [vmem:[#allocation9 + $0xc8] sm:$0xff] }
 0x41e   : > { %4854 = vpow2.f32 %v977_v13 }
 0x41f   : > { %4856 = vpow2.f32 %v981_v27 }
 0x423   : > { %v5802_v14 = vpop.eup %4852 }
 0x424   : > { %v992_v16 = vsel %vm934_vm12, %v5802_v14, 0.0  ;;  %v5808_v18 = vpop.eup %4854 }
 0x425   : > { %993 = vadd.xlane.f32.xlu2 %v992_v16  ;;  %v998_v21 = vsel %vm934_vm12, %v5808_v18, 0.0  ;;  %v5823_v34 = vpop.eup %4856 }
 0x426   : > { %v1004_v33 = vsel %vm934_vm12, %v5823_v34, 0.0 }
 0x430   : > { %999 = vadd.xlane.f32.xlu0 %v998_v21 }
 0x438   : > { %1165 = vmax.xlane.f32.xlu0 %v1164_v29 }
 0x43d   : > { %1539 = vrot.lane.b32.xlu2 %v5664_v15, %s5377_s22 }
 0x440   : > { %1174 = vmax.xlane.f32.xlu0 %v1173_v39 }
 0x445   : > { %1005 = vadd.xlane.f32.xlu1 %v1004_v33 }
 0x44d   : > { %1162 = vmax.xlane.f32.xlu1 %v1161_v44 }
 0x454   : > { %1256 = vrot.lane.b32.xlu0 %v5696_v28, %s5378_s24 }
 0x455   : > { %1171 = vmax.xlane.f32.xlu1 %v1170_v49  ;;  %v985_v57 = vpop.xlane.xlu1 %984 }
 0x456   : > { %4858 = vrcp.f32 %v985_v57 }
 0x45c   : > { %1250 = vrot.lane.b32.xlu0 %v5670_v17, %s5378_s24  ;;  %v4859_v62 = vpop.eup %4858 }
 0x45d   : > { %1180 = vmax.xlane.f32.xlu1 %v1179_v58  ;;  %v988_v59 = vpop.xlane.xlu0 %987  ;;  %v1015_v1 = vmul.f32 %v4859_v62, %v5776_v56  ;;  %v1087_v56 = vld [vmem:[#allocation9 + $0x70] sm:$0xff] }
 0x45e   : > { %4860 = vrcp.f32 %v988_v59 }
 0x45f   : > { %4862 = vpow2.f32 %v979_v50 }
 0x464   : > { %v4861_v0 = vpop.eup %4860 }
 0x465   : > { %v1016_v8 = vmul.f32 %v4861_v0, %v5780_v37  ;;  %v5852_v45 = vpop.eup %4862  ;;  %v5861_v37 = vadd.f32 %v1153_v41, %v1087_v56  ;;  %v991_v16 = vpop.xlane.xlu0 %990 }
 0x466   : > { %1159 = vmax.xlane.f32.xlu2 %v1158_v31  ;;  %v1001_v54 = vsel %vm934_vm12, %v5852_v45, 0.0  ;;  %4864 = vrcp.f32 %v991_v16  ;;  %v1527_v16 = vld [vmem:[#allocation9 + $0xc0] sm:$0xff] }
 0x467   : > { %v1023_v2 = vpack.c.bf16 %v1016_v8, %v1015_v1  ;;  %v1176_v10 = vsel %vm934_vm12, %v5861_v37, -inf }
 0x469   : > { %4367 = vmatmul.msk.bf16.vlgmr.msra.gmra.mxu2 %vm934_vm12, %v1023_v2 }
 0x46c   : > { %v4865_v21 = vpop.eup %4864 }
 0x46d   : > { %v1017_v26 = vmul.f32 %v4865_v21, %v5785_v63 }
 0x46e   : > { %1002 = vadd.xlane.f32.xlu2 %v1001_v54 }
 0x475   : > { %v997_v52 = vpop.xlane.xlu1 %996 }
 0x476   : > { %1168 = vmax.xlane.f32.xlu2 %v1167_v7 }
 0x478   : > { %v1542_v19 = vpop.permute.xlu0 %1541 }
 0x479   : > { %v5863_v9 = vpop.f32.mrf.mxu3 }
 0x47e   : > { %1177 = vmax.xlane.f32.xlu2 %v1176_v10 }
 0x481   : > { %v1586_v12 = vpop.f32.mrf.mxu3 }
 0x482   : > { %v5867_v13 = vadd.f32 %v1586_v12, %v1528_v11  ;;  %v1529_v11 = vld [vmem:[#allocation9 + $0xd0] sm:$0xff] }
 0x484   : > { %v1607_v40 = vsel %vm934_vm12, %v5867_v13, -inf }
 0x486   : > { %1608 = vmax.xlane.f32.xlu0 %v1607_v40 }
 0x489   : > { %v1589_v12 = vpop.f32.mrf.mxu3 }
 0x48a   : > { %v5902_v40 = vadd.f32 %v1589_v12, %v1529_v11 }
 0x48d   : > { %v5876_v41 = vpop.permute.xlu1 %1318 }
 0x491   : > { %v1591_v21 = vpop.f32.mrf.mxu3 }
 0x498   : > { %v994_v35 = vpop.xlane.xlu2 %993 }
 0x499   : > { %4866 = vrcp.f32 %v994_v35  ;;  %v5915_v35 = vadd.f32 %v5863_v9, %v1527_v16 }
 0x49f   : > { %v4867_v22 = vpop.eup %4866 }
 0x4a0   : > { %v1540_v23 = vpop.permute.xlu2 %1539  ;;  %v1018_v27 = vmul.f32 %v4867_v22, %v5802_v14 }
 0x4a1   : > { %4389 = vmatmul.msk.bf16.gmra.mxu3 %vm880_vm11, %v1540_v23 }
 0x4a2   : > { %v1024_v29 = vpack.c.bf16 %v1018_v27, %v1017_v26 }
 0x4a3   : > { %v1000_v30 = vpop.xlane.xlu0 %999 }
 0x4a4   : > { %4368 = vmatmul.msk.bf16.gmra.mxu2 %vm934_vm12, %v1024_v29  ;;  %4868 = vrcp.f32 %v1000_v30 }
 0x4a5   : > { %4870 = vrcp.f32 %v997_v52  ;;  %v1531_v52 = vld [vmem:[#allocation9 + $0xe0] sm:$0xff] }
 0x4aa   : > { %v4869_v39 = vpop.eup %4868 }
 0x4ab   : > { %v4871_v33 = vpop.eup %4870  ;;  %v1020_v36 = vmul.f32 %v4869_v39, %v5808_v18  ;;  %v1166_v14 = vpop.xlane.xlu0 %1165 }
 0x4ac   : > { %v1019_v44 = vmul.f32 %v4871_v33, %v5790_v3  ;;  %v1184_v23 = vsub.f32 %v5812_v24, %v1166_v14 }
 0x4ae   : > { %v1025_v63 = vpack.c.bf16 %v1020_v36, %v1019_v44  ;;  %v1194_v27 = vmul.f32 1.442695, %v1184_v23 }
 0x4b1   : > { %4390 = vmatmul.msk.bf16.gmra.mxu3 %vm880_vm11, %v1542_v19  ;;  %v1530_v19 = vld [vmem:[#allocation9 + $0xd8] sm:$0xff] }
 0x4b2   : > { %v5921_v22 = vadd.f32 %v1591_v21, %v1530_v19 }
 0x4b3   : > { %v1175_v49 = vpop.xlane.xlu0 %1174 }
 0x4b4   : > { %4369 = vmatmul.msk.bf16.gmra.mxu2 %vm934_vm12, %v1025_v63  ;;  %v1187_v56 = vsub.f32 %v5817_v32, %v1175_v49  ;;  %v1613_v26 = vsel %vm934_vm12, %v5921_v22, -inf  ;;  %v1532_v63 = vld [vmem:[#allocation9 + $0xe8] sm:$0xff] }
 0x4b8   : > { %v1006_v47 = vpop.xlane.xlu1 %1005 }
 0x4c0   : > { %v1163_v51 = vpop.xlane.xlu1 %1162 }
 0x4c1   : > { %v1183_v53 = vsub.f32 %v5827_v38, %v1163_v51 }
 0x4c3   : > { %v1192_v57 = vmul.f32 1.442695, %v1183_v53  ;;  %v1533_v53 = vld [vmem:[#allocation9 + $0xf0] sm:$0xff] }
 0x4c5   : > { %4872 = vpow2.f32 %v1192_v57 }
 0x4c6   : > { %v1257_v25 = vpop.permute.xlu0 %1256 }
 0x4c7   : > { %1278 = vmatpush.bf16.msrb.mxu0 %v1257_v25 }
 0x4c8   : > { %v1172_v9 = vpop.xlane.xlu1 %1171 }
 0x4c9   : > { %v1186_v29 = vsub.f32 %v5831_v48, %v1172_v9  ;;  %v1304_v9 = vld [vmem:[#allocation9 + $0x80] sm:$0xff] }
 0x4cb   : > { %v5882_v18 = vpop.eup %4872 }
 0x4cc   : > { %v1209_v3 = vsel %vm934_vm12, %v5882_v18, 0.0 }
 0x4cd   : > { %1210 = vadd.xlane.f32.xlu1 %v1209_v3 }
 0x4d9   : > { %v1160_v58 = vpop.xlane.xlu2 %1159 }
 0x4da   : > { %v1182_v59 = vsub.f32 %v5845_v61, %v1160_v58 }
 0x4dc   : > { %v1190_v60 = vmul.f32 1.442695, %v1182_v59 }
 0x4de   : > { %4874 = vpow2.f32 %v1190_v60  ;;  %v1534_v60 = vld [vmem:[#allocation9 + $0xf8] sm:$0xff] }
 0x4df   : > { %4876 = vrcp.f32 %v1006_v47 }
 0x4e1   : > { %v1003_v50 = vpop.xlane.xlu2 %1002 }
 0x4e2   : > { %4878 = vrcp.f32 %v1003_v50 }
 0x4e4   : > { %v5887_v62 = vpop.eup %4874 }
 0x4e5   : > { %v1206_v38 = vsel %vm934_vm12, %v5887_v62, 0.0  ;;  %v4877_v0 = vpop.eup %4876 }
 0x4e6   : > { %1207 = vadd.xlane.f32.xlu2 %v1206_v38  ;;  %1252 = vrot.lane.b32.xlu1 %v5660_v4, %s5378_s24  ;;  %v1022_v61 = vmul.f32 %v4877_v0, %v5823_v34  ;;  %v1610_v34 = vsel %vm934_vm12, %v5902_v40, -inf }
 0x4e8   : > { %v4879_v31 = vpop.eup %4878 }
 0x4e9   : > { %v1169_v1 = vpop.xlane.xlu2 %1168  ;;  %v1021_v8 = vmul.f32 %v4879_v31, %v5852_v45  ;;  %v1200_v45 = vmul.f32 1.442695, %v1187_v56 }
 0x4ea   : > { %v1185_v2 = vsub.f32 %v5857_v6, %v1169_v1 }
 0x4eb   : > { %v1026_v54 = vpack.c.bf16 %v1022_v61, %v1021_v8  ;;  %v1181_v61 = vpop.xlane.xlu1 %1180 }
 0x4ec   : > { %v1196_v5 = vmul.f32 1.442695, %v1185_v2  ;;  %v5956_v59 = vpop.f32.mrf.mxu2 }
 0x4ed   : > { %4370 = vmatmul.msk.bf16.gmra.mxu2 %vm934_vm12, %v1026_v54  ;;  %v1189_v54 = vsub.f32 %v5837_v55, %v1181_v61 }
 0x4ee   : > { %4880 = vpow2.f32 %v1196_v5 }
 0x4ef   : > { %4882 = vpow2.f32 %v1200_v45  ;;  %v1251_v45 = vpop.permute.xlu0 %1250 }
 0x4f0   : > { %4884 = vpow2.f32 %v1194_v27 }
 0x4f1   : > { %v1178_v30 = vpop.xlane.xlu2 %1177 }
 0x4f2   : > { %v1188_v24 = vsub.f32 %v5861_v37, %v1178_v30 }
 0x4f4   : > { %v5897_v7 = vpop.eup %4880  ;;  %v5964_v31 = vpop.f32.mrf.mxu2 }
 0x4f5   : > { %v1215_v10 = vsel %vm934_vm12, %v5897_v7, 0.0  ;;  %v5910_v32 = vpop.eup %4882 }
 0x4f6   : > { %1216 = vadd.xlane.f32.xlu0 %v1215_v10  ;;  %v1221_v6 = vsel %vm934_vm12, %v5910_v32, 0.0  ;;  %v5929_v39 = vpop.eup %4884  ;;  %v1204_v10 = vmul.f32 1.442695, %v1189_v54 }
 0x4f7   : > { %v1212_v44 = vsel %vm934_vm12, %v5929_v39, 0.0 }
 0x4f9   : > { %v1609_v19 = vpop.xlane.xlu0 %1608 }
 0x4fa   : > { %v1629_v23 = vsub.f32 %v5867_v13, %v1609_v19 }
 0x4fd   : > { %4379 = vmatmul.msk.bf16.vlgmr.msrb.gmra.mxu2 %vm880_vm11, %v5770_v42  ;;  %v1604_v42 = vsel %vm934_vm12, %v5915_v35, -inf }
 0x4fe   : > { %1254 = vrot.lane.b32.xlu2 %v5664_v15, %s5378_s24  ;;  %1611 = vmax.xlane.f32.xlu0 %v1610_v34 }
 0x506   : > { %1222 = vadd.xlane.f32.xlu0 %v1221_v6 }
 0x50d   : > { %4380 = vmatmul.msk.bf16.gmra.mxu2 %vm880_vm11, %v5772_v43  ;;  %v1198_v43 = vmul.f32 1.442695, %v1186_v29 }
 0x50f   : > { %4886 = vpow2.f32 %v1198_v43 }
 0x510   : > { %1605 = vmax.xlane.f32.xlu1 %v1604_v42 }
 0x515   : > { %v5938_v14 = vpop.eup %4886 }
 0x516   : > { %v1218_v37 = vsel %vm934_vm12, %v5938_v14, 0.0 }
 0x518   : > { %1614 = vmax.xlane.f32.xlu1 %v1613_v26 }
 0x51d   : > { %4381 = vmatmul.msk.bf16.gmra.mxu2 %vm880_vm11, %v5774_v46  ;;  %v1202_v46 = vmul.f32 1.442695, %v1188_v24 }
 0x51f   : > { %4888 = vpow2.f32 %v1202_v46 }
 0x524   : > { %v1594_v33 = vpop.f32.mrf.mxu3 }
 0x525   : > { %v5932_v36 = vadd.f32 %v1594_v33, %v1531_v52  ;;  %v5948_v57 = vpop.eup %4888 }
 0x526   : > { %v1224_v58 = vsel %vm934_vm12, %v5948_v57, 0.0 }
 0x527   : > { %1213 = vadd.xlane.f32.xlu2 %v1212_v44  ;;  %v1616_v48 = vsel %vm934_vm12, %v5932_v36, -inf  ;;  %v5968_v1 = vpop.f32.mrf.mxu2  ;;  %v1305_v44 = vld [vmem:[#allocation9 + $0x88] sm:$0xff] }
 0x528   : > { %1617 = vmax.xlane.f32.xlu0 %v1616_v48 }
 0x52c   : > { %v1596_v47 = vpop.f32.mrf.mxu3 }
 0x52d   : > { %v5940_v49 = vadd.f32 %v1596_v47, %v1532_v63  ;;  %4382 = vmatmul.msk.bf16.gmra.mxu2 %vm880_vm11, %v5876_v41 }
 0x52f   : > { %1219 = vadd.xlane.f32.xlu2 %v1218_v37  ;;  %v1619_v51 = vsel %vm934_vm12, %v5940_v49, -inf  ;;  %v5972_v8 = vpop.f32.mrf.mxu2 }
 0x530   : > { %1620 = vmax.xlane.f32.xlu1 %v1619_v51 }
 0x534   : > { %v1599_v25 = vpop.f32.mrf.mxu3 }
 0x535   : > { %v5950_v3 = vadd.f32 %v1599_v25, %v1533_v53  ;;  %v1306_v53 = vld [vmem:[#allocation9 + $0x90] sm:$0xff] }
 0x537   : > { %1225 = vadd.xlane.f32.xlu2 %v1224_v58  ;;  %v1622_v41 = vsel %vm934_vm12, %v5950_v3, -inf  ;;  %v5977_v56 = vpop.f32.mrf.mxu2 }
 0x538   : > { %1623 = vmax.xlane.f32.xlu1 %v1622_v41  ;;  %v1307_v41 = vld [vmem:[#allocation9 + $0x98] sm:$0xff] }
 0x53c   : > { %v1601_v50 = vpop.f32.mrf.mxu3  ;;  %1479 = vrot.lane.b32.xlu0 %v5696_v28, %s5379_s27 }
 0x53d   : > { %v5960_v38 = vadd.f32 %v1601_v50, %v1534_v60 }
 0x53f   : > { %v1625_v0 = vsel %vm934_vm12, %v5960_v38, -inf }
 0x540   : > { %1626 = vmax.xlane.f32.xlu2 %v1625_v0  ;;  %v1211_v5 = vpop.xlane.xlu1 %1210 }
 0x544   : > { %1700 = vrot.lane.b32.xlu0 %v5664_v15, %s5380_s2 }
 0x551   : > { %1702 = vrot.lane.b32.xlu1 %v5696_v28, %s5380_s2 }
 0x558   : > { %1477 = vrot.lane.b32.xlu2 %v5664_v15, %s5379_s27  ;;  %v1253_v28 = vpop.permute.xlu1 %1252  ;;  %v5980_v15 = vpop.f32.mrf.mxu2 }
 0x559   : > { %v1208_v2 = vpop.xlane.xlu2 %1207 }
 0x55a   : > { %4890 = vrcp.f32 %v1208_v2 }
 0x55b   : > { %4892 = vrcp.f32 %v1211_v5  ;;  %v1308_v5 = vld [vmem:[#allocation9 + $0xa0] sm:$0xff] }
 0x55c   : > { %4894 = vpow2.f32 %v1204_v10 }
 0x560   : > { %v4891_v12 = vpop.eup %4890 }
 0x561   : > { %v1255_v11 = vpop.permute.xlu2 %1254  ;;  %v4893_v34 = vpop.eup %4892  ;;  %v1238_v6 = vmul.f32 %v4891_v12, %v5887_v62  ;;  %v1638_v62 = vmul.f32 1.442695, %v1629_v23 }
 0x562   : > { %1279 = vmatpush.bf16.msrb.mxu0 %v1255_v11  ;;  %v1239_v55 = vmul.f32 %v4893_v34, %v5882_v18  ;;  %v5983_v16 = vpop.eup %4894 }
 0x563   : > { %v1227_v21 = vsel %vm934_vm12, %v5983_v16, 0.0  ;;  %4896 = vpow2.f32 %v1638_v62 }
 0x564   : > { %v1246_v42 = vpack.c.bf16 %v1239_v55, %v1238_v6 }
 0x566   : > { %1280 = vmatpush.bf16.msrb.mxu0 %v1253_v28 }
 0x569   : > { %v5993_v18 = vpop.eup %4896  ;;  %v1217_v63 = vpop.xlane.xlu0 %1216 }
 0x56a   : > { %1281 = vmatpush.bf16.msrb.mxu0 %v1251_v45  ;;  %v1655_v43 = vsel %vm934_vm12, %v5993_v18, 0.0 }
 0x56d   : > { %4375 = vmatmul.msk.bf16.vlgmr.msrb.gmra.mxu0 %vm934_vm12, %v1246_v42 }
 0x56e   : > { %1228 = vadd.xlane.f32.xlu0 %v1227_v21  ;;  %v1309_v21 = vld [vmem:[#allocation9 + $0xa8] sm:$0xff] }
 0x570   : > { %v5989_v26 = vpop.f32.mrf.mxu2 }
 0x571   : > { %v6012_v58 = vpop.xlane.xlu0 %1611 }
 0x578   : > { %v5991_v27 = vpop.f32.mrf.mxu2 }
 0x579   : > { %v1223_v54 = vpop.xlane.xlu0 %1222 }
 0x580   : > { %v1361_v29 = vpop.f32.mrf.mxu2 }
 0x581   : > { %v5997_v30 = vadd.f32 %v1361_v29, %v1304_v9  ;;  %1656 = vadd.xlane.f32.xlu2 %v1655_v43 }
 0x583   : > { %v1606_v52 = vpop.xlane.xlu1 %1605  ;;  %v1381_v13 = vsel %vm934_vm12, %v5997_v30, -inf }
 0x584   : > { %v1628_v33 = vsub.f32 %v5915_v35, %v1606_v52  ;;  %1382 = vmax.xlane.f32.xlu0 %v1381_v13  ;;  %v1310_v52 = vld [vmem:[#allocation9 + $0xb0] sm:$0xff] }
 0x586   : > { %v1636_v24 = vmul.f32 1.442695, %v1628_v33 }
 0x588   : > { %4898 = vpow2.f32 %v1636_v24  ;;  %v1363_v48 = vpop.f32.mrf.mxu2 }
 0x589   : > { %v6002_v46 = vadd.f32 %v1363_v48, %v1305_v44  ;;  %4900 = vrcp.f32 %v1217_v63 }
 0x58b   : > { %v1384_v47 = vsel %vm934_vm12, %v6002_v46, -inf  ;;  %v6031_v62 = vpop.xlane.xlu1 %1614 }
 0x58c   : > { %1385 = vmax.xlane.f32.xlu2 %v1384_v47 }
 0x58e   : > { %v6006_v37 = vpop.eup %4898 }
 0x58f   : > { %v1652_v51 = vsel %vm934_vm12, %v6006_v37, 0.0  ;;  %v4901_v10 = vpop.eup %4900 }
 0x590   : > { %1653 = vadd.xlane.f32.xlu1 %v1652_v51  ;;  %v1366_v35 = vpop.f32.mrf.mxu2  ;;  %v1241_v6 = vmul.f32 %v4901_v10, %v5897_v7 }
 0x591   : > { %v6010_v25 = vadd.f32 %v1366_v35, %v1306_v53  ;;  %v1311_v35 = vld [vmem:[#allocation9 + $0xb8] sm:$0xff] }
 0x593   : > { %v1387_v60 = vsel %vm934_vm12, %v6010_v25, -inf }
 0x598   : > { %v1368_v50 = vpop.f32.mrf.mxu2  ;;  %1388 = vmax.xlane.f32.xlu1 %v1387_v60  ;;  %1698 = vrot.lane.b32.xlu0 %v5660_v4, %s5380_s2 }
 0x599   : > { %v6018_v0 = vadd.f32 %v1368_v50, %v1307_v41 }
 0x59a   : > { %v1214_v61 = vpop.xlane.xlu2 %1213 }
 0x59b   : > { %4902 = vrcp.f32 %v1214_v61  ;;  %v1390_v2 = vsel %vm934_vm12, %v6018_v0, -inf  ;;  %v6028_v19 = vpop.xlane.xlu0 %1617 }
 0x59c   : > { %1391 = vmax.xlane.f32.xlu2 %v1390_v2 }
 0x5a0   : > { %v1371_v11 = vpop.f32.mrf.mxu2 }
 0x5a1   : > { %v4903_v12 = vpop.eup %4902  ;;  %v6022_v45 = vadd.f32 %v1371_v11, %v1308_v5 }
 0x5a2   : > { %v1220_v28 = vpop.xlane.xlu2 %1219  ;;  %v1240_v34 = vmul.f32 %v4903_v12, %v5929_v39 }
 0x5a3   : > { %v1393_v55 = vsel %vm934_vm12, %v6022_v45, -inf  ;;  %4904 = vrcp.f32 %v1220_v28  ;;  %v1621_v44 = vpop.xlane.xlu1 %1620 }
 0x5a4   : > { %1394 = vmax.xlane.f32.xlu1 %v1393_v55  ;;  %v1247_v42 = vpack.c.bf16 %v1241_v6, %v1240_v34  ;;  %4906 = vrcp.f32 %v1223_v54 }
 0x5a6   : > { %4376 = vmatmul.msk.bf16.gmra.mxu0 %vm934_vm12, %v1247_v42 }
 0x5a8   : > { %v1373_v23 = vpop.f32.mrf.mxu2 }
 0x5a9   : > { %v6033_v9 = vadd.f32 %v1373_v23, %v1309_v21  ;;  %v4905_v29 = vpop.eup %4904 }
 0x5aa   : > { %v1226_v39 = vpop.xlane.xlu2 %1225  ;;  %v4907_v13 = vpop.eup %4906  ;;  %v1242_v24 = vmul.f32 %v4905_v29, %v5938_v14 }
 0x5ab   : > { %v1396_v7 = vsel %vm934_vm12, %v6033_v9, -inf  ;;  %v1243_v63 = vmul.f32 %v4907_v13, %v5910_v32  ;;  %v1624_v50 = vpop.xlane.xlu1 %1623  ;;  %4908 = vrcp.f32 %v1226_v39 }
 0x5ac   : > { %1397 = vmax.xlane.f32.xlu2 %v1396_v7 }
 0x5ad   : > { %v1248_v53 = vpack.c.bf16 %v1243_v63, %v1242_v24 }
 0x5ae   : > { %v1480_v43 = vpop.permute.xlu0 %1479 }
 0x5af   : > { %1501 = vmatpush.bf16.msrb.mxu1 %v1480_v43 }
 0x5b0   : > { %v1376_v33 = vpop.f32.mrf.mxu2 }
 0x5b1   : > { %v6038_v48 = vadd.f32 %v1376_v33, %v1310_v52  ;;  %v4909_v5 = vpop.eup %4908 }
 0x5b2   : > { %v1244_v11 = vmul.f32 %v4909_v5, %v5948_v57 }
 0x5b3   : > { %v6041_v47 = vpop.xlane.xlu2 %1626  ;;  %v1399_v51 = vsel %vm934_vm12, %v6038_v48, -inf }
 0x5b4   : > { %1400 = vmax.xlane.f32.xlu1 %v1399_v51  ;;  %v1633_v51 = vsub.f32 %v5940_v49, %v1621_v44 }
 0x5b6   : > { %4377 = vmatmul.msk.bf16.gmra.mxu0 %vm934_vm12, %v1248_v53  ;;  %v1701_v2 = vpop.permute.xlu0 %1700 }
 0x5b8   : > { %v1378_v41 = vpop.f32.mrf.mxu2 }
 0x5b9   : > { %v6046_v60 = vadd.f32 %v1378_v41, %v1311_v35  ;;  %v1646_v41 = vmul.f32 1.442695, %v1633_v51 }
 0x5bb   : > { %v1478_v14 = vpop.permute.xlu2 %1477  ;;  %v1402_v61 = vsel %vm934_vm12, %v6046_v60, -inf }
 0x5bc   : > { %1403 = vmax.xlane.f32.xlu2 %v1402_v61  ;;  %1502 = vmatpush.bf16.msrb.mxu1 %v1478_v14 }
 0x5c3   : > { %v1703_v32 = vpop.permute.xlu1 %1702 }
 0x5c4   : > { %1724 = vmatpush.bf16.msra.mxu0 %v1703_v32 }
 0x5c8   : > { %1725 = vmatpush.bf16.msra.mxu0 %v1701_v2 }
 0x5cd   : > { %1475 = vrot.lane.b32.xlu1 %v5660_v4, %s5379_s27 }
 0x5e1   : > { %v1229_v54 = vpop.xlane.xlu0 %1228 }
 0x5e2   : > { %4910 = vrcp.f32 %v1229_v54 }
 0x5e8   : > { %v4911_v10 = vpop.eup %4910 }
 0x5e9   : > { %v1245_v12 = vmul.f32 %v4911_v10, %v5983_v16  ;;  %v1632_v10 = vsub.f32 %v5932_v36, %v6028_v19 }
 0x5eb   : > { %v1249_v28 = vpack.c.bf16 %v1245_v12, %v1244_v11  ;;  %v1644_v12 = vmul.f32 1.442695, %v1632_v10 }
 0x5ed   : > { %4378 = vmatmul.msk.bf16.gmra.mxu0 %vm934_vm12, %v1249_v28 }
 0x5f4   : > { %v6055_v34 = vpop.xlane.xlu2 %1656 }
 0x5f7   : > { %v1383_v6 = vpop.xlane.xlu0 %1382 }
 0x5f8   : > { %v1405_v55 = vsub.f32 %v5997_v30, %v1383_v6  ;;  %v1631_v6 = vsub.f32 %v5921_v22, %v6031_v62 }
 0x5fa   : > { %v1413_v42 = vmul.f32 1.442695, %v1405_v55 }
 0x5fc   : > { %4912 = vpow2.f32 %v1413_v42 }
 0x5ff   : > { %v1386_v4 = vpop.xlane.xlu2 %1385 }
 0x600   : > { %v1406_v21 = vsub.f32 %v6002_v46, %v1386_v4 }
 0x602   : > { %v6059_v23 = vpop.eup %4912  ;;  %v1415_v39 = vmul.f32 1.442695, %v1406_v21 }
 0x603   : > { %v1429_v57 = vsel %vm934_vm12, %v6059_v23, 0.0  ;;  %v6063_v16 = vpop.xlane.xlu1 %1653 }
 0x604   : > { %4914 = vpow2.f32 %v1415_v39  ;;  %1430 = vadd.xlane.f32.xlu2 %v1429_v57 }
 0x60a   : > { %v6065_v7 = vpop.eup %4914  ;;  %v1699_v29 = vpop.permute.xlu0 %1698 }
 0x60b   : > { %1726 = vmatpush.bf16.msra.mxu0 %v1699_v29  ;;  %v1432_v30 = vsel %vm934_vm12, %v6065_v7, 0.0  ;;  %v1389_v43 = vpop.xlane.xlu1 %1388 }
 0x60c   : > { %1433 = vadd.xlane.f32.xlu0 %v1432_v30  ;;  %v1407_v54 = vsub.f32 %v6010_v25, %v1389_v43  ;;  %v1642_v25 = vmul.f32 1.442695, %v1631_v6 }
 0x60e   : > { %v1417_v11 = vmul.f32 1.442695, %v1407_v54 }
 0x60f   : > { %v1392_v46 = vpop.xlane.xlu2 %1391 }
 0x610   : > { %v1408_v52 = vsub.f32 %v6018_v0, %v1392_v46 }
 0x612   : > { %v1419_v13 = vmul.f32 1.442695, %v1408_v52  ;;  %v1635_v52 = vsub.f32 %v5960_v38, %v6041_v47 }
 0x614   : > { %4916 = vpow2.f32 %v1419_v13  ;;  %v1650_v13 = vmul.f32 1.442695, %v1635_v52 }
 0x617   : > { %v1395_v33 = vpop.xlane.xlu1 %1394 }
 0x618   : > { %v1409_v24 = vsub.f32 %v6022_v45, %v1395_v33  ;;  %v1634_v45 = vsub.f32 %v5950_v3, %v1624_v50 }
 0x61a   : > { %v6071_v63 = vpop.eup %4916  ;;  %v1421_v53 = vmul.f32 1.442695, %v1409_v24  ;;  %v1648_v44 = vmul.f32 1.442695, %v1634_v45  ;;  %v1283_v24 = vpop.f32.mrf.mxu0 }
 0x61b   : > { %v1438_v35 = vsel %vm934_vm12, %v6071_v63, 0.0 }
 0x61c   : > { %4918 = vpow2.f32 %v1421_v53  ;;  %1439 = vadd.xlane.f32.xlu1 %v1438_v35  ;;  %1473 = vrot.lane.b32.xlu2 %v5670_v17, %s5379_s27 }
 0x61d   : > { %4920 = vpow2.f32 %v1646_v41 }
 0x61e   : > { %4922 = vpow2.f32 %v1648_v44 }
 0x61f   : > { %v1398_v5 = vpop.xlane.xlu2 %1397 }
 0x620   : > { %1696 = vrot.lane.b32.xlu0 %v5670_v17, %s5380_s2  ;;  %v1630_v17 = vsub.f32 %v5902_v40, %v6012_v58  ;;  %v1410_v4 = vsub.f32 %v6033_v9, %v1398_v5 }
 0x622   : > { %v6080_v0 = vpop.eup %4918  ;;  %v1640_v50 = vmul.f32 1.442695, %v1630_v17  ;;  %v1423_v21 = vmul.f32 1.442695, %v1410_v4  ;;  %v1285_v35 = vpop.f32.mrf.mxu0 }
 0x623   : > { %v1441_v49 = vsel %vm934_vm12, %v6080_v0, 0.0  ;;  %v6085_v14 = vpop.eup %4920  ;;  %v4690_v47 = vpack.i.bf16 %v1285_v35, %v1283_v24 }
 0x624   : > { %1442 = vadd.xlane.f32.xlu1 %v1441_v49  ;;  %v1667_v61 = vsel %vm934_vm12, %v6085_v14, 0.0  ;;  %v6089_v32 = vpop.eup %4922  ;;  %4924 = vpow2.f32 %v1640_v50 }
 0x625   : > { %v1670_v3 = vsel %vm934_vm12, %v6089_v32, 0.0  ;;  %4926 = vpow2.f32 %v1417_v11 }
 0x626   : > { %4928 = vpow2.f32 %v1644_v12 }
 0x627   : > { %v1401_v2 = vpop.xlane.xlu1 %1400  ;;  %4930 = vpow2.f32 %v1642_v25 }
 0x628   : > { %v1411_v57 = vsub.f32 %v6038_v48, %v1401_v2 }
 0x62a   : > { %v6100_v58 = vpop.eup %4924  ;;  %v1425_v30 = vmul.f32 1.442695, %v1411_v57 }
 0x62b   : > { %v1658_v42 = vsel %vm934_vm12, %v6100_v58, 0.0  ;;  %v6105_v36 = vpop.eup %4926 }
 0x62c   : > { %1668 = vadd.xlane.f32.xlu1 %v1667_v61  ;;  %v6108_v22 = vpop.eup %4928  ;;  %v1435_v62 = vsel %vm934_vm12, %v6105_v36, 0.0 }
 0x62d   : > { %v6114_v39 = vpop.eup %4930 }
 0x62e   : > { %v1661_v9 = vsel %vm934_vm12, %v6114_v39, 0.0 }
 0x62f   : > { %v1404_v40 = vpop.xlane.xlu2 %1403 }
 0x630   : > { %v1412_v55 = vsub.f32 %v6046_v60, %v1404_v40  ;;  %v1664_v60 = vsel %vm934_vm12, %v6108_v22, 0.0 }
 0x632   : > { %v1427_v19 = vmul.f32 1.442695, %v1412_v55 }
 0x634   : > { %1671 = vadd.xlane.f32.xlu1 %v1670_v3  ;;  %4932 = vpow2.f32 %v1427_v19 }
 0x635   : > { %4934 = vpow2.f32 %v1423_v21 }
 0x636   : > { %4936 = vpow2.f32 %v1425_v30 }
 0x637   : > { %4938 = vpow2.f32 %v1650_v13  ;;  %v1288_v13 = vpop.f32.mrf.mxu0 }
 0x63a   : > { %v6117_v29 = vpop.eup %4932 }
 0x63b   : > { %v1450_v43 = vsel %vm934_vm12, %v6117_v29, 0.0  ;;  %v6123_v46 = vpop.eup %4934 }
 0x63c   : > { %v1444_v48 = vsel %vm934_vm12, %v6123_v46, 0.0  ;;  %v6129_v33 = vpop.eup %4936 }
 0x63d   : > { %v1447_v51 = vsel %vm934_vm12, %v6129_v33, 0.0  ;;  %v6133_v53 = vpop.eup %4938 }
 0x63e   : > { %v1673_v38 = vsel %vm934_vm12, %v6133_v53, 0.0 }
 0x63f   : > { %v1476_v28 = vpop.permute.xlu1 %1475 }
 0x640   : > { %1503 = vmatpush.bf16.msrb.mxu1 %v1476_v28 }
 0x645   : > { %1659 = vadd.xlane.f32.xlu2 %v1658_v42 }
 0x64a   : > { %1436 = vadd.xlane.f32.xlu0 %v1435_v62 }
 0x64d   : > { %1665 = vadd.xlane.f32.xlu2 %v1664_v60 }
 0x652   : > { %1662 = vadd.xlane.f32.xlu0 %v1661_v9 }
 0x655   : > { %1451 = vadd.xlane.f32.xlu2 %v1450_v43 }
 0x65a   : > { %1445 = vadd.xlane.f32.xlu0 %v1444_v48 }
 0x662   : > { %1448 = vadd.xlane.f32.xlu0 %v1447_v51 }
 0x66a   : > { %1674 = vadd.xlane.f32.xlu0 %v1673_v38 }
 0x66d   : > { %4691 = vrot.lane.b32.xlu2 %v4690_v47, %s5381_s4 }
 0x677   : > { %v1431_v41 = vpop.xlane.xlu2 %1430 }
 0x678   : > { %4940 = vrcp.f32 %v1431_v41 }
 0x67e   : > { %v4941_v44 = vpop.eup %4940 }
 0x67f   : > { %v1474_v45 = vpop.permute.xlu2 %1473  ;;  %v1434_v49 = vpop.xlane.xlu0 %1433  ;;  %v1461_v17 = vmul.f32 %v4941_v44, %v6059_v23 }
 0x680   : > { %4942 = vrcp.f32 %v1434_v49  ;;  %1504 = vmatpush.bf16.msrb.mxu1 %v1474_v45  ;;  %v1290_v45 = vpop.f32.mrf.mxu0 }
 0x681   : > { %4944 = vrcp.f32 %v6063_v16 }
 0x682   : > { %4946 = vrcp.f32 %v6055_v34 }
 0x686   : > { %v4943_v61 = vpop.eup %4942 }
 0x687   : > { %v1462_v3 = vmul.f32 %v4943_v61, %v6065_v7  ;;  %v4945_v2 = vpop.eup %4944 }
 0x688   : > { %v4947_v54 = vpop.eup %4946  ;;  %v1684_v5 = vmul.f32 %v4945_v2, %v6006_v37 }
 0x689   : > { %v1469_v50 = vpack.c.bf16 %v1462_v3, %v1461_v17  ;;  %v1685_v10 = vmul.f32 %v4947_v54, %v5993_v18  ;;  %v1293_v3 = vpop.f32.mrf.mxu0 }
 0x68b   : > { %4383 = vmatmul.msk.bf16.vlgmr.msrb.gmra.mxu1 %vm934_vm12, %v1469_v50  ;;  %v1692_v12 = vpack.c.bf16 %v1685_v10, %v1684_v5 }
 0x68f   : > { %v1440_v16 = vpop.xlane.xlu1 %1439 }
 0x690   : > { %4948 = vrcp.f32 %v1440_v16 }
 0x691   : > { %v1295_v2 = vpop.f32.mrf.mxu0 }
 0x692   : > { %v1697_v11 = vpop.permute.xlu0 %1696 }
 0x693   : > { %1727 = vmatpush.bf16.msra.mxu0 %v1697_v11 }
 0x696   : > { %4391 = vmatmul.msk.bf16.vlgmr.msra.gmra.mxu0 %vm934_vm12, %v1692_v12  ;;  %v4949_v34 = vpop.eup %4948 }
 0x697   : > { %v1464_v37 = vmul.f32 %v4949_v34, %v6071_v63  ;;  %v1443_v18 = vpop.xlane.xlu1 %1442 }
 0x699   : > { %v1298_v54 = vpop.f32.mrf.mxu0 }
 0x69f   : > { %v1669_v57 = vpop.xlane.xlu1 %1668 }
 0x6a1   : > { %v1300_v5 = vpop.f32.mrf.mxu0 }
 0x6a7   : > { %v1672_v41 = vpop.xlane.xlu1 %1671 }
 0x6b8   : > { %v1660_v7 = vpop.xlane.xlu2 %1659 }
 0x6bd   : > { %v1437_v23 = vpop.xlane.xlu0 %1436 }
 0x6be   : > { %4950 = vrcp.f32 %v1437_v23  ;;  %v4735_v23 = vpack.i.bf16 %v1300_v5, %v1298_v54 }
 0x6bf   : > { %4952 = vrcp.f32 %v1660_v7 }
 0x6c0   : > { %v1666_v21 = vpop.xlane.xlu2 %1665 }
 0x6c4   : > { %v4951_v28 = vpop.eup %4950 }
 0x6c5   : > { %v1663_v6 = vpop.xlane.xlu0 %1662  ;;  %v1463_v40 = vmul.f32 %v4951_v28, %v6105_v36  ;;  %v4953_v25 = vpop.eup %4952 }
 0x6c6   : > { %4954 = vrcp.f32 %v1663_v6  ;;  %v1686_v4 = vmul.f32 %v4953_v25, %v6100_v58 }
 0x6c7   : > { %v1470_v55 = vpack.c.bf16 %v1464_v37, %v1463_v40  ;;  %4956 = vrcp.f32 %v1443_v18 }
 0x6c8   : > { %v1452_v58 = vpop.xlane.xlu2 %1451 }
 0x6c9   : > { %4384 = vmatmul.msk.bf16.gmra.mxu1 %vm934_vm12, %v1470_v55  ;;  %v4585_v55 = vld [vmem:[%s7326_s5 + $0x8] sm:$0xff] }
 0x6ca   : > { %1913 = vmatpush.bf16.msra.mxu2 %v4585_v55 }
 0x6cc   : > { %v4955_v42 = vpop.eup %4954 }
 0x6cd   : > { %v1446_v19 = vpop.xlane.xlu0 %1445  ;;  %v1687_v62 = vmul.f32 %v4955_v42, %v6114_v39  ;;  %v4957_v63 = vpop.eup %4956 }
 0x6ce   : > { %4958 = vrcp.f32 %v1446_v19  ;;  %v1465_v30 = vmul.f32 %v4957_v63, %v6080_v0 }
 0x6cf   : > { %v1693_v60 = vpack.c.bf16 %v1687_v62, %v1686_v4  ;;  %4960 = vrcp.f32 %v1666_v21 }
 0x6d0   : > { %4962 = vrcp.f32 %v1669_v57 }
 0x6d1   : > { %4392 = vmatmul.msk.bf16.gmra.mxu0 %vm934_vm12, %v1693_v60 }
 0x6d4   : > { %v4959_v36 = vpop.eup %4958 }
 0x6d5   : > { %v1449_v9 = vpop.xlane.xlu0 %1448  ;;  %v1466_v43 = vmul.f32 %v4959_v36, %v6123_v46  ;;  %v4961_v48 = vpop.eup %4960  ;;  %v4584_v36 = vld [vmem:[%s7326_s5] sm:$0xff] }
 0x6d6   : > { %v4963_v39 = vpop.eup %4962  ;;  %4964 = vrcp.f32 %v1449_v9  ;;  %v1688_v24 = vmul.f32 %v4961_v48, %v6108_v22  ;;  %1914 = vmatpush.bf16.msra.mxu2 %v4584_v36 }
 0x6d7   : > { %v1471_v52 = vpack.c.bf16 %v1466_v43, %v1465_v30  ;;  %4966 = vrcp.f32 %v1452_v58  ;;  %v1689_v51 = vmul.f32 %v4963_v39, %v6085_v14  ;;  %v4692_v43 = vpop.permute.xlu2 %4691 }
 0x6d8   : > { %v4694_v48 = vunpack.i.h.bf16 %v4692_v43  ;;  %v4693_v58 = vunpack.i.l.bf16 %v4692_v43 }
 0x6d9   : > { %4385 = vmatmul.msk.bf16.gmra.mxu1 %vm934_vm12, %v1471_v52  ;;  %v1694_v38 = vpack.c.bf16 %v1689_v51, %v1688_v24 }
 0x6da   : > { %v1846_v51 = vsel %vm880_vm11, %v5964_v31, %v4694_v48 }
 0x6dc   : > { %v4965_v47 = vpop.eup %4964 }
 0x6dd   : > { %v1675_v35 = vpop.xlane.xlu0 %1674  ;;  %v4967_v0 = vpop.eup %4966  ;;  %v1467_v46 = vmul.f32 %v4965_v47, %v6129_v33 }
 0x6de   : > { %4968 = vrcp.f32 %v1675_v35  ;;  %v1468_v49 = vmul.f32 %v4967_v0, %v6117_v29  ;;  %v1845_v35 = vsel %vm880_vm11, %v5956_v59, %v4693_v58 }
 0x6df   : > { %4970 = vrcp.f32 %v1672_v41 }
 0x6e0   : > { %v1472_v44 = vpack.c.bf16 %v1468_v49, %v1467_v46 }
 0x6e1   : > { %4393 = vmatmul.msk.bf16.gmra.mxu0 %vm934_vm12, %v1694_v38 }
 0x6e4   : > { %v4969_v61 = vpop.eup %4968 }
 0x6e5   : > { %v4971_v22 = vpop.eup %4970  ;;  %v1691_v14 = vmul.f32 %v4969_v61, %v6133_v53  ;;  %v4720_v53 = vpack.i.bf16 %v1295_v2, %v1293_v3 }
 0x6e6   : > { %v1690_v17 = vmul.f32 %v4971_v22, %v6089_v32  ;;  %v4705_v32 = vpack.i.bf16 %v1290_v45, %v1288_v13 }
 0x6e8   : > { %v1695_v50 = vpack.c.bf16 %v1691_v14, %v1690_v17 }
 0x6e9   : > { %4386 = vmatmul.msk.bf16.gmra.mxu1 %vm934_vm12, %v1472_v44 }
 0x6f1   : > { %4394 = vmatmul.msk.bf16.gmra.mxu0 %vm934_vm12, %v1695_v50 }
 0x708   : > { %v1506_v33 = vpop.f32.mrf.mxu1 }
 0x710   : > { %v1508_v10 = vpop.f32.mrf.mxu1 }
 0x711   : > { %v4695_v11 = vpack.i.bf16 %v1508_v10, %v1506_v33 }
 0x713   : > { %4696 = vrot.lane.b32.xlu1 %v4695_v11, %s7340_s23  ;;  %v1729_v29 = vpop.f32.mrf.mxu0 }
 0x71b   : > { %v1731_v12 = vpop.f32.mrf.mxu0 }
 0x71c   : > { %v4700_v16 = vpack.i.bf16 %v1731_v12, %v1729_v29 }
 0x71e   : > { %4701 = vrot.lane.b32.xlu0 %v4700_v16, %s7338_s1 }
 0x726   : > { %4706 = vrot.lane.b32.xlu0 %v4705_v32, %s5381_s4 }
 0x72e   : > { %4721 = vrot.lane.b32.xlu0 %v4720_v53, %s5381_s4 }
 0x736   : > { %4736 = vrot.lane.b32.xlu0 %v4735_v23, %s5381_s4 }
 0x746   : > { %v1511_v7 = vpop.f32.mrf.mxu1 }
 0x74e   : > { %v1513_v34 = vpop.f32.mrf.mxu1  ;;  %v1734_v28 = vpop.f32.mrf.mxu0 }
 0x74f   : > { %v4710_v6 = vpack.i.bf16 %v1513_v34, %v1511_v7 }
 0x751   : > { %4711 = vrot.lane.b32.xlu2 %v4710_v6, %s7340_s23 }
 0x756   : > { %v1516_v40 = vpop.f32.mrf.mxu1  ;;  %v1736_v37 = vpop.f32.mrf.mxu0 }
 0x757   : > { %v4715_v18 = vpack.i.bf16 %v1736_v37, %v1734_v28 }
 0x759   : > { %4716 = vrot.lane.b32.xlu1 %v4715_v18, %s7338_s1 }
 0x75e   : > { %v1518_v25 = vpop.f32.mrf.mxu1  ;;  %v1739_v42 = vpop.f32.mrf.mxu0 }
 0x75f   : > { %v4725_v19 = vpack.i.bf16 %v1518_v25, %v1516_v40 }
 0x761   : > { %4726 = vrot.lane.b32.xlu2 %v4725_v19, %s7340_s23 }
 0x766   : > { %v1521_v4 = vpop.f32.mrf.mxu1  ;;  %v1741_v62 = vpop.f32.mrf.mxu0 }
 0x767   : > { %v4730_v21 = vpack.i.bf16 %v1741_v62, %v1739_v42 }
 0x769   : > { %4731 = vrot.lane.b32.xlu1 %v4730_v21, %s7338_s1 }
 0x76e   : > { %v1523_v60 = vpop.f32.mrf.mxu1  ;;  %v1744_v57 = vpop.f32.mrf.mxu0 }
 0x76f   : > { %v4740_v63 = vpack.i.bf16 %v1523_v60, %v1521_v4 }
 0x771   : > { %4741 = vrot.lane.b32.xlu2 %v4740_v63, %s7340_s23 }
 0x776   : > { %v1746_v9 = vpop.f32.mrf.mxu0 }
 0x777   : > { %v4745_v30 = vpack.i.bf16 %v1746_v9, %v1744_v57 }
 0x779   : > { %4746 = vrot.lane.b32.xlu1 %v4745_v30, %s7338_s1 }
 0x785   : > { %v4697_v52 = vpop.permute.xlu1 %4696 }
 0x786   : > { %v4699_v39 = vunpack.i.h.bf16 %v4697_v52  ;;  %v4698_v13 = vunpack.i.l.bf16 %v4697_v52 }
 0x788   : > { %v1855_v41 = vsel %vm1853_vm13, %v1846_v51, %v4699_v39  ;;  %v1854_v0 = vsel %vm1853_vm13, %v1845_v35, %v4698_v13  ;;  %v5180_v39 = vld [vmem:[%s5534_s17] sm:$0xff] }
 0x790   : > { %v4702_v24 = vpop.permute.xlu0 %4701 }
 0x791   : > { %v4704_v38 = vunpack.i.h.bf16 %v4702_v24  ;;  %v4703_v47 = vunpack.i.l.bf16 %v4702_v24 }
 0x793   : > { %v1864_v46 = vsel %vm1862_vm14, %v1855_v41, %v4704_v38  ;;  %v1863_v45 = vsel %vm1862_vm14, %v1854_v0, %v4703_v47  ;;  %v5181_v38 = vld [vmem:[%s5534_s17 + $0x8] sm:$0xff] }
 0x794   : > { %v1871_v49 = vpack.c.bf16 %v1864_v46, %v1863_v45  ;;  %v5182_v45 = vld [vmem:[%s5534_s17 + $0x10] sm:$0xff] }
 0x796   : > { %4403 = vmatmul.msk.bf16.vlgmr.msra.gmra.mxu2 %vm565_vm0, %v1871_v49 }
 0x798   : > { %v4707_v44 = vpop.permute.xlu0 %4706 }
 0x799   : > { %v4709_v22 = vunpack.i.h.bf16 %v4707_v44  ;;  %v4708_v31 = vunpack.i.l.bf16 %v4707_v44 }
 0x79b   : > { %v1848_v3 = vsel %vm880_vm11, %v5972_v8, %v4709_v22  ;;  %v1847_v50 = vsel %vm880_vm11, %v5968_v1, %v4708_v31  ;;  %v5183_v31 = vld [vmem:[%s5534_s17 + $0x18] sm:$0xff] }
 0x7a0   : > { %v4722_v12 = vpop.permute.xlu0 %4721 }
 0x7a1   : > { %v4724_v32 = vunpack.i.h.bf16 %v4722_v12  ;;  %v4723_v8 = vunpack.i.l.bf16 %v4722_v12 }
 0x7a3   : > { %v1850_v7 = vsel %vm880_vm11, %v5980_v15, %v4724_v32  ;;  %v1849_v34 = vsel %vm880_vm11, %v5977_v56, %v4723_v8  ;;  %v5186_v32 = vld [vmem:[%s5534_s17 + $0x30] sm:$0xff] }
 0x7a8   : > { %v4737_v42 = vpop.permute.xlu0 %4736 }
 0x7a9   : > { %v4739_v4 = vunpack.i.h.bf16 %v4737_v42  ;;  %v4738_v15 = vunpack.i.l.bf16 %v4737_v42 }
 0x7ab   : > { %v4712_v61 = vpop.permute.xlu2 %4711  ;;  %v1852_v60 = vsel %vm880_vm11, %v5991_v27, %v4739_v4  ;;  %v1851_v57 = vsel %vm880_vm11, %v5989_v26, %v4738_v15  ;;  %v4813_v27 = vld [vmem:[%s7327_s6] ss:$0 sm:$0xff] }
 0x7ac   : > { %v4714_v14 = vunpack.i.h.bf16 %v4712_v61  ;;  %v4713_v17 = vunpack.i.l.bf16 %v4712_v61 }
 0x7ae   : > { %v1856_v33 = vsel %vm1853_vm13, %v1847_v50, %v4713_v17  ;;  %v1857_v5 = vsel %vm1853_vm13, %v1848_v3, %v4714_v14  ;;  %v5184_v50 = vld [vmem:[%s5534_s17 + $0x20] sm:$0xff] }
 0x7bb   : > { %v4727_v16 = vpop.permute.xlu2 %4726 }
 0x7bc   : > { %v4729_v53 = vunpack.i.h.bf16 %v4727_v16  ;;  %v4728_v23 = vunpack.i.l.bf16 %v4727_v16 }
 0x7be   : > { %v1858_v40 = vsel %vm1853_vm13, %v1849_v34, %v4728_v23  ;;  %v1859_v37 = vsel %vm1853_vm13, %v1850_v7, %v4729_v53 }
 0x7cb   : > { %v4717_v59 = vpop.permute.xlu1 %4716  ;;  %v4742_v19 = vpop.permute.xlu2 %4741 }
 0x7cc   : > { %v4719_v2 = vunpack.i.h.bf16 %v4717_v59  ;;  %v4718_v54 = vunpack.i.l.bf16 %v4717_v59  ;;  %v4744_v62 = vunpack.i.h.bf16 %v4742_v19  ;;  %v4743_v56 = vunpack.i.l.bf16 %v4742_v19 }
 0x7ce   : > { %v1865_v10 = vsel %vm1862_vm14, %v1856_v33, %v4718_v54  ;;  %v1866_v11 = vsel %vm1862_vm14, %v1857_v5, %v4719_v2  ;;  %v1860_v9 = vsel %vm1853_vm13, %v1851_v57, %v4743_v56  ;;  %v1861_v30 = vsel %vm1853_vm13, %v1852_v60, %v4744_v62 }
 0x7cf   : > { %v1872_v29 = vpack.c.bf16 %v1866_v11, %v1865_v10  ;;  %v5185_v10 = vld [vmem:[%s5534_s17 + $0x28] sm:$0xff] }
 0x7d1   : > { %4404 = vmatmul.msk.bf16.gmra.mxu2 %vm565_vm0, %v1872_v29 }
 0x7db   : > { %v4732_v1 = vpop.permute.xlu1 %4731 }
 0x7dc   : > { %v4734_v28 = vunpack.i.h.bf16 %v4732_v1  ;;  %v4733_v6 = vunpack.i.l.bf16 %v4732_v1 }
 0x7de   : > { %v1867_v18 = vsel %vm1862_vm14, %v1858_v40, %v4733_v6  ;;  %v1868_v55 = vsel %vm1862_vm14, %v1859_v37, %v4734_v28 }
 0x7df   : > { %v1873_v25 = vpack.c.bf16 %v1868_v55, %v1867_v18  ;;  %v5187_v55 = vld [vmem:[%s5534_s17 + $0x38] sm:$0xff] }
 0x7e1   : > { %4405 = vmatmul.msk.bf16.gmra.mxu2 %vm565_vm0, %v1873_v25 }
 0x7eb   : > { %v4747_v21 = vpop.permute.xlu1 %4746 }
 0x7ec   : > { %v4749_v63 = vunpack.i.h.bf16 %v4747_v21  ;;  %v4748_v36 = vunpack.i.l.bf16 %v4747_v21 }
 0x7ee   : > { %v1869_v43 = vsel %vm1862_vm14, %v1860_v9, %v4748_v36  ;;  %v1870_v52 = vsel %vm1862_vm14, %v1861_v30, %v4749_v63 }
 0x7ef   : > { %v1874_v48 = vpack.c.bf16 %v1870_v52, %v1869_v43 }
 0x7f1   : > { %4406 = vmatmul.msk.bf16.gmra.mxu2 %vm565_vm0, %v1874_v48 }
 0x819   : > { %v1916_v26 = vpop.f32.mrf.mxu2 }
 0x81a   : > { %v1917_v58 = vadd.f32 %v4813_v27, %v1916_v26 }
 0x81c   : > { %v6221_v13 = vadd.f32 %v5180_v39, %v1917_v58 }
 0x81e   : > { %v1946_v24 = vsel %vm565_vm0, %v6221_v13, 0.0 }
 0x81f   : > { %1947 = vadd.xlane.f32.xlu0 %v1946_v24 }
 0x821   : > { %v1918_v51 = vpop.f32.mrf.mxu2 }
 0x822   : > { %v1919_v35 = vadd.f32 %v4813_v27, %v1918_v51 }
 0x824   : > { %v6226_v47 = vadd.f32 %v5181_v38, %v1919_v35 }
 0x826   : > { %v1949_v41 = vsel %vm565_vm0, %v6226_v47, 0.0 }
 0x827   : > { %1950 = vadd.xlane.f32.xlu2 %v1949_v41 }
 0x854   : > { %v1921_v0 = vpop.f32.mrf.mxu2 }
 0x855   : > { %v1922_v46 = vadd.f32 %v4813_v27, %v1921_v0 }
 0x857   : > { %v6231_v49 = vadd.f32 %v5182_v45, %v1922_v46 }
 0x859   : > { %v1952_v44 = vsel %vm565_vm0, %v6231_v49, 0.0 }
 0x85a   : > { %1953 = vadd.xlane.f32.xlu1 %v1952_v44 }
 0x85c   : > { %v1923_v61 = vpop.f32.mrf.mxu2 }
 0x85d   : > { %v1924_v22 = vadd.f32 %v4813_v27, %v1923_v61  ;;  %v4587_v61 = vld [vmem:[%s7330_s9 + $0x8] sm:$0xff] }
 0x85e   : > { %2186 = vmatpush.bf16.msra.mxu1 %v4587_v61 }
 0x85f   : > { %v6236_v14 = vadd.f32 %v5183_v31, %v1924_v22 }
 0x861   : > { %v1955_v17 = vsel %vm565_vm0, %v6236_v14, 0.0 }
 0x862   : > { %1956 = vadd.xlane.f32.xlu0 %v1955_v17  ;;  %v4586_v17 = vld [vmem:[%s7330_s9] sm:$0xff] }
 0x863   : > { %2187 = vmatpush.bf16.msra.mxu1 %v4586_v17 }
 0x864   : > { %v1926_v59 = vpop.f32.mrf.mxu2 }
 0x865   : > { %v1927_v3 = vadd.f32 %v4813_v27, %v1926_v59 }
 0x867   : > { %v6241_v2 = vadd.f32 %v5184_v50, %v1927_v3 }
 0x869   : > { %v1958_v54 = vsel %vm565_vm0, %v6241_v2, 0.0 }
 0x86a   : > { %1959 = vadd.xlane.f32.xlu2 %v1958_v54 }
 0x86c   : > { %v1928_v33 = vpop.f32.mrf.mxu2 }
 0x86d   : > { %v1929_v5 = vadd.f32 %v4813_v27, %v1928_v33 }
 0x86f   : > { %v6246_v11 = vadd.f32 %v5185_v10, %v1929_v5 }
 0x871   : > { %v1961_v29 = vsel %vm565_vm0, %v6246_v11, 0.0 }
 0x872   : > { %1962 = vadd.xlane.f32.xlu1 %v1961_v29 }
 0x874   : > { %v1931_v12 = vpop.f32.mrf.mxu2 }
 0x875   : > { %v1932_v16 = vadd.f32 %v4813_v27, %v1931_v12 }
 0x877   : > { %v6251_v8 = vadd.f32 %v5186_v32, %v1932_v16 }
 0x879   : > { %v1964_v53 = vsel %vm565_vm0, %v6251_v8, 0.0 }
 0x87a   : > { %1965 = vadd.xlane.f32.xlu1 %v1964_v53 }
 0x87c   : > { %v1933_v34 = vpop.f32.mrf.mxu2 }
 0x87d   : > { %v1934_v6 = vadd.f32 %v4813_v27, %v1933_v34 }
 0x87f   : > { %v6264_v25 = vadd.f32 %v5187_v55, %v1934_v6 }
 0x881   : > { %v1967_v15 = vsel %vm565_vm0, %v6264_v25, 0.0 }
 0x892   : > { %v1948_v23 = vpop.xlane.xlu0 %1947 }
 0x893   : > { %v1970_v1 = vmul.f32 %v1948_v23, %v5550_v20 }
 0x895   : > { %v6257_v7 = vsub.f32 %v6221_v13, %v1970_v1 }
 0x897   : > { %v1986_v28 = vmul.f32 %v6257_v7, %v6257_v7 }
 0x899   : > { %v1994_v40 = vsel %vm565_vm0, %v1986_v28, 0.0 }
 0x89a   : > { %v1951_v37 = vpop.xlane.xlu2 %1950  ;;  %1995 = vadd.xlane.f32.xlu0 %v1994_v40 }
 0x89b   : > { %v1971_v18 = vmul.f32 %v1951_v37, %v5550_v20 }
 0x89d   : > { %v6267_v42 = vsub.f32 %v6226_v47, %v1971_v18 }
 0x89f   : > { %v1987_v19 = vmul.f32 %v6267_v42, %v6267_v42 }
 0x8a1   : > { %v1997_v4 = vsel %vm565_vm0, %v1987_v19, 0.0  ;;  %v6327_v19 = vld [vmem:[%s7328_s7] ss:$0 sm:$0xff] }
 0x8a2   : > { %1998 = vadd.xlane.f32.xlu2 %v1997_v4  ;;  %1968 = vadd.xlane.f32.xlu0 %v1967_v15 }
 0x8cd   : > { %v1954_v62 = vpop.xlane.xlu1 %1953 }
 0x8ce   : > { %v1972_v56 = vmul.f32 %v1954_v62, %v5550_v20 }
 0x8d0   : > { %v6276_v21 = vsub.f32 %v6231_v49, %v1972_v56 }
 0x8d2   : > { %v1988_v60 = vmul.f32 %v6276_v21, %v6276_v21 }
 0x8d4   : > { %v2000_v57 = vsel %vm565_vm0, %v1988_v60, 0.0 }
 0x8d5   : > { %2001 = vadd.xlane.f32.xlu2 %v2000_v57  ;;  %v1957_v63 = vpop.xlane.xlu0 %1956  ;;  %v6335_v57 = vld [vmem:[%s7329_s8] ss:$0 sm:$0xff] }
 0x8d6   : > { %v1973_v36 = vmul.f32 %v1957_v63, %v5550_v20 }
 0x8d8   : > { %v6283_v9 = vsub.f32 %v6236_v14, %v1973_v36 }
 0x8da   : > { %v1989_v30 = vmul.f32 %v6283_v9, %v6283_v9 }
 0x8dc   : > { %v2003_v43 = vsel %vm565_vm0, %v1989_v30, 0.0 }
 0x8dd   : > { %v1960_v52 = vpop.xlane.xlu2 %1959  ;;  %2004 = vadd.xlane.f32.xlu1 %v2003_v43 }
 0x8de   : > { %v1974_v48 = vmul.f32 %v1960_v52, %v5550_v20 }
 0x8e0   : > { %v6290_v27 = vsub.f32 %v6241_v2, %v1974_v48 }
 0x8e2   : > { %v1990_v26 = vmul.f32 %v6290_v27, %v6290_v27 }
 0x8e4   : > { %v2006_v58 = vsel %vm565_vm0, %v1990_v26, 0.0 }
 0x8e5   : > { %v1963_v39 = vpop.xlane.xlu1 %1962  ;;  %2007 = vadd.xlane.f32.xlu0 %v2006_v58 }
 0x8e6   : > { %v1975_v24 = vmul.f32 %v1963_v39, %v5550_v20 }
 0x8e8   : > { %v6297_v51 = vsub.f32 %v6246_v11, %v1975_v24 }
 0x8ea   : > { %v1991_v35 = vmul.f32 %v6297_v51, %v6297_v51 }
 0x8ec   : > { %v2009_v38 = vsel %vm565_vm0, %v1991_v35, 0.0 }
 0x8ed   : > { %v1966_v41 = vpop.xlane.xlu1 %1965  ;;  %2010 = vadd.xlane.f32.xlu2 %v2009_v38 }
 0x8ee   : > { %v1976_v0 = vmul.f32 %v1966_v41, %v5550_v20 }
 0x8f0   : > { %v6304_v46 = vsub.f32 %v6251_v8, %v1976_v0 }
 0x8f2   : > { %v1992_v45 = vmul.f32 %v6304_v46, %v6304_v46 }
 0x8f4   : > { %v2012_v44 = vsel %vm565_vm0, %v1992_v45, 0.0 }
 0x8f5   : > { %2013 = vadd.xlane.f32.xlu1 %v2012_v44 }
 0x90d   : > { %v1996_v22 = vpop.xlane.xlu0 %1995 }
 0x90e   : > { %v2018_v31 = vmul.f32 %v1996_v22, %v5550_v20 }
 0x910   : > { %v2026_v59 = vadd.f32 1e-05, %v2018_v31 }
 0x912   : > { %4972 = vrsqrt.f32 %v2026_v59  ;;  %vm2040_vm1 = vweird.f32 %v2026_v59 }
 0x915   : > { %v1999_v3 = vpop.xlane.xlu2 %1998  ;;  %v1969_v50 = vpop.xlane.xlu0 %1968 }
 0x916   : > { %v2019_v54 = vmul.f32 %v1999_v3, %v5550_v20  ;;  %v1977_v33 = vmul.f32 %v1969_v50, %v5550_v20 }
 0x918   : > { %v4973_v5 = vpop.eup %4972  ;;  %v2027_v10 = vadd.f32 1e-05, %v2019_v54  ;;  %v6319_v29 = vsub.f32 %v6264_v25, %v1977_v33 }
 0x919   : > { %v2035_v12 = vmul.f32 %v4973_v5, %v2026_v59  ;;  %vm2041_vm15 = vweird.f32 %v4973_v5 }
 0x91a   : > { %4974 = vrsqrt.f32 %v2027_v10  ;;  %v1993_v16 = vmul.f32 %v6319_v29, %v6319_v29  ;;  %vm2042_vm2 = vmor %vm2040_vm1, %vm2041_vm15  ;;  %vm2050_vm4 = vweird.f32 %v2027_v10 }
 0x91b   : > { %v2036_v32 = vmul.f32 %v4973_v5, %v2035_v12 }
 0x91c   : > { %v2015_v53 = vsel %vm565_vm0, %v1993_v16, 0.0 }
 0x91d   : > { %v2037_v23 = vmul.f32 0.5, %v2036_v32  ;;  %2016 = vadd.xlane.f32.xlu0 %v2015_v53 }
 0x91f   : > { %v2038_v1 = vsub.f32 1.5, %v2037_v23 }
 0x920   : > { %v4975_v34 = vpop.eup %4974 }
 0x921   : > { %v2039_v28 = vmul.f32 %v4973_v5, %v2038_v1  ;;  %v2045_v6 = vmul.f32 %v4975_v34, %v2027_v10  ;;  %vm2051_vm3 = vweird.f32 %v4975_v34 }
 0x922   : > { %vm2052_vm5 = vmor %vm2050_vm4, %vm2051_vm3 }
 0x923   : > { %v2046_v40 = vmul.f32 %v4975_v34, %v2045_v6  ;;  %v2043_v37 = vsel %vm2042_vm2, %v4973_v5, %v2039_v28 }
 0x924   : > { %v2114_v4 = vmul.f32 %v2043_v37, %v6257_v7 }
 0x925   : > { %v2047_v18 = vmul.f32 0.5, %v2046_v40 }
 0x926   : > { %v2125_v56 = vmul.f32 %v6327_v19, %v2114_v4 }
 0x927   : > { %v2048_v55 = vsub.f32 1.5, %v2047_v18 }
 0x928   : > { %v2136_v36 = vadd.f32 %v6335_v57, %v2125_v56 }
 0x929   : > { %v2049_v15 = vmul.f32 %v4975_v34, %v2048_v55 }
 0x92b   : > { %v2053_v62 = vsel %vm2052_vm5, %v4975_v34, %v2049_v15 }
 0x92c   : > { %v2115_v60 = vmul.f32 %v2053_v62, %v6267_v42 }
 0x92e   : > { %v2126_v63 = vmul.f32 %v6327_v19, %v2115_v60 }
 0x930   : > { %v2137_v30 = vadd.f32 %v6335_v57, %v2126_v63 }
 0x932   : > { %v2144_v7 = vpack.c.bf16 %v2137_v30, %v2136_v36 }
 0x934   : > { %4415 = vmatmul.msk.bf16.vlgmr.msra.gmra.mxu1 %vm565_vm0, %v2144_v7 }
 0x948   : > { %v2002_v43 = vpop.xlane.xlu2 %2001 }
 0x949   : > { %v2020_v52 = vmul.f32 %v2002_v43, %v5550_v20 }
 0x94b   : > { %v2028_v48 = vadd.f32 1e-05, %v2020_v52 }
 0x94d   : > { %4976 = vrsqrt.f32 %v2028_v48  ;;  %vm2060_vm7 = vweird.f32 %v2028_v48 }
 0x950   : > { %v2005_v42 = vpop.xlane.xlu1 %2004 }
 0x951   : > { %v2021_v26 = vmul.f32 %v2005_v42, %v5550_v20 }
 0x953   : > { %v4977_v58 = vpop.eup %4976  ;;  %v2029_v39 = vadd.f32 1e-05, %v2021_v26 }
 0x954   : > { %v2055_v24 = vmul.f32 %v4977_v58, %v2028_v48  ;;  %vm2061_vm6 = vweird.f32 %v4977_v58 }
 0x955   : > { %4978 = vrsqrt.f32 %v2029_v39  ;;  %vm2062_vm8 = vmor %vm2060_vm7, %vm2061_vm6  ;;  %vm2070_vm10 = vweird.f32 %v2029_v39 }
 0x956   : > { %v2056_v35 = vmul.f32 %v4977_v58, %v2055_v24 }
 0x958   : > { %v2057_v38 = vmul.f32 0.5, %v2056_v35  ;;  %v2008_v41 = vpop.xlane.xlu0 %2007 }
 0x959   : > { %v2022_v0 = vmul.f32 %v2008_v41, %v5550_v20 }
 0x95a   : > { %v2058_v45 = vsub.f32 1.5, %v2057_v38 }
 0x95b   : > { %v4979_v44 = vpop.eup %4978  ;;  %v2030_v61 = vadd.f32 1e-05, %v2022_v0 }
 0x95c   : > { %v2059_v22 = vmul.f32 %v4977_v58, %v2058_v45  ;;  %v2065_v31 = vmul.f32 %v4979_v44, %v2029_v39  ;;  %vm2071_vm9 = vweird.f32 %v4979_v44  ;;  %v4595_v45 = vld [vmem:[%s7332_s11 + $0x38] sm:$0xff] }
 0x95d   : > { %4980 = vrsqrt.f32 %v2030_v61  ;;  %vm2072_vm15 = vmor %vm2070_vm10, %vm2071_vm9  ;;  %vm2080_vm2 = vweird.f32 %v2030_v61  ;;  %2353 = vmatpush.bf16.msra.mxu3 %v4595_v45 }
 0x95e   : > { %v2066_v17 = vmul.f32 %v4979_v44, %v2065_v31  ;;  %v2063_v59 = vsel %vm2062_vm8, %v4977_v58, %v2059_v22 }
 0x95f   : > { %v2116_v12 = vmul.f32 %v2063_v59, %v6276_v21 }
 0x960   : > { %v2067_v3 = vmul.f32 0.5, %v2066_v17  ;;  %v2011_v50 = vpop.xlane.xlu2 %2010  ;;  %v4593_v17 = vld [vmem:[%s7332_s11 + $0x28] sm:$0xff] }
 0x961   : > { %v2023_v54 = vmul.f32 %v2011_v50, %v5550_v20  ;;  %v2127_v34 = vmul.f32 %v6327_v19, %v2116_v12 }
 0x962   : > { %v2068_v33 = vsub.f32 1.5, %v2067_v3 }
 0x963   : > { %v4981_v5 = vpop.eup %4980  ;;  %v2031_v10 = vadd.f32 1e-05, %v2023_v54  ;;  %v2138_v18 = vadd.f32 %v6335_v57, %v2127_v34  ;;  %v4592_v54 = vld [vmem:[%s7332_s11 + $0x20] sm:$0xff] }
 0x964   : > { %v2069_v16 = vmul.f32 %v4979_v44, %v2068_v33  ;;  %v2075_v32 = vmul.f32 %v4981_v5, %v2030_v61  ;;  %vm2081_vm1 = vweird.f32 %v4981_v5  ;;  %v4594_v61 = vld [vmem:[%s7332_s11 + $0x30] sm:$0xff] }
 0x965   : > { %4982 = vrsqrt.f32 %v2031_v10  ;;  %vm2082_vm3 = vmor %vm2080_vm2, %vm2081_vm1  ;;  %vm2090_vm5 = vweird.f32 %v2031_v10  ;;  %2354 = vmatpush.bf16.msra.mxu3 %v4594_v61 }
 0x966   : > { %v2073_v53 = vsel %vm2072_vm15, %v4979_v44, %v2069_v16  ;;  %v2076_v23 = vmul.f32 %v4981_v5, %v2075_v32 }
 0x967   : > { %v2117_v1 = vmul.f32 %v2073_v53, %v6283_v9  ;;  %v4590_v53 = vld [vmem:[%s7332_s11 + $0x10] sm:$0xff] }
 0x968   : > { %v2077_v28 = vmul.f32 0.5, %v2076_v23  ;;  %v2014_v52 = vpop.xlane.xlu1 %2013 }
 0x969   : > { %v2128_v6 = vmul.f32 %v6327_v19, %v2117_v1  ;;  %v2024_v42 = vmul.f32 %v2014_v52, %v5550_v20  ;;  %2355 = vmatpush.bf16.msra.mxu3 %v4593_v17 }
 0x96a   : > { %v2078_v40 = vsub.f32 1.5, %v2077_v28 }
 0x96b   : > { %v4983_v37 = vpop.eup %4982  ;;  %v2139_v21 = vadd.f32 %v6335_v57, %v2128_v6  ;;  %v2032_v24 = vadd.f32 1e-05, %v2024_v42 }
 0x96c   : > { %v2079_v55 = vmul.f32 %v4981_v5, %v2078_v40  ;;  %v2085_v4 = vmul.f32 %v4983_v37, %v2031_v10  ;;  %vm2091_vm4 = vweird.f32 %v4983_v37  ;;  %v4591_v10 = vld [vmem:[%s7332_s11 + $0x18] sm:$0xff] }
 0x96d   : > { %v2145_v15 = vpack.c.bf16 %v2139_v21, %v2138_v18  ;;  %vm2092_vm6 = vmor %vm2090_vm5, %vm2091_vm4  ;;  %4984 = vrsqrt.f32 %v2032_v24  ;;  %vm2100_vm8 = vweird.f32 %v2032_v24  ;;  %2356 = vmatpush.bf16.msra.mxu3 %v4592_v54  ;;  %v4588_v18 = vld [vmem:[%s7332_s11] sm:$0xff] }
 0x96e   : > { %v2086_v62 = vmul.f32 %v4983_v37, %v2085_v4  ;;  %v2083_v9 = vsel %vm2082_vm3, %v4981_v5, %v2079_v55 }
 0x96f   : > { %4416 = vmatmul.msk.bf16.gmra.mxu1 %vm565_vm0, %v2145_v15  ;;  %v2118_v63 = vmul.f32 %v2083_v9, %v6290_v27 }
 0x970   : > { %v2087_v56 = vmul.f32 0.5, %v2086_v62 }
 0x971   : > { %v2129_v43 = vmul.f32 %v6327_v19, %v2118_v63  ;;  %2357 = vmatpush.bf16.msra.mxu3 %v4591_v10 }
 0x972   : > { %v2088_v60 = vsub.f32 1.5, %v2087_v56 }
 0x973   : > { %v2140_v26 = vadd.f32 %v6335_v57, %v2129_v43  ;;  %v4985_v27 = vpop.eup %4984 }
 0x974   : > { %v2089_v36 = vmul.f32 %v4983_v37, %v2088_v60  ;;  %v2095_v35 = vmul.f32 %v4985_v27, %v2032_v24  ;;  %vm2101_vm7 = vweird.f32 %v4985_v27 }
 0x975   : > { %vm2102_vm9 = vmor %vm2100_vm8, %vm2101_vm7  ;;  %2358 = vmatpush.bf16.msra.mxu3 %v4590_v53 }
 0x976   : > { %v2093_v30 = vsel %vm2092_vm6, %v4983_v37, %v2089_v36  ;;  %v2096_v38 = vmul.f32 %v4985_v27, %v2095_v35 }
 0x977   : > { %v2119_v7 = vmul.f32 %v2093_v30, %v6297_v51 }
 0x978   : > { %v2097_v44 = vmul.f32 0.5, %v2096_v38 }
 0x979   : > { %v2130_v48 = vmul.f32 %v6327_v19, %v2119_v7 }
 0x97a   : > { %v2098_v22 = vsub.f32 1.5, %v2097_v44 }
 0x97b   : > { %v2141_v58 = vadd.f32 %v6335_v57, %v2130_v48 }
 0x97c   : > { %v2099_v59 = vmul.f32 %v4985_v27, %v2098_v22 }
 0x97d   : > { %v2146_v39 = vpack.c.bf16 %v2141_v58, %v2140_v26 }
 0x97e   : > { %v2103_v33 = vsel %vm2102_vm9, %v4985_v27, %v2099_v59 }
 0x97f   : > { %4417 = vmatmul.msk.bf16.gmra.mxu1 %vm565_vm0, %v2146_v39  ;;  %v2120_v16 = vmul.f32 %v2103_v33, %v6304_v46  ;;  %v4589_v46 = vld [vmem:[%s7332_s11 + $0x8] sm:$0xff] }
 0x980   : > { %2359 = vmatpush.bf16.msra.mxu3 %v4589_v46 }
 0x981   : > { %v2131_v34 = vmul.f32 %v6327_v19, %v2120_v16 }
 0x983   : > { %v2142_v6 = vadd.f32 %v6335_v57, %v2131_v34 }
 0x984   : > { %2360 = vmatpush.bf16.msra.mxu3 %v4588_v18 }
 0x990   : > { %v2017_v51 = vpop.xlane.xlu0 %2016 }
 0x991   : > { %v2025_v41 = vmul.f32 %v2017_v51, %v5550_v20 }
 0x993   : > { %v2033_v0 = vadd.f32 1e-05, %v2025_v41 }
 0x995   : > { %4986 = vrsqrt.f32 %v2033_v0  ;;  %vm2110_vm15 = vweird.f32 %v2033_v0 }
 0x99b   : > { %v4987_v31 = vpop.eup %4986 }
 0x99c   : > { %v2105_v3 = vmul.f32 %v4987_v31, %v2033_v0  ;;  %vm2111_vm10 = vweird.f32 %v4987_v31 }
 0x99d   : > { %vm2112_vm1 = vmor %vm2110_vm15, %vm2111_vm10 }
 0x99e   : > { %v2106_v50 = vmul.f32 %v4987_v31, %v2105_v3 }
 0x9a0   : > { %v2107_v5 = vmul.f32 0.5, %v2106_v50 }
 0x9a2   : > { %v2108_v12 = vsub.f32 1.5, %v2107_v5 }
 0x9a4   : > { %v2109_v32 = vmul.f32 %v4987_v31, %v2108_v12 }
 0x9a6   : > { %v2113_v23 = vsel %vm2112_vm1, %v4987_v31, %v2109_v32 }
 0x9a7   : > { %v2121_v1 = vmul.f32 %v2113_v23, %v6319_v29  ;;  %v6394_v29 = vld [vmem:[%s7331_s10] ss:$0 sm:$0xff] }
 0x9a9   : > { %v2132_v28 = vmul.f32 %v6327_v19, %v2121_v1 }
 0x9ab   : > { %v2143_v40 = vadd.f32 %v6335_v57, %v2132_v28 }
 0x9ad   : > { %v2147_v37 = vpack.c.bf16 %v2143_v40, %v2142_v6 }
 0x9af   : > { %4418 = vmatmul.msk.bf16.gmra.mxu1 %vm565_vm0, %v2147_v37 }
 0x9b1   : > { %v2189_v19 = vpop.f32.mrf.mxu1 }
 0x9b2   : > { %v2190_v21 = vadd.f32 %v6394_v29, %v2189_v19 }
 0x9b4   : > { %v2217_v55 = vmul.f32 0.044715, %v2190_v21  ;;  %v2209_v42 = vmul.f32 0.5, %v2190_v21 }
 0x9b6   : > { %v2225_v4 = vmul.f32 %v2217_v55, %v2190_v21 }
 0x9b8   : > { %v2233_v57 = vmul.f32 %v2225_v4, %v2190_v21 }
 0x9b9   : > { %v2191_v15 = vpop.f32.mrf.mxu1 }
 0x9ba   : > { %v2241_v62 = vadd.f32 %v2233_v57, %v2190_v21  ;;  %v2192_v9 = vadd.f32 %v6394_v29, %v2191_v15 }
 0x9bc   : > { %v2218_v56 = vmul.f32 0.044715, %v2192_v9  ;;  %v2249_v60 = vmul.f32 0.7978846, %v2241_v62  ;;  %v2210_v26 = vmul.f32 0.5, %v2192_v9 }
 0x9be   : > { %v2226_v63 = vmul.f32 %v2218_v56, %v2192_v9  ;;  %4988 = vtanh.f32 %v2249_v60 }
 0x9c0   : > { %v2234_v36 = vmul.f32 %v2226_v63, %v2192_v9 }
 0x9c2   : > { %v2242_v30 = vadd.f32 %v2234_v36, %v2192_v9 }
 0x9c4   : > { %v2250_v7 = vmul.f32 0.7978846, %v2242_v30  ;;  %v4989_v43 = vpop.eup %4988 }
 0x9c5   : > { %v2265_v52 = vadd.f32 1.0, %v4989_v43 }
 0x9c6   : > { %4990 = vtanh.f32 %v2250_v7 }
 0x9c7   : > { %v2273_v39 = vmul.f32 %v2265_v52, %v2209_v42 }
 0x9cc   : > { %v4991_v48 = vpop.eup %4990 }
 0x9cd   : > { %v2266_v58 = vadd.f32 1.0, %v4991_v48 }
 0x9cf   : > { %v2274_v24 = vmul.f32 %v2266_v58, %v2210_v26 }
 0x9d1   : > { %v2281_v27 = vpack.c.bf16 %v2274_v24, %v2273_v39 }
 0x9d3   : > { %2361 = vmatmul.bf16.vlgmr.msra.gmra.mxu3 %v2281_v27 }
 0x9ec   : > { %v2194_v35 = vpop.f32.mrf.mxu1 }
 0x9ed   : > { %v2195_v38 = vadd.f32 %v6394_v29, %v2194_v35 }
 0x9ef   : > { %v2219_v51 = vmul.f32 0.044715, %v2195_v38  ;;  %v2211_v46 = vmul.f32 0.5, %v2195_v38 }
 0x9f1   : > { %v2227_v41 = vmul.f32 %v2219_v51, %v2195_v38 }
 0x9f3   : > { %v2235_v0 = vmul.f32 %v2227_v41, %v2195_v38 }
 0x9f4   : > { %v2196_v45 = vpop.f32.mrf.mxu1 }
 0x9f5   : > { %v2197_v44 = vadd.f32 %v6394_v29, %v2196_v45  ;;  %v2243_v61 = vadd.f32 %v2235_v0, %v2195_v38 }
 0x9f7   : > { %v2220_v22 = vmul.f32 0.044715, %v2197_v44  ;;  %v2251_v17 = vmul.f32 0.7978846, %v2243_v61  ;;  %v2212_v6 = vmul.f32 0.5, %v2197_v44 }
 0x9f9   : > { %v2228_v31 = vmul.f32 %v2220_v22, %v2197_v44  ;;  %4992 = vtanh.f32 %v2251_v17 }
 0x9fb   : > { %v2236_v59 = vmul.f32 %v2228_v31, %v2197_v44 }
 0x9fc   : > { %v2199_v3 = vpop.f32.mrf.mxu1 }
 0x9fd   : > { %v2200_v50 = vadd.f32 %v6394_v29, %v2199_v3  ;;  %v2244_v54 = vadd.f32 %v2236_v59, %v2197_v44 }
 0x9ff   : > { %v2221_v33 = vmul.f32 0.044715, %v2200_v50  ;;  %v2252_v5 = vmul.f32 0.7978846, %v2244_v54  ;;  %v4993_v12 = vpop.eup %4992  ;;  %v2213_v60 = vmul.f32 0.5, %v2200_v50 }
 0xa00   : > { %v2267_v1 = vadd.f32 1.0, %v4993_v12 }
 0xa01   : > { %4994 = vtanh.f32 %v2252_v5  ;;  %v2229_v10 = vmul.f32 %v2221_v33, %v2200_v50 }
 0xa02   : > { %v2275_v19 = vmul.f32 %v2267_v1, %v2211_v46 }
 0xa03   : > { %v2237_v16 = vmul.f32 %v2229_v10, %v2200_v50 }
 0xa04   : > { %v2201_v32 = vpop.f32.mrf.mxu1 }
 0xa05   : > { %v2202_v53 = vadd.f32 %v6394_v29, %v2201_v32  ;;  %v2245_v23 = vadd.f32 %v2237_v16, %v2200_v50 }
 0xa07   : > { %v4995_v34 = vpop.eup %4994  ;;  %v2222_v28 = vmul.f32 0.044715, %v2202_v53  ;;  %v2253_v18 = vmul.f32 0.7978846, %v2245_v23  ;;  %v2214_v63 = vmul.f32 0.5, %v2202_v53 }
 0xa08   : > { %v2268_v40 = vadd.f32 1.0, %v4995_v34 }
 0xa09   : > { %v2230_v37 = vmul.f32 %v2222_v28, %v2202_v53  ;;  %4996 = vtanh.f32 %v2253_v18 }
 0xa0a   : > { %v2276_v21 = vmul.f32 %v2268_v40, %v2212_v6 }
 0xa0b   : > { %v2238_v55 = vmul.f32 %v2230_v37, %v2202_v53 }
 0xa0c   : > { %v2282_v4 = vpack.c.bf16 %v2276_v21, %v2275_v19 }
 0xa0d   : > { %v2246_v57 = vadd.f32 %v2238_v55, %v2202_v53 }
 0xa0e   : > { %2366 = vmatmul.bf16.gmra.mxu3 %v2282_v4 }
 0xa0f   : > { %v2254_v15 = vmul.f32 0.7978846, %v2246_v57  ;;  %v4997_v62 = vpop.eup %4996 }
 0xa10   : > { %v2269_v9 = vadd.f32 1.0, %v4997_v62 }
 0xa11   : > { %4998 = vtanh.f32 %v2254_v15 }
 0xa12   : > { %v2277_v30 = vmul.f32 %v2269_v9, %v2213_v60 }
 0xa17   : > { %v4999_v56 = vpop.eup %4998 }
 0xa18   : > { %v2270_v36 = vadd.f32 1.0, %v4999_v56 }
 0xa1a   : > { %v2278_v7 = vmul.f32 %v2270_v36, %v2214_v63 }
 0xa1c   : > { %v2283_v43 = vpack.c.bf16 %v2278_v7, %v2277_v30 }
 0xa1e   : > { %2371 = vmatmul.bf16.gmra.mxu3 %v2283_v43 }
 0xa2c   : > { %v2204_v52 = vpop.f32.mrf.mxu1 }
 0xa2d   : > { %v2205_v48 = vadd.f32 %v6394_v29, %v2204_v52 }
 0xa2f   : > { %v2223_v42 = vmul.f32 0.044715, %v2205_v48  ;;  %v2215_v31 = vmul.f32 0.5, %v2205_v48 }
 0xa31   : > { %v2231_v26 = vmul.f32 %v2223_v42, %v2205_v48 }
 0xa33   : > { %v2239_v58 = vmul.f32 %v2231_v26, %v2205_v48 }
 0xa34   : > { %v2206_v39 = vpop.f32.mrf.mxu1 }
 0xa35   : > { %v2207_v24 = vadd.f32 %v6394_v29, %v2206_v39  ;;  %v2247_v27 = vadd.f32 %v2239_v58, %v2205_v48  ;;  %v4817_v29 = vld [vmem:[%s7333_s12] ss:$0 sm:$0xff] }
 0xa37   : > { %v2224_v35 = vmul.f32 0.044715, %v2207_v24  ;;  %v2255_v51 = vmul.f32 0.7978846, %v2247_v27  ;;  %v2216_v17 = vmul.f32 0.5, %v2207_v24 }
 0xa39   : > { %v2232_v38 = vmul.f32 %v2224_v35, %v2207_v24  ;;  %5000 = vtanh.f32 %v2255_v51 }
 0xa3b   : > { %v2240_v41 = vmul.f32 %v2232_v38, %v2207_v24 }
 0xa3d   : > { %v2248_v0 = vadd.f32 %v2240_v41, %v2207_v24 }
 0xa3f   : > { %v2256_v45 = vmul.f32 0.7978846, %v2248_v0  ;;  %v5001_v44 = vpop.eup %5000 }
 0xa40   : > { %v2271_v61 = vadd.f32 1.0, %v5001_v44 }
 0xa41   : > { %5002 = vtanh.f32 %v2256_v45 }
 0xa42   : > { %v2279_v3 = vmul.f32 %v2271_v61, %v2215_v31 }
 0xa47   : > { %v5003_v22 = vpop.eup %5002 }
 0xa48   : > { %v2272_v59 = vadd.f32 1.0, %v5003_v22 }
 0xa4a   : > { %v2280_v50 = vmul.f32 %v2272_v59, %v2216_v17 }
 0xa4c   : > { %v2284_v54 = vpack.c.bf16 %v2280_v50, %v2279_v3 }
 0xa4e   : > { %2376 = vmatmul.bf16.gmra.mxu3 %v2284_v54 }
 0xa56   : > { %v2362_v33 = vpop.f32.mrf.mxu3 }
 0xa57   : > { %v2363_v5 = vadd.f32 %v4817_v29, %v2362_v33 }
 0xa59   : > { %v6409_v10 = vadd.f32 %v2363_v5, %v6221_v13 }
 0xa5b   : > { %v2394_v12 = vsel %vm565_vm0, %v6409_v10, 0.0 }
 0xa5c   : > { %2395 = vadd.xlane.f32.xlu2 %v2394_v12 }
 0xa5e   : > { %v2364_v16 = vpop.f32.mrf.mxu3 }
 0xa5f   : > { %v2365_v32 = vadd.f32 %v4817_v29, %v2364_v16 }
 0xa61   : > { %v6414_v53 = vadd.f32 %v2365_v32, %v6226_v47 }
 0xa63   : > { %v2397_v23 = vsel %vm565_vm0, %v6414_v53, 0.0 }
 0xa64   : > { %2398 = vadd.xlane.f32.xlu1 %v2397_v23 }
 0xa91   : > { %v2367_v1 = vpop.f32.mrf.mxu3 }
 0xa92   : > { %v2368_v34 = vadd.f32 %v4817_v29, %v2367_v1  ;;  %v4596_v1 = vld [vmem:[#allocation6 + $0x10] sm:$0xff] }
 0xa94   : > { %v6419_v28 = vadd.f32 %v2368_v34, %v6231_v49 }
 0xa96   : > { %v2400_v13 = vsel %vm565_vm0, %v6419_v28, 0.0 }
 0xa97   : > { %2401 = vadd.xlane.f32.xlu0 %v2400_v13 }
 0xa99   : > { %v2369_v46 = vpop.f32.mrf.mxu3 }
 0xa9a   : > { %v2370_v6 = vadd.f32 %v4817_v29, %v2369_v46 }
 0xa9c   : > { %v6424_v40 = vadd.f32 %v2370_v6, %v6236_v14 }
 0xa9e   : > { %v2403_v47 = vsel %vm565_vm0, %v6424_v40, 0.0 }
 0xa9f   : > { %2404 = vadd.xlane.f32.xlu2 %v2403_v47 }
 0xaa1   : > { %v2372_v37 = vpop.f32.mrf.mxu3 }
 0xaa2   : > { %v2373_v18 = vadd.f32 %v4817_v29, %v2372_v37 }
 0xaa4   : > { %v6429_v19 = vadd.f32 %v2373_v18, %v6241_v2 }
 0xaa6   : > { %v2406_v49 = vsel %vm565_vm0, %v6429_v19, 0.0 }
 0xaa7   : > { %2407 = vadd.xlane.f32.xlu1 %v2406_v49 }
 0xaa9   : > { %v2374_v21 = vpop.f32.mrf.mxu3 }
 0xaaa   : > { %v2375_v55 = vadd.f32 %v4817_v29, %v2374_v21 }
 0xaac   : > { %v6434_v4 = vadd.f32 %v2375_v55, %v6246_v11 }
 0xaae   : > { %v2409_v14 = vsel %vm565_vm0, %v6434_v4, 0.0 }
 0xaaf   : > { %2410 = vadd.xlane.f32.xlu0 %v2409_v14 }
 0xacf   : > { %v2396_v57 = vpop.xlane.xlu2 %2395 }
 0xad0   : > { %v2418_v15 = vmul.f32 %v2396_v57, %v5550_v20 }
 0xad1   : > { %v2377_v62 = vpop.f32.mrf.mxu3 }
 0xad2   : > { %v6440_v2 = vsub.f32 %v6409_v10, %v2418_v15  ;;  %v2378_v9 = vadd.f32 %v4817_v29, %v2377_v62 }
 0xad4   : > { %v6443_v56 = vadd.f32 %v2378_v9, %v6251_v8  ;;  %v2434_v60 = vmul.f32 %v6440_v2, %v6440_v2 }
 0xad6   : > { %v2442_v11 = vsel %vm565_vm0, %v2434_v60, 0.0  ;;  %v2412_v63 = vsel %vm565_vm0, %v6443_v56, 0.0 }
 0xad7   : > { %v2399_v36 = vpop.xlane.xlu1 %2398  ;;  %2443 = vadd.xlane.f32.xlu2 %v2442_v11  ;;  %2413 = vadd.xlane.f32.xlu0 %v2412_v63 }
 0xad8   : > { %v2419_v30 = vmul.f32 %v2399_v36, %v5550_v20 }
 0xad9   : > { %v2379_v7 = vpop.f32.mrf.mxu3 }
 0xada   : > { %v6452_v43 = vsub.f32 %v6414_v53, %v2419_v30  ;;  %v2380_v52 = vadd.f32 %v4817_v29, %v2379_v7  ;;  %v4597_v29 = vld [vmem:[#allocation6 + $0x18] sm:$0xff] }
 0xadb   : > { %2636 = vmatpush.bf16.msrb.mxu0 %v4597_v29 }
 0xadc   : > { %v6455_v8 = vadd.f32 %v2380_v52, %v6264_v25  ;;  %v2435_v48 = vmul.f32 %v6452_v43, %v6452_v43 }
 0xade   : > { %7356 = vst [vmem:[#allocation13_spill] sm:$0xff] %v6455_v8  ;;  %v2445_v42 = vsel %vm565_vm0, %v2435_v48, 0.0  ;;  %v2415_v26 = vsel %vm565_vm0, %v6455_v8, 0.0  ;;  %v6506_v48 = vld [vmem:[#allocation2 + $0x1] ss:$0 sm:$0xff] }
 0xadf   : > { %2446 = vadd.xlane.f32.xlu1 %v2445_v42  ;;  %2416 = vadd.xlane.f32.xlu2 %v2415_v26 }
 0xae0   : > { %2637 = vmatpush.bf16.msrb.mxu0 %v4596_v1 }
 0xb0a   : > { %v2402_v58 = vpop.xlane.xlu0 %2401 }
 0xb0b   : > { %v2420_v39 = vmul.f32 %v2402_v58, %v5550_v20 }
 0xb0d   : > { %v6464_v24 = vsub.f32 %v6419_v28, %v2420_v39  ;;  %v6509_v39 = vld [vmem:[#allocation4 + $0x1] ss:$0 sm:$0xff] }
 0xb0f   : > { %v2436_v25 = vmul.f32 %v6464_v24, %v6464_v24 }
 0xb11   : > { %v2448_v27 = vsel %vm565_vm0, %v2436_v25, 0.0 }
 0xb12   : > { %v2405_v35 = vpop.xlane.xlu2 %2404  ;;  %2449 = vadd.xlane.f32.xlu1 %v2448_v27 }
 0xb13   : > { %v2421_v38 = vmul.f32 %v2405_v35, %v5550_v20 }
 0xb15   : > { %v6471_v51 = vsub.f32 %v6424_v40, %v2421_v38 }
 0xb17   : > { %v2437_v41 = vmul.f32 %v6471_v51, %v6471_v51 }
 0xb19   : > { %v2451_v0 = vsel %vm565_vm0, %v2437_v41, 0.0 }
 0xb1a   : > { %v2408_v45 = vpop.xlane.xlu1 %2407  ;;  %2452 = vadd.xlane.f32.xlu0 %v2451_v0 }
 0xb1b   : > { %v2422_v44 = vmul.f32 %v2408_v45, %v5550_v20 }
 0xb1d   : > { %v6478_v61 = vsub.f32 %v6429_v19, %v2422_v44 }
 0xb1f   : > { %v2438_v22 = vmul.f32 %v6478_v61, %v6478_v61 }
 0xb21   : > { %v2454_v31 = vsel %vm565_vm0, %v2438_v22, 0.0 }
 0xb22   : > { %2455 = vadd.xlane.f32.xlu2 %v2454_v31  ;;  %v2411_v17 = vpop.xlane.xlu0 %2410 }
 0xb23   : > { %v2423_v59 = vmul.f32 %v2411_v17, %v5550_v20 }
 0xb25   : > { %v6485_v3 = vsub.f32 %v6434_v4, %v2423_v59 }
 0xb27   : > { %v2439_v50 = vmul.f32 %v6485_v3, %v6485_v3 }
 0xb29   : > { %v2457_v54 = vsel %vm565_vm0, %v2439_v50, 0.0 }
 0xb2a   : > { %2458 = vadd.xlane.f32.xlu1 %v2457_v54 }
 0xb4a   : > { %v2444_v33 = vpop.xlane.xlu2 %2443  ;;  %v2414_v5 = vpop.xlane.xlu0 %2413 }
 0xb4b   : > { %v2466_v12 = vmul.f32 %v2444_v33, %v5550_v20  ;;  %v2424_v16 = vmul.f32 %v2414_v5, %v5550_v20 }
 0xb4d   : > { %v2474_v32 = vadd.f32 1e-05, %v2466_v12  ;;  %v6493_v23 = vsub.f32 %v6443_v56, %v2424_v16 }
 0xb4f   : > { %5004 = vrsqrt.f32 %v2474_v32  ;;  %v2440_v34 = vmul.f32 %v6493_v23, %v6493_v23  ;;  %vm2488_vm3 = vweird.f32 %v2474_v32 }
 0xb51   : > { %v2460_v13 = vsel %vm565_vm0, %v2440_v34, 0.0 }
 0xb52   : > { %v2447_v46 = vpop.xlane.xlu1 %2446  ;;  %v2417_v6 = vpop.xlane.xlu2 %2416  ;;  %2461 = vadd.xlane.f32.xlu0 %v2460_v13 }
 0xb53   : > { %v2467_v47 = vmul.f32 %v2447_v46, %v5550_v20  ;;  %v2425_v37 = vmul.f32 %v2417_v6, %v5550_v20 }
 0xb55   : > { %v5005_v18 = vpop.eup %5004  ;;  %v2475_v49 = vadd.f32 1e-05, %v2467_v47  ;;  %v6501_v21 = vsub.f32 %v6455_v8, %v2425_v37 }
 0xb56   : > { %v2483_v55 = vmul.f32 %v5005_v18, %v2474_v32  ;;  %vm2489_vm2 = vweird.f32 %v5005_v18 }
 0xb57   : > { %5006 = vrsqrt.f32 %v2475_v49  ;;  %v2441_v14 = vmul.f32 %v6501_v21, %v6501_v21  ;;  %vm2490_vm4 = vmor %vm2488_vm3, %vm2489_vm2  ;;  %vm2498_vm6 = vweird.f32 %v2475_v49 }
 0xb58   : > { %v2484_v57 = vmul.f32 %v5005_v18, %v2483_v55 }
 0xb59   : > { %v2463_v15 = vsel %vm565_vm0, %v2441_v14, 0.0 }
 0xb5a   : > { %v2485_v62 = vmul.f32 0.5, %v2484_v57  ;;  %2464 = vadd.xlane.f32.xlu2 %v2463_v15 }
 0xb5c   : > { %v2486_v9 = vsub.f32 1.5, %v2485_v62 }
 0xb5d   : > { %v5007_v60 = vpop.eup %5006 }
 0xb5e   : > { %v2487_v11 = vmul.f32 %v5005_v18, %v2486_v9  ;;  %v2493_v63 = vmul.f32 %v5007_v60, %v2475_v49  ;;  %vm2499_vm5 = vweird.f32 %v5007_v60 }
 0xb5f   : > { %vm2500_vm7 = vmor %vm2498_vm6, %vm2499_vm5 }
 0xb60   : > { %v2494_v36 = vmul.f32 %v5007_v60, %v2493_v63  ;;  %v2491_v30 = vsel %vm2490_vm4, %v5005_v18, %v2487_v11 }
 0xb61   : > { %v2562_v42 = vmul.f32 %v2491_v30, %v6440_v2 }
 0xb62   : > { %v2495_v7 = vmul.f32 0.5, %v2494_v36 }
 0xb63   : > { %v2573_v25 = vmul.f32 %v6506_v48, %v2562_v42 }
 0xb64   : > { %v2496_v52 = vsub.f32 1.5, %v2495_v7 }
 0xb65   : > { %v2584_v38 = vadd.f32 %v6509_v39, %v2573_v25 }
 0xb66   : > { %v2497_v26 = vmul.f32 %v5007_v60, %v2496_v52 }
 0xb68   : > { %v2501_v58 = vsel %vm2500_vm7, %v5007_v60, %v2497_v26 }
 0xb69   : > { %v2563_v27 = vmul.f32 %v2501_v58, %v6452_v43 }
 0xb6b   : > { %v2574_v35 = vmul.f32 %v6506_v48, %v2563_v27 }
 0xb6d   : > { %v2585_v41 = vadd.f32 %v6509_v39, %v2574_v35 }
 0xb6f   : > { %v2592_v0 = vpack.c.bf16 %v2585_v41, %v2584_v38 }
 0xb71   : > { %4459 = vmatmul.msk.bf16.vlgmr.msrb.gmra.mxu0 %vm565_vm0, %v2592_v0 }
 0xb85   : > { %v2450_v2 = vpop.xlane.xlu1 %2449 }
 0xb86   : > { %v2468_v45 = vmul.f32 %v2450_v2, %v5550_v20 }
 0xb88   : > { %v2476_v44 = vadd.f32 1e-05, %v2468_v45 }
 0xb8a   : > { %5008 = vrsqrt.f32 %v2476_v44  ;;  %vm2508_vm9 = vweird.f32 %v2476_v44 }
 0xb8d   : > { %v2453_v22 = vpop.xlane.xlu0 %2452 }
 0xb8e   : > { %v2469_v31 = vmul.f32 %v2453_v22, %v5550_v20 }
 0xb90   : > { %v5009_v17 = vpop.eup %5008  ;;  %v2477_v59 = vadd.f32 1e-05, %v2469_v31 }
 0xb91   : > { %v2503_v43 = vmul.f32 %v5009_v17, %v2476_v44  ;;  %vm2509_vm8 = vweird.f32 %v5009_v17 }
 0xb92   : > { %5010 = vrsqrt.f32 %v2477_v59  ;;  %vm2510_vm10 = vmor %vm2508_vm9, %vm2509_vm8  ;;  %vm2518_vm1 = vweird.f32 %v2477_v59 }
 0xb93   : > { %v2504_v50 = vmul.f32 %v5009_v17, %v2503_v43 }
 0xb95   : > { %v2505_v54 = vmul.f32 0.5, %v2504_v50  ;;  %v2456_v29 = vpop.xlane.xlu2 %2455 }
 0xb96   : > { %v2470_v33 = vmul.f32 %v2456_v29, %v5550_v20 }
 0xb97   : > { %v2506_v5 = vsub.f32 1.5, %v2505_v54 }
 0xb98   : > { %v5011_v12 = vpop.eup %5010  ;;  %v2478_v16 = vadd.f32 1e-05, %v2470_v33 }
 0xb99   : > { %v2507_v32 = vmul.f32 %v5009_v17, %v2506_v5  ;;  %v2513_v1 = vmul.f32 %v5011_v12, %v2477_v59  ;;  %vm2519_vm15 = vweird.f32 %v5011_v12 }
 0xb9a   : > { %5012 = vrsqrt.f32 %v2478_v16  ;;  %vm2520_vm2 = vmor %vm2518_vm1, %vm2519_vm15  ;;  %vm2528_vm4 = vweird.f32 %v2478_v16 }
 0xb9b   : > { %v2514_v34 = vmul.f32 %v5011_v12, %v2513_v1  ;;  %v2511_v13 = vsel %vm2510_vm10, %v5009_v17, %v2507_v32 }
 0xb9c   : > { %v2564_v49 = vmul.f32 %v2511_v13, %v6464_v24 }
 0xb9d   : > { %v2515_v46 = vmul.f32 0.5, %v2514_v34  ;;  %v2459_v6 = vpop.xlane.xlu1 %2458 }
 0xb9e   : > { %v2471_v47 = vmul.f32 %v2459_v6, %v5550_v20  ;;  %v2575_v60 = vmul.f32 %v6506_v48, %v2564_v49 }
 0xb9f   : > { %v2516_v37 = vsub.f32 1.5, %v2515_v46 }
 0xba0   : > { %v5013_v18 = vpop.eup %5012  ;;  %v2479_v55 = vadd.f32 1e-05, %v2471_v47  ;;  %v2586_v7 = vadd.f32 %v6509_v39, %v2575_v60 }
 0xba1   : > { %v2517_v14 = vmul.f32 %v5011_v12, %v2516_v37  ;;  %v2523_v57 = vmul.f32 %v5013_v18, %v2478_v16  ;;  %vm2529_vm3 = vweird.f32 %v5013_v18 }
 0xba2   : > { %5014 = vrsqrt.f32 %v2479_v55  ;;  %vm2530_vm5 = vmor %vm2528_vm4, %vm2529_vm3  ;;  %vm2538_vm7 = vweird.f32 %v2479_v55 }
 0xba3   : > { %v2521_v15 = vsel %vm2520_vm2, %v5011_v12, %v2517_v14  ;;  %v2524_v62 = vmul.f32 %v5013_v18, %v2523_v57 }
 0xba4   : > { %v2565_v9 = vmul.f32 %v2521_v15, %v6471_v51 }
 0xba5   : > { %v2525_v11 = vmul.f32 0.5, %v2524_v62 }
 0xba6   : > { %v2576_v63 = vmul.f32 %v6506_v48, %v2565_v9 }
 0xba7   : > { %v2526_v36 = vsub.f32 1.5, %v2525_v11 }
 0xba8   : > { %v5015_v30 = vpop.eup %5014  ;;  %v2587_v24 = vadd.f32 %v6509_v39, %v2576_v63 }
 0xba9   : > { %v2527_v52 = vmul.f32 %v5013_v18, %v2526_v36  ;;  %v2533_v42 = vmul.f32 %v5015_v30, %v2479_v55  ;;  %vm2539_vm6 = vweird.f32 %v5015_v30  ;;  %v4820_v36 = vld [vmem:[#allocation7 + $0x1] ss:$0 sm:$0xff] }
 0xbaa   : > { %v2593_v26 = vpack.c.bf16 %v2587_v24, %v2586_v7  ;;  %vm2540_vm8 = vmor %vm2538_vm7, %vm2539_vm6 }
 0xbab   : > { %v2534_v58 = vmul.f32 %v5015_v30, %v2533_v42  ;;  %v2531_v51 = vsel %vm2530_vm5, %v5013_v18, %v2527_v52 }
 0xbac   : > { %4460 = vmatmul.msk.bf16.gmra.mxu0 %vm565_vm0, %v2593_v26  ;;  %v2566_v35 = vmul.f32 %v2531_v51, %v6478_v61 }
 0xbad   : > { %v2535_v25 = vmul.f32 0.5, %v2534_v58 }
 0xbae   : > { %v2577_v2 = vmul.f32 %v6506_v48, %v2566_v35 }
 0xbaf   : > { %v2536_v27 = vsub.f32 1.5, %v2535_v25 }
 0xbb0   : > { %v2588_v44 = vadd.f32 %v6509_v39, %v2577_v2 }
 0xbb1   : > { %v2537_v38 = vmul.f32 %v5015_v30, %v2536_v27 }
 0xbb3   : > { %v2541_v41 = vsel %vm2540_vm8, %v5015_v30, %v2537_v38 }
 0xbb4   : > { %v2567_v0 = vmul.f32 %v2541_v41, %v6485_v3 }
 0xbb6   : > { %v2578_v45 = vmul.f32 %v6506_v48, %v2567_v0 }
 0xbb8   : > { %v2589_v22 = vadd.f32 %v6509_v39, %v2578_v45 }
 0xbba   : > { %v2594_v31 = vpack.c.bf16 %v2589_v22, %v2588_v44 }
 0xbbc   : > { %4461 = vmatmul.msk.bf16.gmra.mxu0 %vm565_vm0, %v2594_v31 }
 0xbc5   : > { %v2462_v17 = vpop.xlane.xlu0 %2461 }
 0xbc6   : > { %v2472_v61 = vmul.f32 %v2462_v17, %v5550_v20 }
 0xbc8   : > { %v2480_v59 = vadd.f32 1e-05, %v2472_v61 }
 0xbca   : > { %5016 = vrsqrt.f32 %v2480_v59  ;;  %vm2548_vm10 = vweird.f32 %v2480_v59 }
 0xbcd   : > { %v2465_v43 = vpop.xlane.xlu2 %2464 }
 0xbce   : > { %v2473_v50 = vmul.f32 %v2465_v43, %v5550_v20 }
 0xbd0   : > { %v5017_v3 = vpop.eup %5016  ;;  %v2481_v54 = vadd.f32 1e-05, %v2473_v50 }
 0xbd1   : > { %v2543_v29 = vmul.f32 %v5017_v3, %v2480_v59  ;;  %vm2549_vm9 = vweird.f32 %v5017_v3 }
 0xbd2   : > { %5018 = vrsqrt.f32 %v2481_v54  ;;  %vm2550_vm15 = vmor %vm2548_vm10, %vm2549_vm9  ;;  %vm2558_vm2 = vweird.f32 %v2481_v54 }
 0xbd3   : > { %v2544_v33 = vmul.f32 %v5017_v3, %v2543_v29 }
 0xbd5   : > { %v2545_v5 = vmul.f32 0.5, %v2544_v33 }
 0xbd7   : > { %v2546_v12 = vsub.f32 1.5, %v2545_v5 }
 0xbd8   : > { %v5019_v16 = vpop.eup %5018 }
 0xbd9   : > { %v2547_v32 = vmul.f32 %v5017_v3, %v2546_v12  ;;  %v2553_v1 = vmul.f32 %v5019_v16, %v2481_v54  ;;  %vm2559_vm1 = vweird.f32 %v5019_v16 }
 0xbda   : > { %vm2560_vm3 = vmor %vm2558_vm2, %vm2559_vm1 }
 0xbdb   : > { %v2554_v34 = vmul.f32 %v5019_v16, %v2553_v1  ;;  %v2551_v13 = vsel %vm2550_vm15, %v5017_v3, %v2547_v32 }
 0xbdc   : > { %v2568_v47 = vmul.f32 %v2551_v13, %v6493_v23 }
 0xbdd   : > { %v2555_v46 = vmul.f32 0.5, %v2554_v34 }
 0xbde   : > { %v2579_v55 = vmul.f32 %v6506_v48, %v2568_v47 }
 0xbdf   : > { %v2556_v6 = vsub.f32 1.5, %v2555_v46 }
 0xbe0   : > { %v2590_v57 = vadd.f32 %v6509_v39, %v2579_v55 }
 0xbe1   : > { %v2557_v37 = vmul.f32 %v5019_v16, %v2556_v6 }
 0xbe3   : > { %v2561_v18 = vsel %vm2560_vm3, %v5019_v16, %v2557_v37 }
 0xbe4   : > { %v2569_v49 = vmul.f32 %v2561_v18, %v6501_v21 }
 0xbe6   : > { %v2580_v14 = vmul.f32 %v6506_v48, %v2569_v49 }
 0xbe8   : > { %v2591_v15 = vadd.f32 %v6509_v39, %v2580_v14 }
 0xbea   : > { %v2595_v62 = vpack.c.bf16 %v2591_v15, %v2590_v57 }
 0xbec   : > { %4462 = vmatmul.msk.bf16.gmra.mxu0 %vm565_vm0, %v2595_v62 }
 0xbee   : > { %v2639_v9 = vpop.f32.mrf.mxu0 }
 0xbef   : > { %v2640_v26 = vadd.f32 %v4820_v36, %v2639_v9 }
 0xbf1   : > { %v2659_v38 = vpack.c.bf16 %v2640_v26, %v2640_v26 }
 0xbf3   : > { %v2684_v45 = vunpack.c.l.b16 %v2659_v38 }
 0xbf6   : > { %v2641_v60 = vpop.f32.mrf.mxu0 }
 0xbf7   : > { %v2642_v52 = vadd.f32 %v4820_v36, %v2641_v60 }
 0xbf9   : > { %v2660_v25 = vpack.c.bf16 %v2642_v52, %v2642_v52 }
 0xbfb   : > { %v2685_v0 = vunpack.c.l.b16 %v2660_v25 }
 0xbfd   : > { %v6550_v22 = vpack.c.b16 %v2685_v0, %v2684_v45 }
 0xc29   : > { %v2644_v23 = vpop.f32.mrf.mxu0 }
 0xc2a   : > { %v2645_v58 = vadd.f32 %v4820_v36, %v2644_v23 }
 0xc2c   : > { %v2661_v41 = vpack.c.bf16 %v2645_v58, %v2645_v58 }
 0xc2e   : > { %v2686_v44 = vunpack.c.l.b16 %v2661_v41 }
 0xc31   : > { %v2646_v11 = vpop.f32.mrf.mxu0 }
 0xc32   : > { %v2647_v42 = vadd.f32 %v4820_v36, %v2646_v11 }
 0xc34   : > { %v2662_v27 = vpack.c.bf16 %v2647_v42, %v2647_v42 }
 0xc36   : > { %v2687_v2 = vunpack.c.l.b16 %v2662_v27 }
 0xc38   : > { %v6552_v31 = vpack.c.b16 %v2687_v2, %v2686_v44 }
 0xc39   : > { %v2649_v63 = vpop.f32.mrf.mxu0 }
 0xc3a   : > { %v2650_v30 = vadd.f32 %v4820_v36, %v2649_v63 }
 0xc3c   : > { %v2663_v21 = vpack.c.bf16 %v2650_v30, %v2650_v30 }
 0xc3e   : > { %v2688_v51 = vunpack.c.l.b16 %v2663_v21 }
 0xc41   : > { %v2651_v7 = vpop.f32.mrf.mxu0 }
 0xc42   : > { %v2652_v24 = vadd.f32 %v4820_v36, %v2651_v7 }
 0xc44   : > { %v2664_v48 = vpack.c.bf16 %v2652_v24, %v2652_v24 }
 0xc46   : > { %v2689_v39 = vunpack.c.l.b16 %v2664_v48 }
 0xc48   : > { %v6544_v35 = vpack.c.b16 %v2689_v39, %v2688_v51 }
 0xc4a   : > { %2923 = vrot.lane.b32.xlu0 %v6544_v35, %s5371_s20  ;;  %2700 = vrot.lane.b32.xlu2 %v6544_v35, %s5370_s15 }
 0xc52   : > { %2696 = vrot.lane.b32.xlu0 %v6550_v22, %s5370_s15  ;;  %2921 = vrot.lane.b32.xlu2 %v6552_v31, %s5371_s20 }
 0xc5a   : > { %2913 = vrot.lane.b32.xlu0 %v6552_v31, %s5372_s21  ;;  %2911 = vrot.lane.b32.xlu2 %v6550_v22, %s5372_s21 }
 0xc62   : > { %2915 = vrot.lane.b32.xlu2 %v6544_v35, %s5372_s21 }
 0xc69   : > { %v2654_v17 = vpop.f32.mrf.mxu0 }
 0xc6a   : > { %3369 = vrot.lane.b32.xlu2 %v6544_v35, %s5375_s16  ;;  %v2655_v61 = vadd.f32 %v4820_v36, %v2654_v17 }
 0xc6c   : > { %v2665_v43 = vpack.c.bf16 %v2655_v61, %v2655_v61 }
 0xc6e   : > { %v2690_v54 = vunpack.c.l.b16 %v2665_v43 }
 0xc71   : > { %v2656_v59 = vpop.f32.mrf.mxu0 }
 0xc72   : > { %v2657_v50 = vadd.f32 %v4820_v36, %v2656_v59  ;;  %3367 = vrot.lane.b32.xlu2 %v6552_v31, %s5375_s16 }
 0xc74   : > { %v2666_v3 = vpack.c.bf16 %v2657_v50, %v2657_v50 }
 0xc76   : > { %v2691_v29 = vunpack.c.l.b16 %v2666_v3 }
 0xc78   : > { %v6568_v33 = vpack.c.b16 %v2691_v29, %v2690_v54 }
 0xc7a   : > { %3134 = vrot.lane.b32.xlu2 %v6550_v22, %s5376_s18  ;;  %2925 = vrot.lane.b32.xlu0 %v6568_v33, %s5371_s20 }
 0xc7b   : > { %2702 = vrot.lane.b32.xlu1 %v6568_v33, %s5370_s15 }
 0xc82   : > { %3359 = vrot.lane.b32.xlu2 %v6552_v31, %s5377_s22  ;;  %3144 = vrot.lane.b32.xlu0 %v6552_v31, %s5374_s28 }
 0xc83   : > { %2698 = vrot.lane.b32.xlu1 %v6552_v31, %s5370_s15  ;;  %s7357_s15 = smov 16  }
 0xc8a   : > { %2851 = vrot.lane.b32.xlu2 %v6552_v31, %s5373_s26  ;;  %3142 = vrot.lane.b32.xlu0 %v6550_v22, %s5374_s28 }
 0xc8b   : > { %2919 = vrot.lane.b32.xlu1 %v6550_v22, %s5371_s20  ;;  %s7358_s20 = smov 24  }
 0xc92   : > { %3140 = vrot.lane.b32.xlu2 %v6568_v33, %s5376_s18  ;;  %3357 = vrot.lane.b32.xlu0 %v6550_v22, %s5377_s22 }
 0xc93   : > { %3146 = vrot.lane.b32.xlu1 %v6544_v35, %s5374_s28 }
 0xc9a   : > { %3524 = vrot.lane.b32.xlu2 %v6568_v33, %s5380_s2  ;;  %3371 = vrot.lane.b32.xlu0 %v6568_v33, %s5375_s16 }
 0xc9b   : > { %3148 = vrot.lane.b32.xlu1 %v6568_v33, %s5374_s28 }
 0xca2   : > { %3138 = vrot.lane.b32.xlu0 %v6544_v35, %s5376_s18 }
 0xca3   : > { %3365 = vrot.lane.b32.xlu1 %v6550_v22, %s5375_s16 }
 0xca4   : > { %v2701_v16 = vpop.permute.xlu2 %2700 }
 0xca5   : > { %v2723_v49 = vsel %vm880_vm11, %v2701_v16, 0 }
 0xcaa   : > { %2853 = vrot.lane.b32.xlu0 %v6544_v35, %s5373_s26 }
 0xcab   : > { %2917 = vrot.lane.b32.xlu1 %v6568_v33, %s5372_s21 }
 0xcac   : > { %v2922_v46 = vpop.permute.xlu2 %2921 }
 0xcad   : > { %v2943_v57 = vsel %vm880_vm11, %v2922_v46, 0 }
 0xcb2   : > { %3363 = vrot.lane.b32.xlu0 %v6568_v33, %s5377_s22 }
 0xcb3   : > { %3136 = vrot.lane.b32.xlu1 %v6552_v31, %s5376_s18 }
 0xcb4   : > { %v2912_v55 = vpop.permute.xlu2 %2911 }
 0xcba   : > { %2855 = vrot.lane.b32.xlu0 %v6568_v33, %s5373_s26 }
 0xcbb   : > { %3361 = vrot.lane.b32.xlu1 %v6544_v35, %s5377_s22 }
 0xcbc   : > { %v2924_v5 = vpop.permute.xlu0 %2923  ;;  %v2916_v9 = vpop.permute.xlu2 %2915 }
 0xcbd   : > { %v2946_v37 = vsel %vm880_vm11, %v2924_v5, 0 }
 0xcc3   : > { %3076 = vrot.lane.b32.xlu1 %v6544_v35, %s5378_s24 }
 0xcc4   : > { %v2697_v12 = vpop.permute.xlu0 %2696  ;;  %v3370_v36 = vpop.permute.xlu2 %3369 }
 0xcc5   : > { %v2717_v63 = vsel %vm880_vm11, %v2697_v12, 0  ;;  %v3392_v42 = vsel %vm880_vm11, %v3370_v36, 0 }
 0xccb   : > { %3074 = vrot.lane.b32.xlu1 %v6552_v31, %s5378_s24 }
 0xccc   : > { %v2914_v32 = vpop.permute.xlu0 %2913  ;;  %v3368_v26 = vpop.permute.xlu2 %3367 }
 0xccd   : > { %v3389_v39 = vsel %vm880_vm11, %v3368_v26, 0 }
 0xcd3   : > { %2849 = vrot.lane.b32.xlu1 %v6550_v22, %s5373_s26  ;;  %s7361_s26 = sld [smem:[#allocation17_spill]] }
 0xcd4   : > { %v3135_v38 = vpop.permute.xlu2 %3134 }
 0xcdb   : > { %3072 = vrot.lane.b32.xlu1 %v6550_v22, %s5378_s24 }
 0xcdc   : > { %v3360_v44 = vpop.permute.xlu2 %3359 }
 0xce3   : > { %3078 = vrot.lane.b32.xlu1 %v6568_v33, %s5378_s24 }
 0xce4   : > { %v2852_v59 = vpop.permute.xlu2 %2851 }
 0xceb   : > { %3301 = vrot.lane.b32.xlu1 %v6568_v33, %s5379_s27 }
 0xcec   : > { %v2926_v1 = vpop.permute.xlu0 %2925  ;;  %v3141_v5 = vpop.permute.xlu2 %3140 }
 0xced   : > { %v2703_v34 = vpop.permute.xlu1 %2702  ;;  %v2949_v13 = vsel %vm880_vm11, %v2926_v1, 0 }
 0xcee   : > { %v2726_v6 = vsel %vm880_vm11, %v2703_v34, 0  ;;  %2955 = vmatpush.bf16.xpose.msrb.mxu3 %v2949_v13 }
 0xcef   : > { %2732 = vmatpush.bf16.xpose.msrb.mxu2 %v2726_v6 }
 0xcf4   : > { %v3145_v47 = vpop.permute.xlu0 %3144  ;;  %v3525_v16 = vpop.permute.xlu2 %3524 }
 0xcf5   : > { %v2699_v18 = vpop.permute.xlu1 %2698  ;;  %v3166_v27 = vsel %vm880_vm11, %v3145_v47, 0 }
 0xcf6   : > { %2956 = vmatpush.bf16.xpose.msrb.mxu3 %v2946_v37  ;;  %v2720_v62 = vsel %vm880_vm11, %v2699_v18, 0  ;;  %v2904_v37 = vld [vmem:[#allocation9 + $0x148] sm:$0xff] }
 0xcf7   : > { %2733 = vmatpush.bf16.xpose.msrb.mxu2 %v2723_v49  ;;  %v2669_v18 = vld [vmem:[#allocation9 + $0x108] sm:$0xff] }
 0xcfc   : > { %v3143_v14 = vpop.permute.xlu0 %3142 }
 0xcfd   : > { %v2920_v15 = vpop.permute.xlu1 %2919  ;;  %v3163_v45 = vsel %vm880_vm11, %v3143_v14, 0 }
 0xcfe   : > { %2957 = vmatpush.bf16.xpose.msrb.mxu3 %v2943_v57  ;;  %v2940_v23 = vsel %vm880_vm11, %v2920_v15, 0 }
 0xcff   : > { %2734 = vmatpush.bf16.xpose.msrb.mxu2 %v2720_v62 }
 0xd04   : > { %v3358_v60 = vpop.permute.xlu0 %3357 }
 0xd05   : > { %v3147_v11 = vpop.permute.xlu1 %3146 }
 0xd06   : > { %2958 = vmatpush.bf16.xpose.msrb.mxu3 %v2940_v23  ;;  %v3169_v58 = vsel %vm880_vm11, %v3147_v11, 0 }
 0xd07   : > { %2735 = vmatpush.bf16.xpose.msrb.mxu2 %v2717_v63 }
 0xd0c   : > { %v3372_v30 = vpop.permute.xlu0 %3371 }
 0xd0d   : > { %v3149_v7 = vpop.permute.xlu1 %3148  ;;  %v3395_v21 = vsel %vm880_vm11, %v3372_v30, 0  ;;  %4471 = vmatmul.msk.bf16.vlgmr.msrb.gmra.mxu3 %vm880_vm11, %v2912_v55 }
 0xd0e   : > { %v3172_v24 = vsel %vm880_vm11, %v3149_v7, 0  ;;  %4463 = vmatmul.msk.bf16.vlgmr.msrb.gmra.mxu2 %vm880_vm11, %v6550_v22  ;;  %3401 = vmatpush.bf16.xpose.msra.mxu3 %v3395_v21  ;;  %v2906_v21 = vld [vmem:[#allocation9 + $0x158] sm:$0xff] }
 0xd0f   : > { %3178 = vmatpush.bf16.xpose.msra.mxu2 %v3172_v24  ;;  %v2671_v24 = vld [vmem:[#allocation9 + $0x118] sm:$0xff] }
 0xd14   : > { %v3139_v52 = vpop.permute.xlu0 %3138 }
 0xd15   : > { %v3366_v48 = vpop.permute.xlu1 %3365 }
 0xd16   : > { %3402 = vmatpush.bf16.xpose.msra.mxu3 %v3392_v42  ;;  %v3386_v0 = vsel %vm880_vm11, %v3366_v48, 0 }
 0xd17   : > { %3179 = vmatpush.bf16.xpose.msra.mxu2 %v3169_v58 }
 0xd1c   : > { %v2854_v51 = vpop.permute.xlu0 %2853 }
 0xd1d   : > { %v2918_v25 = vpop.permute.xlu1 %2917  ;;  %4472 = vmatmul.msk.bf16.gmra.mxu3 %vm880_vm11, %v2914_v32  ;;  %v2668_v32 = vld [vmem:[#allocation9 + $0x100] sm:$0xff] }
 0xd1e   : > { %4464 = vmatmul.msk.bf16.gmra.mxu2 %vm880_vm11, %v6552_v31  ;;  %3403 = vmatpush.bf16.xpose.msra.mxu3 %v3389_v39  ;;  %v2907_v39 = vld [vmem:[#allocation9 + $0x160] sm:$0xff] }
 0xd1f   : > { %3180 = vmatpush.bf16.xpose.msra.mxu2 %v3166_v27 }
 0xd24   : > { %v3364_v41 = vpop.permute.xlu0 %3363 }
 0xd25   : > { %v3137_v2 = vpop.permute.xlu1 %3136 }
 0xd26   : > { %3404 = vmatpush.bf16.xpose.msra.mxu3 %v3386_v0 }
 0xd27   : > { %3181 = vmatpush.bf16.xpose.msra.mxu2 %v3163_v45 }
 0xd2c   : > { %v2856_v17 = vpop.permute.xlu0 %2855 }
 0xd2d   : > { %v3362_v61 = vpop.permute.xlu1 %3361  ;;  %2877 = vmatpush.bf16.msrb.mxu1 %v2856_v17  ;;  %4473 = vmatmul.msk.bf16.gmra.mxu3 %vm880_vm11, %v2916_v9  ;;  %v2905_v9 = vld [vmem:[#allocation9 + $0x150] sm:$0xff]  ;;  %v2673_v17 = vld [vmem:[#allocation9 + $0x128] sm:$0xff] }
 0xd2e   : > { %4465 = vmatmul.msk.bf16.gmra.mxu2 %vm880_vm11, %v6544_v35 }
 0xd31   : > { %2878 = vmatpush.bf16.msrb.mxu1 %v2854_v51 }
 0xd35   : > { %v3077_v43 = vpop.permute.xlu1 %3076  ;;  %2879 = vmatpush.bf16.msrb.mxu1 %v2852_v59 }
 0xd3d   : > { %v3075_v50 = vpop.permute.xlu1 %3074  ;;  %4474 = vmatmul.msk.bf16.gmra.mxu3 %vm880_vm11, %v2918_v25  ;;  %v2672_v25 = vld [vmem:[#allocation9 + $0x120] sm:$0xff] }
 0xd3e   : > { %4466 = vmatmul.msk.bf16.gmra.mxu2 %vm880_vm11, %v6568_v33  ;;  %v2903_v33 = vld [vmem:[#allocation9 + $0x140] sm:$0xff] }
 0xd45   : > { %v2850_v3 = vpop.permute.xlu1 %2849 }
 0xd46   : > { %2880 = vmatpush.bf16.msrb.mxu1 %v2850_v3 }
 0xd4d   : > { %v3073_v54 = vpop.permute.xlu1 %3072  ;;  %4487 = vmatmul.msk.bf16.vlgmr.msra.gmra.mxu3 %vm880_vm11, %v3358_v60  ;;  %v2670_v60 = vld [vmem:[#allocation9 + $0x110] sm:$0xff] }
 0xd4e   : > { %4479 = vmatmul.msk.bf16.vlgmr.msra.gmra.mxu2 %vm880_vm11, %v3135_v38 }
 0xd55   : > { %v3079_v29 = vpop.permute.xlu1 %3078 }
 0xd56   : > { %3100 = vmatpush.bf16.msra.mxu0 %v3079_v29  ;;  %v2674_v29 = vld [vmem:[#allocation9 + $0x130] sm:$0xff] }
 0xd5a   : > { %3101 = vmatpush.bf16.msra.mxu0 %v3077_v43 }
 0xd5d   : > { %v3302_v12 = vpop.permute.xlu1 %3301  ;;  %4488 = vmatmul.msk.bf16.gmra.mxu3 %vm880_vm11, %v3360_v44  ;;  %v2908_v44 = vld [vmem:[#allocation9 + $0x168] sm:$0xff] }
 0xd5e   : > { %3102 = vmatpush.bf16.msra.mxu0 %v3075_v50  ;;  %4480 = vmatmul.msk.bf16.gmra.mxu2 %vm880_vm11, %v3137_v2 }
 0xd5f   : > { %3323 = vmatpush.bf16.msra.mxu1 %v3302_v12 }
 0xd62   : > { %3103 = vmatpush.bf16.msra.mxu0 %v3073_v54 }
 0xd66   : > { %3546 = vmatpush.bf16.msrb.mxu0 %v3525_v16 }
 0xd6d   : > { %4489 = vmatmul.msk.bf16.gmra.mxu3 %vm880_vm11, %v3362_v61 }
 0xd6e   : > { %4481 = vmatmul.msk.bf16.gmra.mxu2 %vm880_vm11, %v3139_v52 }
 0xd7d   : > { %4490 = vmatmul.msk.bf16.gmra.mxu3 %vm880_vm11, %v3364_v41 }
 0xd7e   : > { %4482 = vmatmul.msk.bf16.gmra.mxu2 %vm880_vm11, %v3141_v5 }
 0xd90   : > { %v2960_v1 = vpop.f32.mrf.mxu3 }
 0xd91   : > { %v2737_v34 = vpop.f32.mrf.mxu2  ;;  %v6664_v13 = vadd.f32 %v2960_v1, %v2903_v33  ;;  %v2675_v1 = vld [vmem:[#allocation9 + $0x138] sm:$0xff] }
 0xd92   : > { %v6666_v46 = vadd.f32 %v2737_v34, %v2668_v32  ;;  %v2909_v32 = vld [vmem:[#allocation9 + $0x170] sm:$0xff] }
 0xd93   : > { %v2980_v6 = vsel %vm934_vm12, %v6664_v13, -inf }
 0xd94   : > { %v2757_v47 = vsel %vm934_vm12, %v6666_v46, -inf  ;;  %2981 = vmax.xlane.f32.xlu0 %v2980_v6 }
 0xd95   : > { %2758 = vmax.xlane.f32.xlu1 %v2757_v47 }
 0xd98   : > { %v2962_v49 = vpop.f32.mrf.mxu3 }
 0xd99   : > { %v2739_v55 = vpop.f32.mrf.mxu2  ;;  %v6672_v14 = vadd.f32 %v2962_v49, %v2904_v37 }
 0xd9a   : > { %v6674_v57 = vadd.f32 %v2739_v55, %v2669_v18  ;;  %v2910_v55 = vld [vmem:[#allocation9 + $0x178] sm:$0xff] }
 0xd9b   : > { %v2983_v15 = vsel %vm934_vm12, %v6672_v14, -inf }
 0xd9c   : > { %v2760_v62 = vsel %vm934_vm12, %v6674_v57, -inf }
 0xd9d   : > { %2761 = vmax.xlane.f32.xlu2 %v2760_v62  ;;  %2984 = vmax.xlane.f32.xlu1 %v2983_v15  ;;  %v3349_v15 = vld [vmem:[#allocation9 + $0x1c0] sm:$0xff] }
 0xda0   : > { %v2965_v23 = vpop.f32.mrf.mxu3 }
 0xda1   : > { %v2742_v11 = vpop.f32.mrf.mxu2  ;;  %v6680_v63 = vadd.f32 %v2965_v23, %v2905_v9 }
 0xda2   : > { %v6682_v36 = vadd.f32 %v2742_v11, %v2670_v60 }
 0xda3   : > { %v2986_v30 = vsel %vm934_vm12, %v6680_v63, -inf }
 0xda4   : > { %v2763_v7 = vsel %vm934_vm12, %v6682_v36, -inf }
 0xda5   : > { %2764 = vmax.xlane.f32.xlu2 %v2763_v7  ;;  %2987 = vmax.xlane.f32.xlu1 %v2986_v30  ;;  %v3126_v7 = vld [vmem:[#allocation9 + $0x180] sm:$0xff] }
 0xda8   : > { %v2967_v52 = vpop.f32.mrf.mxu3 }
 0xda9   : > { %v2744_v42 = vpop.f32.mrf.mxu2  ;;  %v6688_v48 = vadd.f32 %v2967_v52, %v2906_v21  ;;  %v3350_v21 = vld [vmem:[#allocation9 + $0x1c8] sm:$0xff] }
 0xdaa   : > { %v6690_v26 = vadd.f32 %v2744_v42, %v2671_v24  ;;  %v3127_v24 = vld [vmem:[#allocation9 + $0x188] sm:$0xff] }
 0xdab   : > { %v2989_v58 = vsel %vm934_vm12, %v6688_v48, -inf }
 0xdac   : > { %v2766_v51 = vsel %vm934_vm12, %v6690_v26, -inf }
 0xdad   : > { %2990 = vmax.xlane.f32.xlu2 %v2989_v58  ;;  %2767 = vmax.xlane.f32.xlu0 %v2766_v51 }
 0xdb0   : > { %v2970_v27 = vpop.f32.mrf.mxu3 }
 0xdb1   : > { %v2747_v38 = vpop.f32.mrf.mxu2  ;;  %v6696_v41 = vadd.f32 %v2970_v27, %v2907_v39 }
 0xdb2   : > { %v6698_v0 = vadd.f32 %v2747_v38, %v2672_v25 }
 0xdb3   : > { %v2992_v2 = vsel %vm934_vm12, %v6696_v41, -inf }
 0xdb4   : > { %v2769_v45 = vsel %vm934_vm12, %v6698_v0, -inf }
 0xdb5   : > { %2993 = vmax.xlane.f32.xlu2 %v2992_v2  ;;  %2770 = vmax.xlane.f32.xlu0 %v2769_v45  ;;  %v3351_v2 = vld [vmem:[#allocation9 + $0x1d0] sm:$0xff] }
 0xdb6   : > { %v3128_v45 = vld [vmem:[#allocation9 + $0x190] sm:$0xff] }
 0xdb8   : > { %v2972_v61 = vpop.f32.mrf.mxu3 }
 0xdb9   : > { %v2749_v59 = vpop.f32.mrf.mxu2  ;;  %v6704_v43 = vadd.f32 %v2972_v61, %v2908_v44 }
 0xdba   : > { %v6706_v50 = vadd.f32 %v2749_v59, %v2673_v17 }
 0xdbb   : > { %v2995_v3 = vsel %vm934_vm12, %v6704_v43, -inf }
 0xdbc   : > { %v2772_v54 = vsel %vm934_vm12, %v6706_v50, -inf }
 0xdbd   : > { %2773 = vmax.xlane.f32.xlu1 %v2772_v54  ;;  %2996 = vmax.xlane.f32.xlu0 %v2995_v3 }
 0xdc0   : > { %v2975_v5 = vpop.f32.mrf.mxu3 }
 0xdc1   : > { %v2752_v12 = vpop.f32.mrf.mxu2  ;;  %v6716_v34 = vadd.f32 %v2975_v5, %v2909_v32  ;;  %v3129_v5 = vld [vmem:[#allocation9 + $0x198] sm:$0xff] }
 0xdc2   : > { %v6712_v16 = vadd.f32 %v2752_v12, %v2674_v29  ;;  %v3352_v29 = vld [vmem:[#allocation9 + $0x1d8] sm:$0xff] }
 0xdc3   : > { %v2998_v49 = vsel %vm934_vm12, %v6716_v34, -inf }
 0xdc4   : > { %v2775_v33 = vsel %vm934_vm12, %v6712_v16, -inf }
 0xdc5   : > { %2776 = vmax.xlane.f32.xlu1 %v2775_v33 }
 0xdc8   : > { %v2977_v6 = vpop.f32.mrf.mxu3 }
 0xdc9   : > { %v2754_v47 = vpop.f32.mrf.mxu2  ;;  %v6724_v62 = vadd.f32 %v2977_v6, %v2910_v55 }
 0xdca   : > { %v6718_v37 = vadd.f32 %v2754_v47, %v2675_v1 }
 0xdcb   : > { %v3001_v30 = vsel %vm934_vm12, %v6724_v62, -inf }
 0xdcc   : > { %v2778_v18 = vsel %vm934_vm12, %v6718_v37, -inf }
 0xdcd   : > { %2779 = vmax.xlane.f32.xlu2 %v2778_v18  ;;  %2999 = vmax.xlane.f32.xlu1 %v2998_v49  ;;  %v3353_v18 = vld [vmem:[#allocation9 + $0x1e0] sm:$0xff] }
 0xdce   : > { %v3130_v49 = vld [vmem:[#allocation9 + $0x1a0] sm:$0xff] }
 0xdd0   : > { %v3406_v9 = vpop.f32.mrf.mxu3 }
 0xdd1   : > { %v3183_v60 = vpop.f32.mrf.mxu2  ;;  %v6726_v23 = vadd.f32 %v3406_v9, %v3349_v15 }
 0xdd2   : > { %v6732_v52 = vadd.f32 %v3183_v60, %v3126_v7  ;;  %v3354_v7 = vld [vmem:[#allocation9 + $0x1e8] sm:$0xff] }
 0xdd3   : > { %v3426_v11 = vsel %vm934_vm12, %v6726_v23, -inf }
 0xdd4   : > { %3427 = vmax.xlane.f32.xlu0 %v3426_v11  ;;  %v3203_v38 = vsel %vm934_vm12, %v6732_v52, -inf }
 0xdd5   : > { %3002 = vmax.xlane.f32.xlu2 %v3001_v30 }
 0xdd8   : > { %v3408_v42 = vpop.f32.mrf.mxu3 }
 0xdd9   : > { %v3185_v58 = vpop.f32.mrf.mxu2  ;;  %v6734_v51 = vadd.f32 %v3408_v42, %v3350_v21  ;;  %v3131_v21 = vld [vmem:[#allocation9 + $0x1a8] sm:$0xff] }
 0xdda   : > { %v6736_v39 = vadd.f32 %v3185_v58, %v3127_v24 }
 0xddb   : > { %v3429_v25 = vsel %vm934_vm12, %v6734_v51, -inf }
 0xddc   : > { %v3206_v27 = vsel %vm934_vm12, %v6736_v39, -inf  ;;  %3430 = vmax.xlane.f32.xlu0 %v3429_v25 }
 0xddd   : > { %3207 = vmax.xlane.f32.xlu1 %v3206_v27  ;;  %3204 = vmax.xlane.f32.xlu2 %v3203_v38 }
 0xde0   : > { %v3411_v44 = vpop.f32.mrf.mxu3 }
 0xde1   : > { %v3188_v17 = vpop.f32.mrf.mxu2  ;;  %v6744_v61 = vadd.f32 %v3411_v44, %v3351_v2  ;;  %v3132_v2 = vld [vmem:[#allocation9 + $0x1b0] sm:$0xff] }
 0xde2   : > { %v6746_v59 = vadd.f32 %v3188_v17, %v3128_v45 }
 0xde3   : > { %v3432_v3 = vsel %vm934_vm12, %v6744_v61, -inf }
 0xde4   : > { %v3209_v54 = vsel %vm934_vm12, %v6746_v59, -inf  ;;  %3433 = vmax.xlane.f32.xlu0 %v3432_v3 }
 0xde5   : > { %3210 = vmax.xlane.f32.xlu1 %v3209_v54  ;;  %v3355_v54 = vld [vmem:[#allocation9 + $0x1f0] sm:$0xff] }
 0xde8   : > { %v3413_v12 = vpop.f32.mrf.mxu3 }
 0xde9   : > { %v3190_v33 = vpop.f32.mrf.mxu2  ;;  %v6752_v32 = vadd.f32 %v3413_v12, %v3352_v29  ;;  %v3133_v29 = vld [vmem:[#allocation9 + $0x1b8] sm:$0xff] }
 0xdea   : > { %v6754_v1 = vadd.f32 %v3190_v33, %v3129_v5 }
 0xdeb   : > { %v3435_v6 = vsel %vm934_vm12, %v6752_v32, -inf }
 0xdec   : > { %v3212_v47 = vsel %vm934_vm12, %v6754_v1, -inf }
 0xded   : > { %3213 = vmax.xlane.f32.xlu2 %v3212_v47  ;;  %3436 = vmax.xlane.f32.xlu1 %v3435_v6 }
 0xdf0   : > { %v3416_v55 = vpop.f32.mrf.mxu3 }
 0xdf1   : > { %v3193_v15 = vpop.f32.mrf.mxu2  ;;  %v6760_v9 = vadd.f32 %v3416_v55, %v3353_v18 }
 0xdf2   : > { %v6762_v60 = vadd.f32 %v3193_v15, %v3130_v49 }
 0xdf3   : > { %v3438_v11 = vsel %vm934_vm12, %v6760_v9, -inf }
 0xdf4   : > { %v3215_v30 = vsel %vm934_vm12, %v6762_v60, -inf }
 0xdf5   : > { %3439 = vmax.xlane.f32.xlu2 %v3438_v11  ;;  %3216 = vmax.xlane.f32.xlu0 %v3215_v30  ;;  %v3356_v30 = vld [vmem:[#allocation9 + $0x1f8] sm:$0xff] }
 0xdf8   : > { %v3418_v24 = vpop.f32.mrf.mxu3 }
 0xdf9   : > { %v3195_v42 = vpop.f32.mrf.mxu2  ;;  %v6768_v58 = vadd.f32 %v3418_v24, %v3354_v7 }
 0xdfa   : > { %v6770_v25 = vadd.f32 %v3195_v42, %v3131_v21 }
 0xdfb   : > { %v3441_v27 = vsel %vm934_vm12, %v6768_v58, -inf }
 0xdfc   : > { %v3218_v38 = vsel %vm934_vm12, %v6770_v25, -inf }
 0xdfd   : > { %3219 = vmax.xlane.f32.xlu1 %v3218_v38  ;;  %3442 = vmax.xlane.f32.xlu0 %v3441_v27 }
 0xe00   : > { %v3421_v17 = vpop.f32.mrf.mxu3 }
 0xe01   : > { %v3198_v45 = vpop.f32.mrf.mxu2  ;;  %v6780_v5 = vadd.f32 %v3421_v17, %v3355_v54 }
 0xe02   : > { %v6776_v44 = vadd.f32 %v3198_v45, %v3132_v2 }
 0xe03   : > { %v3444_v11 = vsel %vm934_vm12, %v6780_v5, -inf }
 0xe04   : > { %v3221_v3 = vsel %vm934_vm12, %v6776_v44, -inf }
 0xe05   : > { %3222 = vmax.xlane.f32.xlu2 %v3221_v3 }
 0xe07   : > { %v2982_v33 = vpop.xlane.xlu0 %2981 }
 0xe08   : > { %v2759_v12 = vpop.xlane.xlu1 %2758  ;;  %v3004_v55 = vsub.f32 %v6664_v13, %v2982_v33  ;;  %v3423_v7 = vpop.f32.mrf.mxu3 }
 0xe09   : > { %v2781_v6 = vsub.f32 %v6666_v46, %v2759_v12  ;;  %v3200_v47 = vpop.f32.mrf.mxu2  ;;  %v6790_v24 = vadd.f32 %v3423_v7, %v3356_v30 }
 0xe0a   : > { %v6783_v18 = vadd.f32 %v3200_v47, %v3133_v29  ;;  %v3012_v21 = vmul.f32 1.442695, %v3004_v55 }
 0xe0b   : > { %v2789_v49 = vmul.f32 1.442695, %v2781_v6  ;;  %v3447_v45 = vsel %vm934_vm12, %v6790_v24, -inf }
 0xe0c   : > { %v3224_v15 = vsel %vm934_vm12, %v6783_v18, -inf }
 0xe0d   : > { %5020 = vpow2.f32 %v2789_v49  ;;  %3225 = vmax.xlane.f32.xlu0 %v3224_v15  ;;  %3445 = vmax.xlane.f32.xlu2 %v3444_v11 }
 0xe0e   : > { %5022 = vpow2.f32 %v3012_v21 }
 0xe10   : > { %v2762_v46 = vpop.xlane.xlu2 %2761  ;;  %v2985_v42 = vpop.xlane.xlu1 %2984 }
 0xe11   : > { %v3005_v27 = vsub.f32 %v6672_v14, %v2985_v42  ;;  %v2782_v13 = vsub.f32 %v6674_v57, %v2762_v46 }
 0xe13   : > { %v6793_v38 = vpop.eup %5020  ;;  %v3014_v2 = vmul.f32 1.442695, %v3005_v27  ;;  %v2791_v3 = vmul.f32 1.442695, %v2782_v13 }
 0xe14   : > { %v2805_v17 = vsel %vm934_vm12, %v6793_v38, 0.0  ;;  %v6800_v12 = vpop.eup %5022 }
 0xe15   : > { %3448 = vmax.xlane.f32.xlu0 %v3447_v45  ;;  %2806 = vadd.xlane.f32.xlu2 %v2805_v17  ;;  %5024 = vpow2.f32 %v3014_v2  ;;  %v3028_v47 = vsel %vm934_vm12, %v6800_v12, 0.0 }
 0xe16   : > { %5026 = vpow2.f32 %v2791_v3 }
 0xe18   : > { %v2765_v54 = vpop.xlane.xlu2 %2764  ;;  %v2988_v29 = vpop.xlane.xlu1 %2987 }
 0xe19   : > { %v2783_v14 = vsub.f32 %v6682_v36, %v2765_v54  ;;  %v3006_v57 = vsub.f32 %v6680_v63, %v2988_v29 }
 0xe1b   : > { %v2793_v33 = vmul.f32 1.442695, %v2783_v14  ;;  %v6804_v6 = vpop.eup %5024  ;;  %v3016_v55 = vmul.f32 1.442695, %v3006_v57 }
 0xe1c   : > { %v3031_v49 = vsel %vm934_vm12, %v6804_v6, 0.0  ;;  %v6810_v30 = vpop.eup %5026 }
 0xe1d   : > { %5028 = vpow2.f32 %v2793_v33  ;;  %3029 = vadd.xlane.f32.xlu2 %v3028_v47  ;;  %3032 = vadd.xlane.f32.xlu0 %v3031_v49  ;;  %v2808_v42 = vsel %vm934_vm12, %v6810_v30, 0.0 }
 0xe1e   : > { %5030 = vpow2.f32 %v3016_v55 }
 0xe20   : > { %v2991_v15 = vpop.xlane.xlu2 %2990  ;;  %v2768_v11 = vpop.xlane.xlu0 %2767 }
 0xe21   : > { %v2784_v36 = vsub.f32 %v6690_v26, %v2768_v11  ;;  %v3007_v21 = vsub.f32 %v6688_v48, %v2991_v15 }
 0xe23   : > { %v6813_v7 = vpop.eup %5028  ;;  %v2795_v63 = vmul.f32 1.442695, %v2784_v36  ;;  %v3018_v27 = vmul.f32 1.442695, %v3007_v21 }
 0xe24   : > { %v2811_v46 = vsel %vm934_vm12, %v6813_v7, 0.0  ;;  %v6820_v45 = vpop.eup %5030 }
 0xe25   : > { %2809 = vadd.xlane.f32.xlu2 %v2808_v42  ;;  %5032 = vpow2.f32 %v2795_v63  ;;  %2812 = vadd.xlane.f32.xlu0 %v2811_v46  ;;  %v3034_v29 = vsel %vm934_vm12, %v6820_v45, 0.0 }
 0xe26   : > { %5034 = vpow2.f32 %v3018_v27 }
 0xe28   : > { %v2994_v13 = vpop.xlane.xlu2 %2993  ;;  %v2771_v2 = vpop.xlane.xlu0 %2770 }
 0xe29   : > { %v3008_v26 = vsub.f32 %v6696_v41, %v2994_v13  ;;  %v2785_v17 = vsub.f32 %v6698_v0, %v2771_v2 }
 0xe2b   : > { %v3020_v3 = vmul.f32 1.442695, %v3008_v26  ;;  %v2797_v48 = vmul.f32 1.442695, %v2785_v17  ;;  %v6824_v54 = vpop.eup %5032 }
 0xe2c   : > { %v2814_v14 = vsel %vm934_vm12, %v6824_v54, 0.0  ;;  %v6832_v47 = vpop.eup %5034 }
 0xe2d   : > { %5036 = vpow2.f32 %v3020_v3  ;;  %3035 = vadd.xlane.f32.xlu2 %v3034_v29  ;;  %2815 = vadd.xlane.f32.xlu0 %v2814_v14  ;;  %v3037_v63 = vsel %vm934_vm12, %v6832_v47, 0.0 }
 0xe2e   : > { %5038 = vpow2.f32 %v2797_v48 }
 0xe30   : > { %v2774_v33 = vpop.xlane.xlu1 %2773  ;;  %v2997_v57 = vpop.xlane.xlu0 %2996 }
 0xe31   : > { %v2786_v41 = vsub.f32 %v6706_v50, %v2774_v33  ;;  %v3009_v0 = vsub.f32 %v6704_v43, %v2997_v57 }
 0xe33   : > { %v6834_v49 = vpop.eup %5036  ;;  %v2799_v55 = vmul.f32 1.442695, %v2786_v41  ;;  %v3022_v15 = vmul.f32 1.442695, %v3009_v0 }
 0xe34   : > { %v6836_v11 = vpop.eup %5038  ;;  %v3040_v36 = vsel %vm934_vm12, %v6834_v49, 0.0 }
 0xe35   : > { %5040 = vpow2.f32 %v2799_v55  ;;  %3041 = vadd.xlane.f32.xlu1 %v3040_v36  ;;  %v2817_v50 = vsel %vm934_vm12, %v6836_v11, 0.0  ;;  %3038 = vadd.xlane.f32.xlu0 %v3037_v63 }
 0xe36   : > { %5042 = vpow2.f32 %v3022_v15  ;;  %2818 = vadd.xlane.f32.xlu2 %v2817_v50 }
 0xe38   : > { %v2777_v43 = vpop.xlane.xlu1 %2776 }
 0xe39   : > { %v2787_v21 = vsub.f32 %v6712_v16, %v2777_v43 }
 0xe3b   : > { %v6845_v46 = vpop.eup %5040  ;;  %v2801_v42 = vmul.f32 1.442695, %v2787_v21 }
 0xe3c   : > { %v6847_v27 = vpop.eup %5042  ;;  %v2820_v13 = vsel %vm934_vm12, %v6845_v46, 0.0 }
 0xe3d   : > { %5044 = vpow2.f32 %v2801_v42  ;;  %v3043_v2 = vsel %vm934_vm12, %v6847_v27, 0.0  ;;  %2821 = vadd.xlane.f32.xlu0 %v2820_v13 }
 0xe3e   : > { %3044 = vadd.xlane.f32.xlu2 %v3043_v2 }
 0xe40   : > { %v2780_v26 = vpop.xlane.xlu2 %2779  ;;  %v3000_v17 = vpop.xlane.xlu1 %2999 }
 0xe41   : > { %v2788_v3 = vsub.f32 %v6718_v37, %v2780_v26  ;;  %v3010_v16 = vsub.f32 %v6716_v34, %v3000_v17 }
 0xe43   : > { %v6855_v48 = vpop.eup %5044  ;;  %v2803_v29 = vmul.f32 1.442695, %v2788_v3  ;;  %v3024_v14 = vmul.f32 1.442695, %v3010_v16 }
 0xe44   : > { %v2823_v33 = vsel %vm934_vm12, %v6855_v48, 0.0 }
 0xe45   : > { %5046 = vpow2.f32 %v2803_v29  ;;  %2824 = vadd.xlane.f32.xlu1 %v2823_v33 }
 0xe46   : > { %5048 = vpow2.f32 %v3024_v14 }
 0xe47   : > { %v3428_v36 = vpop.xlane.xlu0 %3427 }
 0xe48   : > { %v3003_v57 = vpop.xlane.xlu2 %3002 }
 0xe49   : > { %v3011_v41 = vsub.f32 %v6724_v62, %v3003_v57 }
 0xe4b   : > { %v6860_v0 = vpop.eup %5046  ;;  %v3026_v55 = vmul.f32 1.442695, %v3011_v41 }
 0xe4c   : > { %v6862_v15 = vpop.eup %5048  ;;  %v2826_v34 = vsel %vm934_vm12, %v6860_v0, 0.0 }
 0xe4d   : > { %5050 = vpow2.f32 %v3026_v55  ;;  %v3046_v37 = vsel %vm934_vm12, %v6862_v15, 0.0  ;;  %2827 = vadd.xlane.f32.xlu2 %v2826_v34 }
 0xe4e   : > { %3047 = vadd.xlane.f32.xlu0 %v3046_v37 }
 0xe4f   : > { %v3431_v50 = vpop.xlane.xlu0 %3430 }
 0xe50   : > { %v3205_v43 = vpop.xlane.xlu2 %3204  ;;  %v3208_v26 = vpop.xlane.xlu1 %3207  ;;  %v3451_v41 = vsub.f32 %v6734_v51, %v3431_v50 }
 0xe51   : > { %v3227_v16 = vsub.f32 %v6732_v52, %v3205_v43  ;;  %v3228_v34 = vsub.f32 %v6736_v39, %v3208_v26 }
 0xe52   : > { %v3460_v43 = vmul.f32 1.442695, %v3451_v41 }
 0xe53   : > { %v6868_v63 = vpop.eup %5050  ;;  %v3235_v29 = vmul.f32 1.442695, %v3227_v16  ;;  %v3237_v8 = vmul.f32 1.442695, %v3228_v34 }
 0xe54   : > { %v3049_v62 = vsel %vm934_vm12, %v6868_v63, 0.0 }
 0xe55   : > { %3050 = vadd.xlane.f32.xlu1 %v3049_v62  ;;  %5052 = vpow2.f32 %v3235_v29 }
 0xe57   : > { %v3434_v21 = vpop.xlane.xlu0 %3433 }
 0xe58   : > { %v3211_v14 = vpop.xlane.xlu1 %3210  ;;  %v3452_v51 = vsub.f32 %v6744_v61, %v3434_v21 }
 0xe5b   : > { %v6899_v55 = vpop.eup %5052 }
 0xe5c   : > { %v3251_v16 = vsel %vm934_vm12, %v6899_v55, 0.0 }
 0xe60   : > { %v6876_v42 = vpop.xlane.xlu2 %3213  ;;  %v3437_v52 = vpop.xlane.xlu1 %3436 }
 0xe62   : > { %3297 = vrot.lane.b32.xlu0 %v6552_v31, %s5379_s27 }
 0xe65   : > { %3522 = vrot.lane.b32.xlu2 %v6544_v35, %s5380_s2 }
 0xe68   : > { %v6880_v13 = vpop.xlane.xlu0 %3216  ;;  %v6884_v2 = vpop.xlane.xlu2 %3439 }
 0xe6d   : > { %3520 = vrot.lane.b32.xlu2 %v6552_v31, %s5380_s2 }
 0xe6e   : > { %3299 = vrot.lane.b32.xlu1 %v6544_v35, %s5379_s27  ;;  %v3450_v35 = vsub.f32 %v6726_v23, %v3428_v36  ;;  %v3229_v23 = vsub.f32 %v6746_v59, %v3211_v14 }
 0xe70   : > { %v6888_v17 = vpop.xlane.xlu0 %3442  ;;  %v3458_v57 = vmul.f32 1.442695, %v3450_v35  ;;  %v3239_v39 = vmul.f32 1.442695, %v3229_v23  ;;  %v3220_v26 = vpop.xlane.xlu1 %3219  ;;  %v3462_v35 = vmul.f32 1.442695, %v3452_v51 }
 0xe71   : > { %v3232_v59 = vsub.f32 %v6770_v25, %v3220_v26 }
 0xe72   : > { %5054 = vpow2.f32 %v3458_v57 }
 0xe73   : > { %5056 = vpow2.f32 %v3460_v43  ;;  %v3245_v43 = vmul.f32 1.442695, %v3232_v59 }
 0xe74   : > { %5058 = vpow2.f32 %v3237_v8  ;;  %v3453_v8 = vsub.f32 %v6752_v32, %v3437_v52 }
 0xe75   : > { %3295 = vrot.lane.b32.xlu2 %v6550_v22, %s5379_s27 }
 0xe78   : > { %v6890_v3 = vpop.xlane.xlu2 %3222  ;;  %v6908_v36 = vpop.eup %5054 }
 0xe79   : > { %v3474_v57 = vsel %vm934_vm12, %v6908_v36, 0.0  ;;  %v6912_v41 = vpop.eup %5056  ;;  %v3233_v52 = vsub.f32 %v6776_v44, %v6890_v3 }
 0xe7a   : > { %v6915_v61 = vpop.eup %5058  ;;  %v3477_v14 = vsel %vm934_vm12, %v6912_v41, 0.0 }
 0xe7b   : > { %v3254_v32 = vsel %vm934_vm12, %v6915_v61, 0.0  ;;  %v3247_v59 = vmul.f32 1.442695, %v3233_v52 }
 0xe80   : > { %v6893_v31 = vpop.xlane.xlu2 %3445  ;;  %v6895_v33 = vpop.xlane.xlu0 %3225 }
 0xe88   : > { %v2807_v37 = vpop.xlane.xlu2 %2806  ;;  %v6902_v62 = vpop.xlane.xlu0 %3448 }
 0xe8c   : > { %3252 = vadd.xlane.f32.xlu0 %v3251_v16 }
 0xe90   : > { %v3030_v50 = vpop.xlane.xlu2 %3029  ;;  %v3033_v29 = vpop.xlane.xlu0 %3032 }
 0xe91   : > { %5060 = vrcp.f32 %v3030_v50  ;;  %v3464_v50 = vmul.f32 1.442695, %v3453_v8 }
 0xe92   : > { %5062 = vrcp.f32 %v3033_v29  ;;  %v3231_v29 = vsub.f32 %v6762_v60, %v6880_v13  ;;  %v3457_v60 = vsub.f32 %v6790_v24, %v6902_v62 }
 0xe93   : > { %5064 = vpow2.f32 %v3239_v39 }
 0xe94   : > { %3475 = vadd.xlane.f32.xlu0 %v3474_v57  ;;  %5066 = vpow2.f32 %v3462_v35 }
 0xe95   : > { %5068 = vrcp.f32 %v2807_v37 }
 0xe97   : > { %v5061_v21 = vpop.eup %5060 }
 0xe98   : > { %v5063_v34 = vpop.eup %5062  ;;  %v3060_v16 = vmul.f32 %v5061_v21, %v6800_v12  ;;  %v2810_v23 = vpop.xlane.xlu2 %2809  ;;  %3478 = vadd.xlane.f32.xlu1 %v3477_v14 }
 0xe99   : > { %v3061_v51 = vmul.f32 %v5063_v34, %v6804_v6  ;;  %5070 = vrcp.f32 %v2810_v23  ;;  %v2813_v25 = vpop.xlane.xlu0 %2812  ;;  %v6922_v39 = vpop.eup %5064  ;;  %v3243_v34 = vmul.f32 1.442695, %v3231_v29  ;;  %v3472_v23 = vmul.f32 1.442695, %v3457_v60 }
 0xe9a   : > { %v6926_v37 = vpop.eup %5066  ;;  %5072 = vpow2.f32 %v3245_v43  ;;  %v3257_v6 = vsel %vm934_vm12, %v6922_v39, 0.0 }
 0xe9b   : > { %v3068_v26 = vpack.c.bf16 %v3061_v51, %v3060_v16  ;;  %v5069_v12 = vpop.eup %5068  ;;  %5074 = vpow2.f32 %v3464_v50  ;;  %v3480_v57 = vsel %vm934_vm12, %v6926_v37, 0.0 }
 0xe9c   : > { %3255 = vadd.xlane.f32.xlu0 %v3254_v32  ;;  %v2837_v8 = vmul.f32 %v5069_v12, %v6793_v38  ;;  %5076 = vpow2.f32 %v3247_v59 }
 0xe9d   : > { %4475 = vmatmul.msk.bf16.vlgmr.msra.gmra.mxu0 %vm934_vm12, %v3068_v26 }
 0xe9e   : > { %3258 = vadd.xlane.f32.xlu2 %v3257_v6 }
 0xe9f   : > { %v5071_v35 = vpop.eup %5070 }
 0xea0   : > { %v2838_v44 = vmul.f32 %v5071_v35, %v6810_v30  ;;  %v3036_v3 = vpop.xlane.xlu2 %3035  ;;  %3481 = vadd.xlane.f32.xlu1 %v3480_v57  ;;  %v6939_v14 = vpop.eup %5072  ;;  %v3454_v30 = vsub.f32 %v6760_v9, %v6884_v2  ;;  %v3234_v9 = vsub.f32 %v6783_v18, %v6895_v33 }
 0xea1   : > { %v2816_v21 = vpop.xlane.xlu0 %2815  ;;  %v6941_v16 = vpop.eup %5074  ;;  %v3266_v38 = vsel %vm934_vm12, %v6939_v14, 0.0 }
 0xea2   : > { %v2845_v43 = vpack.c.bf16 %v2838_v44, %v2837_v8  ;;  %5078 = vrcp.f32 %v2816_v21  ;;  %v3483_v13 = vsel %vm934_vm12, %v6941_v16, 0.0  ;;  %v6952_v24 = vpop.eup %5076  ;;  %v3466_v62 = vmul.f32 1.442695, %v3454_v30 }
 0xea3   : > { %5080 = vpow2.f32 %v3243_v34  ;;  %v3249_v29 = vmul.f32 1.442695, %v3234_v9 }
 0xea4   : > { %4467 = vmatmul.msk.bf16.vlgmr.msrb.gmra.mxu1 %vm934_vm12, %v2845_v43  ;;  %5082 = vrcp.f32 %v2813_v25  ;;  %v3269_v25 = vsel %vm934_vm12, %v6952_v24, 0.0 }
 0xea5   : > { %5084 = vrcp.f32 %v3036_v3 }
 0xea6   : > { %3267 = vadd.xlane.f32.xlu2 %v3266_v38 }
 0xea8   : > { %3484 = vadd.xlane.f32.xlu1 %v3483_v13  ;;  %v5079_v26 = vpop.eup %5078  ;;  %v3042_v21 = vpop.xlane.xlu1 %3041 }
 0xea9   : > { %v3039_v51 = vpop.xlane.xlu0 %3038  ;;  %v2819_v50 = vpop.xlane.xlu2 %2818  ;;  %v2840_v52 = vmul.f32 %v5079_v26, %v6824_v54 }
 0xeaa   : > { %5086 = vrcp.f32 %v3039_v51  ;;  %v6954_v32 = vpop.eup %5080 }
 0xeab   : > { %5088 = vpow2.f32 %v3472_v23  ;;  %v5083_v2 = vpop.eup %5082  ;;  %v3263_v6 = vsel %vm934_vm12, %v6954_v32, 0.0 }
 0xeac   : > { %5090 = vpow2.f32 %v3466_v62  ;;  %v5085_v12 = vpop.eup %5084  ;;  %v2839_v35 = vmul.f32 %v5083_v2, %v6813_v7 }
 0xead   : > { %v3062_v57 = vmul.f32 %v5085_v12, %v6820_v45  ;;  %5092 = vpow2.f32 %v3249_v29 }
 0xeae   : > { %3270 = vadd.xlane.f32.xlu2 %v3269_v25  ;;  %v2846_v8 = vpack.c.bf16 %v2840_v52, %v2839_v35 }
 0xeb0   : > { %3518 = vrot.lane.b32.xlu0 %v6550_v22, %s5380_s2  ;;  %3264 = vadd.xlane.f32.xlu1 %v3263_v6  ;;  %v5087_v18 = vpop.eup %5086 }
 0xeb1   : > { %v6966_v33 = vpop.eup %5088  ;;  %v3063_v59 = vmul.f32 %v5087_v18, %v6832_v47  ;;  %v2822_v54 = vpop.xlane.xlu0 %2821  ;;  %v3455_v18 = vsub.f32 %v6768_v58, %v6888_v17  ;;  %v3456_v58 = vsub.f32 %v6780_v5, %v6893_v31 }
 0xeb2   : > { %v6970_v44 = vpop.eup %5090  ;;  %v3045_v3 = vpop.xlane.xlu2 %3044  ;;  %5094 = vrcp.f32 %v2822_v54  ;;  %v3495_v22 = vsel %vm934_vm12, %v6966_v33, 0.0 }
 0xeb3   : > { %v3069_v7 = vpack.c.bf16 %v3063_v59, %v3062_v57  ;;  %5096 = vrcp.f32 %v2819_v50  ;;  %v3486_v45 = vsel %vm934_vm12, %v6970_v44, 0.0  ;;  %v6978_v47 = vpop.eup %5092 }
 0xeb4   : > { %4468 = vmatmul.msk.bf16.gmra.mxu1 %vm934_vm12, %v2846_v8  ;;  %5098 = vrcp.f32 %v3045_v3  ;;  %v3272_v13 = vsel %vm934_vm12, %v6978_v47, 0.0  ;;  %v3468_v3 = vmul.f32 1.442695, %v3455_v18 }
 0xeb5   : > { %4476 = vmatmul.msk.bf16.gmra.mxu0 %vm934_vm12, %v3069_v7  ;;  %5100 = vrcp.f32 %v3042_v21 }
 0xeb6   : > { %3496 = vadd.xlane.f32.xlu2 %v3495_v22 }
 0xeb8   : > { %3487 = vadd.xlane.f32.xlu1 %v3486_v45  ;;  %v5095_v34 = vpop.eup %5094  ;;  %v2825_v62 = vpop.xlane.xlu1 %2824 }
 0xeb9   : > { %v5097_v43 = vpop.eup %5096  ;;  %v2842_v38 = vmul.f32 %v5095_v34, %v6845_v46  ;;  %v3230_v46 = vsub.f32 %v6754_v1, %v6876_v42 }
 0xeba   : > { %v5099_v60 = vpop.eup %5098  ;;  %v2841_v23 = vmul.f32 %v5097_v43, %v6836_v11 }
 0xebb   : > { %v5101_v30 = vpop.eup %5100  ;;  %v3065_v51 = vmul.f32 %v5099_v60, %v6847_v27  ;;  %v3241_v12 = vmul.f32 1.442695, %v3230_v46 }
 0xebc   : > { %v3064_v26 = vmul.f32 %v5101_v30, %v6834_v49  ;;  %v2847_v9 = vpack.c.bf16 %v2842_v38, %v2841_v23 }
 0xebe   : > { %v3070_v25 = vpack.c.bf16 %v3065_v51, %v3064_v26 }
 0xec0   : > { %v2828_v50 = vpop.xlane.xlu2 %2827  ;;  %3273 = vadd.xlane.f32.xlu1 %v3272_v13 }
 0xec1   : > { %v3048_v2 = vpop.xlane.xlu0 %3047  ;;  %5102 = vrcp.f32 %v2828_v50 }
 0xec2   : > { %5104 = vrcp.f32 %v2825_v62 }
 0xec3   : > { %5106 = vrcp.f32 %v3048_v2 }
 0xec4   : > { %4469 = vmatmul.msk.bf16.gmra.mxu1 %vm934_vm12, %v2847_v9 }
 0xec5   : > { %4477 = vmatmul.msk.bf16.gmra.mxu0 %vm934_vm12, %v3070_v25 }
 0xec7   : > { %v5103_v52 = vpop.eup %5102 }
 0xec8   : > { %v3051_v11 = vpop.xlane.xlu1 %3050  ;;  %v3523_v27 = vpop.permute.xlu2 %3522  ;;  %v2844_v29 = vmul.f32 %v5103_v52, %v6860_v0  ;;  %v3470_v0 = vmul.f32 1.442695, %v3456_v58 }
 0xec9   : > { %5108 = vrcp.f32 %v3051_v11  ;;  %3547 = vmatpush.bf16.msrb.mxu0 %v3523_v27  ;;  %v5105_v49 = vpop.eup %5104 }
 0xeca   : > { %v5107_v6 = vpop.eup %5106  ;;  %5110 = vpow2.f32 %v3241_v12  ;;  %v2843_v57 = vmul.f32 %v5105_v49, %v6855_v48 }
 0xecb   : > { %v3066_v1 = vmul.f32 %v5107_v6, %v6862_v15  ;;  %5112 = vpow2.f32 %v3468_v3 }
 0xecc   : > { %v2848_v54 = vpack.c.bf16 %v2844_v29, %v2843_v57  ;;  %5114 = vpow2.f32 %v3470_v0 }
 0xecf   : > { %v5109_v35 = vpop.eup %5108 }
 0xed0   : > { %v3067_v42 = vmul.f32 %v5109_v35, %v6868_v63  ;;  %v3521_v59 = vpop.permute.xlu2 %3520  ;;  %v6997_v7 = vpop.eup %5110 }
 0xed1   : > { %3548 = vmatpush.bf16.msrb.mxu0 %v3521_v59  ;;  %v3260_v48 = vsel %vm934_vm12, %v6997_v7, 0.0  ;;  %v7004_v15 = vpop.eup %5112 }
 0xed2   : > { %v3071_v8 = vpack.c.bf16 %v3067_v42, %v3066_v1  ;;  %v3489_v17 = vsel %vm934_vm12, %v7004_v15, 0.0  ;;  %v7008_v21 = vpop.eup %5114 }
 0xed3   : > { %v3492_v5 = vsel %vm934_vm12, %v7008_v21, 0.0 }
 0xed4   : > { %4470 = vmatmul.msk.bf16.gmra.mxu1 %vm934_vm12, %v2848_v54  ;;  %v3298_v22 = vpop.permute.xlu0 %3297 }
 0xed5   : > { %4478 = vmatmul.msk.bf16.gmra.mxu0 %vm934_vm12, %v3071_v8 }
 0xed8   : > { %v3296_v45 = vpop.permute.xlu2 %3295 }
 0xeda   : > { %3261 = vadd.xlane.f32.xlu0 %v3260_v48 }
 0xee0   : > { %v3300_v63 = vpop.permute.xlu1 %3299 }
 0xee1   : > { %3324 = vmatpush.bf16.msra.mxu1 %v3300_v63 }
 0xee2   : > { %3490 = vadd.xlane.f32.xlu0 %v3489_v17 }
 0xee5   : > { %3325 = vmatpush.bf16.msra.mxu1 %v3298_v22 }
 0xee9   : > { %3326 = vmatpush.bf16.msra.mxu1 %v3296_v45 }
 0xeea   : > { %3493 = vadd.xlane.f32.xlu0 %v3492_v5 }
 0xeff   : > { %v3253_v31 = vpop.xlane.xlu0 %3252 }
 0xf00   : > { %5116 = vrcp.f32 %v3253_v31 }
 0xf06   : > { %v5117_v38 = vpop.eup %5116 }
 0xf07   : > { %v3476_v34 = vpop.xlane.xlu0 %3475  ;;  %v3283_v13 = vmul.f32 %v5117_v38, %v6899_v55 }
 0xf0b   : > { %v3479_v60 = vpop.xlane.xlu1 %3478 }
 0xf0f   : > { %v3256_v43 = vpop.xlane.xlu0 %3255 }
 0xf10   : > { %5118 = vrcp.f32 %v3256_v43 }
 0xf11   : > { %5120 = vrcp.f32 %v3479_v60  ;;  %v3259_v18 = vpop.xlane.xlu2 %3258 }
 0xf12   : > { %5122 = vrcp.f32 %v3476_v34 }
 0xf13   : > { %v3482_v62 = vpop.xlane.xlu1 %3481 }
 0xf16   : > { %v5119_v30 = vpop.eup %5118 }
 0xf17   : > { %v3284_v23 = vmul.f32 %v5119_v30, %v6915_v61  ;;  %v5121_v26 = vpop.eup %5120 }
 0xf18   : > { %v5123_v9 = vpop.eup %5122  ;;  %v3507_v2 = vmul.f32 %v5121_v26, %v6912_v41 }
 0xf19   : > { %v3291_v51 = vpack.c.bf16 %v3284_v23, %v3283_v13  ;;  %v3506_v25 = vmul.f32 %v5123_v9, %v6908_v36  ;;  %v3268_v8 = vpop.xlane.xlu2 %3267 }
 0xf1a   : > { %v3105_v50 = vpop.f32.mrf.mxu0 }
 0xf1b   : > { %4483 = vmatmul.msk.bf16.vlgmr.msra.gmra.mxu1 %vm934_vm12, %v3291_v51  ;;  %v3514_v55 = vpack.c.bf16 %v3507_v2, %v3506_v25  ;;  %v3485_v52 = vpop.xlane.xlu1 %3484 }
 0xf1c   : > { %5124 = vrcp.f32 %v3485_v52 }
 0xf1d   : > { %5126 = vrcp.f32 %v3482_v62 }
 0xf1e   : > { %5128 = vrcp.f32 %v3259_v18 }
 0xf21   : > { %v7023_v42 = vpop.f32.mrf.mxu1  ;;  %v3271_v45 = vpop.xlane.xlu2 %3270 }
 0xf22   : > { %v3107_v46 = vpop.f32.mrf.mxu0  ;;  %v3519_v11 = vpop.permute.xlu0 %3518 }
 0xf23   : > { %v4750_v27 = vpack.i.bf16 %v3107_v46, %v3105_v50  ;;  %3549 = vmatpush.bf16.msrb.mxu0 %v3519_v11  ;;  %v5125_v61 = vpop.eup %5124  ;;  %v3265_v1 = vpop.xlane.xlu1 %3264 }
 0xf24   : > { %v5127_v12 = vpop.eup %5126  ;;  %v3509_v49 = vmul.f32 %v5125_v61, %v6941_v16 }
 0xf25   : > { %4751 = vrot.lane.b32.xlu1 %v4750_v27, %s5381_s4  ;;  %v3508_v41 = vmul.f32 %v5127_v12, %v6926_v37  ;;  %v5129_v3 = vpop.eup %5128 }
 0xf26   : > { %4491 = vmatmul.msk.bf16.vlgmr.msrb.gmra.mxu0 %vm934_vm12, %v3514_v55  ;;  %v3285_v63 = vmul.f32 %v5129_v3, %v6922_v39 }
 0xf27   : > { %v3515_v36 = vpack.c.bf16 %v3509_v49, %v3508_v41 }
 0xf29   : > { %v7026_v0 = vpop.f32.mrf.mxu1  ;;  %v3497_v51 = vpop.xlane.xlu2 %3496 }
 0xf2b   : > { %v3488_v37 = vpop.xlane.xlu1 %3487 }
 0xf31   : > { %v7033_v13 = vpop.f32.mrf.mxu1 }
 0xf32   : > { %v3110_v6 = vpop.f32.mrf.mxu0 }
 0xf36   : > { %4492 = vmatmul.msk.bf16.gmra.mxu0 %vm934_vm12, %v3515_v36 }
 0xf39   : > { %v7039_v2 = vpop.f32.mrf.mxu1 }
 0xf3a   : > { %v3112_v29 = vpop.f32.mrf.mxu0 }
 0xf3b   : > { %v4765_v35 = vpack.i.bf16 %v3112_v29, %v3110_v6 }
 0xf3d   : > { %4766 = vrot.lane.b32.xlu1 %v4765_v35, %s5381_s4 }
 0xf42   : > { %v3115_v57 = vpop.f32.mrf.mxu0 }
 0xf4a   : > { %v3117_v59 = vpop.f32.mrf.mxu0 }
 0xf4b   : > { %v4780_v54 = vpack.i.bf16 %v3117_v59, %v3115_v57  ;;  %v4599_v59 = vld [vmem:[%s7326_s5 + $0x18] sm:$0xff] }
 0xf4c   : > { %3735 = vmatpush.bf16.msrb.mxu2 %v4599_v59 }
 0xf4d   : > { %v3262_v16 = vpop.xlane.xlu0 %3261  ;;  %4781 = vrot.lane.b32.xlu1 %v4780_v54, %s5381_s4 }
 0xf4e   : > { %5130 = vrcp.f32 %v3262_v16 }
 0xf4f   : > { %5132 = vrcp.f32 %v3488_v37 }
 0xf52   : > { %v3120_v58 = vpop.f32.mrf.mxu0 }
 0xf54   : > { %v5131_v48 = vpop.eup %5130 }
 0xf55   : > { %v3286_v17 = vmul.f32 %v5131_v48, %v6997_v7  ;;  %v3491_v22 = vpop.xlane.xlu0 %3490  ;;  %v5133_v31 = vpop.eup %5132 }
 0xf56   : > { %5134 = vrcp.f32 %v3491_v22  ;;  %v3510_v38 = vmul.f32 %v5133_v31, %v6970_v44  ;;  %v3274_v44 = vpop.xlane.xlu1 %3273  ;;  %v4598_v31 = vld [vmem:[%s7326_s5 + $0x10] sm:$0xff] }
 0xf57   : > { %v3292_v5 = vpack.c.bf16 %v3286_v17, %v3285_v63  ;;  %5136 = vrcp.f32 %v3265_v1  ;;  %3736 = vmatpush.bf16.msrb.mxu2 %v4598_v31 }
 0xf58   : > { %5138 = vrcp.f32 %v3268_v8 }
 0xf59   : > { %4484 = vmatmul.msk.bf16.gmra.mxu1 %vm934_vm12, %v3292_v5 }
 0xf5a   : > { %v3122_v34 = vpop.f32.mrf.mxu0 }
 0xf5b   : > { %v4795_v60 = vpack.i.bf16 %v3122_v34, %v3120_v58 }
 0xf5c   : > { %v5135_v43 = vpop.eup %5134 }
 0xf5d   : > { %v3511_v30 = vmul.f32 %v5135_v43, %v7004_v15  ;;  %4796 = vrot.lane.b32.xlu1 %v4795_v60, %s5381_s4  ;;  %v3494_v39 = vpop.xlane.xlu0 %3493  ;;  %v5137_v23 = vpop.eup %5136 }
 0xf5e   : > { %v5139_v62 = vpop.eup %5138  ;;  %5140 = vrcp.f32 %v3494_v39  ;;  %v3287_v50 = vmul.f32 %v5137_v23, %v6954_v32 }
 0xf5f   : > { %v3516_v7 = vpack.c.bf16 %v3511_v30, %v3510_v38  ;;  %5142 = vrcp.f32 %v3497_v51  ;;  %v3288_v26 = vmul.f32 %v5139_v62, %v6939_v14  ;;  %v7045_v14 = vpop.f32.mrf.mxu1 }
 0xf60   : > { %5144 = vrcp.f32 %v3274_v44 }
 0xf61   : > { %4493 = vmatmul.msk.bf16.gmra.mxu0 %vm934_vm12, %v3516_v7  ;;  %v3293_v9 = vpack.c.bf16 %v3288_v26, %v3287_v50  ;;  %5146 = vrcp.f32 %v3271_v45 }
 0xf64   : > { %v5141_v15 = vpop.eup %5140 }
 0xf65   : > { %v5143_v25 = vpop.eup %5142  ;;  %v3512_v46 = vmul.f32 %v5141_v15, %v7008_v21 }
 0xf66   : > { %v3513_v11 = vmul.f32 %v5143_v25, %v6966_v33  ;;  %v5145_v55 = vpop.eup %5144 }
 0xf67   : > { %v5147_v32 = vpop.eup %5146  ;;  %v3290_v52 = vmul.f32 %v5145_v55, %v6978_v47  ;;  %v7050_v49 = vpop.f32.mrf.mxu1 }
 0xf68   : > { %v3517_v27 = vpack.c.bf16 %v3513_v11, %v3512_v46  ;;  %v3289_v61 = vmul.f32 %v5147_v32, %v6952_v24 }
 0xf69   : > { %4485 = vmatmul.msk.bf16.gmra.mxu1 %vm934_vm12, %v3293_v9 }
 0xf6a   : > { %v3294_v12 = vpack.c.bf16 %v3290_v52, %v3289_v61 }
 0xf6f   : > { %v7052_v21 = vpop.f32.mrf.mxu1 }
 0xf71   : > { %4494 = vmatmul.msk.bf16.gmra.mxu0 %vm934_vm12, %v3517_v27 }
 0xf77   : > { %v7054_v41 = vpop.f32.mrf.mxu1 }
 0xf79   : > { %4486 = vmatmul.msk.bf16.gmra.mxu1 %vm934_vm12, %v3294_v12 }
 0xf97   : > { %v4752_v60 = vpop.permute.xlu1 %4751 }
 0xf98   : > { %v3328_v33 = vpop.f32.mrf.mxu1  ;;  %v4754_v38 = vunpack.i.h.bf16 %v4752_v60  ;;  %v4753_v30 = vunpack.i.l.bf16 %v4752_v60 }
 0xf9a   : > { %v3668_v62 = vsel %vm880_vm11, %v7026_v0, %v4754_v38  ;;  %v3667_v50 = vsel %vm880_vm11, %v7023_v42, %v4753_v30 }
 0xfa0   : > { %v3330_v6 = vpop.f32.mrf.mxu1 }
 0xfa1   : > { %v4755_v36 = vpack.i.bf16 %v3330_v6, %v3328_v33 }
 0xfa3   : > { %4756 = vrot.lane.b32.xlu0 %v4755_v36, %s7357_s15  ;;  %v3551_v29 = vpop.f32.mrf.mxu0 }
 0xfab   : > { %v3553_v35 = vpop.f32.mrf.mxu0 }
 0xfac   : > { %v4760_v18 = vpack.i.bf16 %v3553_v35, %v3551_v29 }
 0xfae   : > { %4761 = vrot.lane.b32.xlu2 %v4760_v18, %s7358_s20 }
 0xfaf   : > { %v4767_v27 = vpop.permute.xlu1 %4766 }
 0xfb0   : > { %v4769_v55 = vunpack.i.h.bf16 %v4767_v27  ;;  %v4768_v32 = vunpack.i.l.bf16 %v4767_v27 }
 0xfb2   : > { %v3670_v12 = vsel %vm880_vm11, %v7039_v2, %v4769_v55  ;;  %v3669_v33 = vsel %vm880_vm11, %v7033_v13, %v4768_v32 }
 0xfb3   : > { %v3556_v24 = vpop.f32.mrf.mxu0 }
 0xfbb   : > { %v3558_v47 = vpop.f32.mrf.mxu0 }
 0xfbc   : > { %v4775_v57 = vpack.i.bf16 %v3558_v47, %v3556_v24 }
 0xfbe   : > { %4776 = vrot.lane.b32.xlu2 %v4775_v57, %s7358_s20 }
 0xfbf   : > { %v4782_v57 = vpop.permute.xlu1 %4781 }
 0xfc0   : > { %v4783_v59 = vunpack.i.l.bf16 %v4782_v57 }
 0xfd6   : > { %v3333_v1 = vpop.f32.mrf.mxu1 }
 0xfde   : > { %v3335_v54 = vpop.f32.mrf.mxu1  ;;  %v3561_v8 = vpop.f32.mrf.mxu0 }
 0xfdf   : > { %v4770_v16 = vpack.i.bf16 %v3335_v54, %v3333_v1  ;;  %v4784_v1 = vunpack.i.h.bf16 %v4782_v57 }
 0xfe1   : > { %4771 = vrot.lane.b32.xlu0 %v4770_v16, %s7357_s15  ;;  %v3671_v16 = vsel %vm880_vm11, %v7045_v14, %v4783_v59 }
 0xfe6   : > { %v3338_v37 = vpop.f32.mrf.mxu1  ;;  %v3563_v3 = vpop.f32.mrf.mxu0 }
 0xfe7   : > { %v4790_v58 = vpack.i.bf16 %v3563_v3, %v3561_v8 }
 0xfe9   : > { %4791 = vrot.lane.b32.xlu2 %v4790_v58, %s7358_s20 }
 0xfee   : > { %v3340_v48 = vpop.f32.mrf.mxu1  ;;  %v3566_v63 = vpop.f32.mrf.mxu0 }
 0xfef   : > { %v4785_v17 = vpack.i.bf16 %v3340_v48, %v3338_v37  ;;  %v3672_v37 = vsel %vm880_vm11, %v7050_v49, %v4784_v1 }
 0xff1   : > { %4786 = vrot.lane.b32.xlu0 %v4785_v17, %s7357_s15 }
 0xff6   : > { %v3343_v22 = vpop.f32.mrf.mxu1  ;;  %v3568_v45 = vpop.f32.mrf.mxu0 }
 0xff7   : > { %v4805_v5 = vpack.i.bf16 %v3568_v45, %v3566_v63 }
 0xff9   : > { %4806 = vrot.lane.b32.xlu2 %v4805_v5, %s7358_s20  ;;  %v4797_v5 = vpop.permute.xlu1 %4796 }
 0xffa   : > { %v4799_v31 = vunpack.i.h.bf16 %v4797_v5 }
 0xffc   : > { %v3674_v38 = vsel %vm880_vm11, %v7054_v41, %v4799_v31  ;;  %v4821_v41 = vld [vmem:[%s7327_s6 + $0x1] ss:$0 sm:$0xff] }
 0xffe   : > { %v3345_v34 = vpop.f32.mrf.mxu1 }
 0xfff   : > { %v4800_v43 = vpack.i.bf16 %v3345_v34, %v3343_v22  ;;  %v4798_v34 = vunpack.i.l.bf16 %v4797_v5 }
0x1001   : > { %4801 = vrot.lane.b32.xlu0 %v4800_v43, %s7357_s15  ;;  %v3673_v30 = vsel %vm880_vm11, %v7052_v21, %v4798_v34  ;;  %s7360_s15 = sshll.u32 %s7363_s14, 3 }
0x1002   : > { %s552_s28 = scalar_lea.vmem %s7361_s26, %s7360_s15 }
0x1008   : > { %v4762_v39 = vpop.permute.xlu2 %4761 }
0x1009   : > { %v4764_v26 = vunpack.i.h.bf16 %v4762_v39  ;;  %v4763_v44 = vunpack.i.l.bf16 %v4762_v39 }
0x1015   : > { %v4757_v7 = vpop.permute.xlu0 %4756 }
0x1016   : > { %v4759_v23 = vunpack.i.h.bf16 %v4757_v7  ;;  %v4758_v51 = vunpack.i.l.bf16 %v4757_v7 }
0x1018   : > { %v3676_v9 = vsel %vm1853_vm13, %v3668_v62, %v4759_v23  ;;  %v3675_v15 = vsel %vm1853_vm13, %v3667_v50, %v4758_v51  ;;  %v4777_v0 = vpop.permute.xlu2 %4776 }
0x1019   : > { %v3684_v25 = vsel %vm1862_vm14, %v3676_v9, %v4764_v26  ;;  %v3683_v46 = vsel %vm1862_vm14, %v3675_v15, %v4763_v44  ;;  %v4779_v6 = vunpack.i.h.bf16 %v4777_v0  ;;  %v4778_v36 = vunpack.i.l.bf16 %v4777_v0 }
0x101a   : > { %v3691_v11 = vpack.c.bf16 %v3684_v25, %v3683_v46 }
0x101c   : > { %4508 = vmatmul.msk.bf16.vlgmr.msrb.gmra.mxu2 %vm565_vm0, %v3691_v11 }
0x1043   : > { %v4792_v2 = vpop.permute.xlu2 %4791 }
0x1044   : > { %v4794_v3 = vunpack.i.h.bf16 %v4792_v2  ;;  %v4793_v58 = vunpack.i.l.bf16 %v4792_v2 }
0x1053   : > { %v4772_v52 = vpop.permute.xlu0 %4771  ;;  %v4807_v14 = vpop.permute.xlu2 %4806 }
0x1054   : > { %v4774_v61 = vunpack.i.h.bf16 %v4772_v52  ;;  %v4773_v42 = vunpack.i.l.bf16 %v4772_v52  ;;  %v4809_v39 = vunpack.i.h.bf16 %v4807_v14  ;;  %v4808_v7 = vunpack.i.l.bf16 %v4807_v14 }
0x1056   : > { %v3678_v29 = vsel %vm1853_vm13, %v3670_v12, %v4774_v61  ;;  %v3677_v35 = vsel %vm1853_vm13, %v3669_v33, %v4773_v42 }
0x1057   : > { %v3685_v18 = vsel %vm1862_vm14, %v3677_v35, %v4778_v36  ;;  %v3686_v24 = vsel %vm1862_vm14, %v3678_v29, %v4779_v6 }
0x1058   : > { %v3692_v47 = vpack.c.bf16 %v3686_v24, %v3685_v18 }
0x105a   : > { %4509 = vmatmul.msk.bf16.gmra.mxu2 %vm565_vm0, %v3692_v47 }
0x1063   : > { %v4787_v54 = vpop.permute.xlu0 %4786 }
0x1064   : > { %v4789_v8 = vunpack.i.h.bf16 %v4787_v54  ;;  %v4788_v13 = vunpack.i.l.bf16 %v4787_v54 }
0x1066   : > { %v3680_v48 = vsel %vm1853_vm13, %v3672_v37, %v4789_v8  ;;  %v3679_v63 = vsel %vm1853_vm13, %v3671_v16, %v4788_v13  ;;  %v7359_v16 = vld [vmem:[#allocation13_spill] sm:$0xff] }
0x1067   : > { %v3687_v17 = vsel %vm1862_vm14, %v3679_v63, %v4793_v58  ;;  %v3688_v22 = vsel %vm1862_vm14, %v3680_v48, %v4794_v3 }
0x1068   : > { %v3693_v45 = vpack.c.bf16 %v3688_v22, %v3687_v17 }
0x106a   : > { %4510 = vmatmul.msk.bf16.gmra.mxu2 %vm565_vm0, %v3693_v45 }
0x1073   : > { %v4802_v43 = vpop.permute.xlu0 %4801 }
0x1074   : > { %v4804_v60 = vunpack.i.h.bf16 %v4802_v43  ;;  %v4803_v49 = vunpack.i.l.bf16 %v4802_v43 }
0x1076   : > { %v3682_v23 = vsel %vm1853_vm13, %v3674_v38, %v4804_v60  ;;  %v3681_v51 = vsel %vm1853_vm13, %v3673_v30, %v4803_v49 }
0x1077   : > { %v3689_v62 = vsel %vm1862_vm14, %v3681_v51, %v4808_v7  ;;  %v3690_v50 = vsel %vm1862_vm14, %v3682_v23, %v4809_v39 }
0x1078   : > { %v3694_v26 = vpack.c.bf16 %v3690_v50, %v3689_v62 }
0x107a   : > { %4511 = vmatmul.msk.bf16.gmra.mxu2 %vm565_vm0, %v3694_v26 }
0x109f   : > { %v3738_v44 = vpop.f32.mrf.mxu2 }
0x10a0   : > { %v3739_v9 = vadd.f32 %v4821_v41, %v3738_v44 }
0x10a2   : > { %v7110_v21 = vadd.f32 %v3739_v9, %v6409_v10 }
0x10a4   : > { %v3770_v15 = vsel %vm565_vm0, %v7110_v21, 0.0 }
0x10a5   : > { %3771 = vadd.xlane.f32.xlu1 %v3770_v15 }
0x10a7   : > { %v3740_v25 = vpop.f32.mrf.mxu2 }
0x10a8   : > { %v3741_v46 = vadd.f32 %v4821_v41, %v3740_v25 }
0x10aa   : > { %v7115_v11 = vadd.f32 %v3741_v46, %v6414_v53 }
0x10ac   : > { %v3773_v27 = vsel %vm565_vm0, %v7115_v11, 0.0 }
0x10ad   : > { %3774 = vadd.xlane.f32.xlu0 %v3773_v27  ;;  %v4601_v27 = vld [vmem:[%s7330_s9 + $0x18] sm:$0xff] }
0x10ae   : > { %4012 = vmatpush.bf16.msrb.mxu1 %v4601_v27 }
0x10dd   : > { %v3743_v55 = vpop.f32.mrf.mxu2 }
0x10de   : > { %v3744_v32 = vadd.f32 %v4821_v41, %v3743_v55 }
0x10e0   : > { %v7120_v0 = vadd.f32 %v3744_v32, %v6419_v28 }
0x10e2   : > { %v3776_v10 = vsel %vm565_vm0, %v7120_v0, 0.0 }
0x10e3   : > { %3777 = vadd.xlane.f32.xlu2 %v3776_v10 }
0x10e5   : > { %v3745_v52 = vpop.f32.mrf.mxu2 }
0x10e6   : > { %v3746_v61 = vadd.f32 %v4821_v41, %v3745_v52  ;;  %v4600_v52 = vld [vmem:[%s7330_s9 + $0x10] sm:$0xff] }
0x10e7   : > { %4013 = vmatpush.bf16.msrb.mxu1 %v4600_v52 }
0x10e8   : > { %v7125_v42 = vadd.f32 %v3746_v61, %v6424_v40 }
0x10ea   : > { %v3779_v53 = vsel %vm565_vm0, %v7125_v42, 0.0 }
0x10eb   : > { %3780 = vadd.xlane.f32.xlu1 %v3779_v53 }
0x10ed   : > { %v3748_v12 = vpop.f32.mrf.mxu2 }
0x10ee   : > { %v3749_v33 = vadd.f32 %v4821_v41, %v3748_v12 }
0x10f0   : > { %v7130_v6 = vadd.f32 %v3749_v33, %v6429_v19 }
0x10f2   : > { %v3782_v28 = vsel %vm565_vm0, %v7130_v6, 0.0 }
0x10f3   : > { %3783 = vadd.xlane.f32.xlu0 %v3782_v28 }
0x10f5   : > { %v3750_v36 = vpop.f32.mrf.mxu2 }
0x10f6   : > { %v3751_v29 = vadd.f32 %v4821_v41, %v3750_v36 }
0x10f8   : > { %v7135_v35 = vadd.f32 %v3751_v29, %v6434_v4 }
0x10fa   : > { %v3785_v40 = vsel %vm565_vm0, %v7135_v35, 0.0 }
0x10fb   : > { %3786 = vadd.xlane.f32.xlu2 %v3785_v40 }
0x10fd   : > { %v3753_v18 = vpop.f32.mrf.mxu2 }
0x10fe   : > { %v3754_v24 = vadd.f32 %v4821_v41, %v3753_v18 }
0x1100   : > { %v7140_v47 = vadd.f32 %v3754_v24, %v6443_v56 }
0x1102   : > { %v3788_v19 = vsel %vm565_vm0, %v7140_v47, 0.0 }
0x1103   : > { %3789 = vadd.xlane.f32.xlu2 %v3788_v19 }
0x1105   : > { %v3755_v4 = vpop.f32.mrf.mxu2 }
0x1106   : > { %v3756_v54 = vadd.f32 %v4821_v41, %v3755_v4 }
0x1108   : > { %v7153_v37 = vadd.f32 %v3756_v54, %v7359_v16 }
0x110a   : > { %v3791_v63 = vsel %vm565_vm0, %v7153_v37, 0.0 }
0x1118   : > { %v3772_v57 = vpop.xlane.xlu1 %3771 }
0x1119   : > { %v3794_v1 = vmul.f32 %v3772_v57, %v5550_v20 }
0x111b   : > { %v7146_v59 = vsub.f32 %v7110_v21, %v3794_v1 }
0x111d   : > { %v3810_v2 = vmul.f32 %v7146_v59, %v7146_v59 }
0x111f   : > { %v3818_v8 = vsel %vm565_vm0, %v3810_v2, 0.0 }
0x1120   : > { %v3775_v13 = vpop.xlane.xlu0 %3774  ;;  %3819 = vadd.xlane.f32.xlu1 %v3818_v8 }
0x1121   : > { %v3795_v56 = vmul.f32 %v3775_v13, %v5550_v20 }
0x1123   : > { %v7156_v3 = vsub.f32 %v7115_v11, %v3795_v56 }
0x1125   : > { %v3811_v58 = vmul.f32 %v7156_v3, %v7156_v3 }
0x1127   : > { %v3821_v48 = vsel %vm565_vm0, %v3811_v58, 0.0  ;;  %v7216_v58 = vld [vmem:[%s7328_s7 + $0x1] ss:$0 sm:$0xff] }
0x1128   : > { %3822 = vadd.xlane.f32.xlu0 %v3821_v48  ;;  %3792 = vadd.xlane.f32.xlu1 %v3791_v63 }
0x1156   : > { %v3778_v17 = vpop.xlane.xlu2 %3777 }
0x1157   : > { %v3796_v22 = vmul.f32 %v3778_v17, %v5550_v20 }
0x1159   : > { %v7165_v45 = vsub.f32 %v7120_v0, %v3796_v22  ;;  %v7222_v22 = vld [vmem:[%s7329_s8 + $0x1] ss:$0 sm:$0xff] }
0x115b   : > { %v3812_v5 = vmul.f32 %v7165_v45, %v7165_v45 }
0x115d   : > { %v3824_v31 = vsel %vm565_vm0, %v3812_v5, 0.0 }
0x115e   : > { %3825 = vadd.xlane.f32.xlu0 %v3824_v31  ;;  %v3781_v34 = vpop.xlane.xlu1 %3780 }
0x115f   : > { %v3797_v14 = vmul.f32 %v3781_v34, %v5550_v20 }
0x1161   : > { %v7172_v43 = vsub.f32 %v7125_v42, %v3797_v14 }
0x1163   : > { %v3813_v60 = vmul.f32 %v7172_v43, %v7172_v43 }
0x1165   : > { %v3827_v49 = vsel %vm565_vm0, %v3813_v60, 0.0 }
0x1166   : > { %v3784_v38 = vpop.xlane.xlu0 %3783  ;;  %3828 = vadd.xlane.f32.xlu2 %v3827_v49 }
0x1167   : > { %v3798_v30 = vmul.f32 %v3784_v38, %v5550_v20 }
0x1169   : > { %v7179_v39 = vsub.f32 %v7130_v6, %v3798_v30 }
0x116b   : > { %v3814_v7 = vmul.f32 %v7179_v39, %v7179_v39 }
0x116d   : > { %v3830_v23 = vsel %vm565_vm0, %v3814_v7, 0.0 }
0x116e   : > { %v3787_v51 = vpop.xlane.xlu2 %3786  ;;  %3831 = vadd.xlane.f32.xlu1 %v3830_v23 }
0x116f   : > { %v3799_v62 = vmul.f32 %v3787_v51, %v5550_v20 }
0x1171   : > { %v7186_v50 = vsub.f32 %v7135_v35, %v3799_v62 }
0x1173   : > { %v3815_v26 = vmul.f32 %v7186_v50, %v7186_v50 }
0x1175   : > { %v3833_v41 = vsel %vm565_vm0, %v3815_v26, 0.0 }
0x1176   : > { %v3790_v44 = vpop.xlane.xlu2 %3789  ;;  %3834 = vadd.xlane.f32.xlu0 %v3833_v41 }
0x1177   : > { %v3800_v9 = vmul.f32 %v3790_v44, %v5550_v20 }
0x1179   : > { %v7193_v15 = vsub.f32 %v7140_v47, %v3800_v9 }
0x117b   : > { %v3816_v25 = vmul.f32 %v7193_v15, %v7193_v15 }
0x117d   : > { %v3836_v46 = vsel %vm565_vm0, %v3816_v25, 0.0 }
0x117e   : > { %3837 = vadd.xlane.f32.xlu2 %v3836_v46 }
0x1193   : > { %v3820_v55 = vpop.xlane.xlu1 %3819 }
0x1194   : > { %v3842_v32 = vmul.f32 %v3820_v55, %v5550_v20 }
0x1196   : > { %v3850_v10 = vadd.f32 1e-05, %v3842_v32 }
0x1198   : > { %5148 = vrsqrt.f32 %v3850_v10  ;;  %vm3864_vm12 = vweird.f32 %v3850_v10 }
0x119b   : > { %v3823_v61 = vpop.xlane.xlu0 %3822  ;;  %v3793_v53 = vpop.xlane.xlu1 %3792 }
0x119c   : > { %v3843_v12 = vmul.f32 %v3823_v61, %v5550_v20  ;;  %v3801_v33 = vmul.f32 %v3793_v53, %v5550_v20 }
0x119e   : > { %v5149_v28 = vpop.eup %5148  ;;  %v3851_v36 = vadd.f32 1e-05, %v3843_v12  ;;  %v7208_v29 = vsub.f32 %v7153_v37, %v3801_v33 }
0x119f   : > { %v3859_v40 = vmul.f32 %v5149_v28, %v3850_v10  ;;  %vm3865_vm11 = vweird.f32 %v5149_v28 }
0x11a0   : > { %5150 = vrsqrt.f32 %v3851_v36  ;;  %v3817_v18 = vmul.f32 %v7208_v29, %v7208_v29  ;;  %vm3866_vm13 = vmor %vm3864_vm12, %vm3865_vm11  ;;  %vm3874_vm4 = vweird.f32 %v3851_v36 }
0x11a1   : > { %v3860_v24 = vmul.f32 %v5149_v28, %v3859_v40 }
0x11a2   : > { %v3839_v19 = vsel %vm565_vm0, %v3817_v18, 0.0 }
0x11a3   : > { %v3861_v57 = vmul.f32 0.5, %v3860_v24  ;;  %3840 = vadd.xlane.f32.xlu1 %v3839_v19 }
0x11a5   : > { %v3862_v1 = vsub.f32 1.5, %v3861_v57 }
0x11a6   : > { %v5151_v4 = vpop.eup %5150 }
0x11a7   : > { %v3863_v2 = vmul.f32 %v5149_v28, %v3862_v1  ;;  %v3869_v54 = vmul.f32 %v5151_v4, %v3851_v36  ;;  %vm3875_vm14 = vweird.f32 %v5151_v4 }
0x11a8   : > { %vm3876_vm5 = vmor %vm3874_vm4, %vm3875_vm14 }
0x11a9   : > { %v3870_v8 = vmul.f32 %v5151_v4, %v3869_v54  ;;  %v3867_v13 = vsel %vm3866_vm13, %v5149_v28, %v3863_v2 }
0x11aa   : > { %v3938_v48 = vmul.f32 %v3867_v13, %v7146_v59 }
0x11ab   : > { %v3871_v56 = vmul.f32 0.5, %v3870_v8 }
0x11ac   : > { %v3949_v5 = vmul.f32 %v7216_v58, %v3938_v48 }
0x11ad   : > { %v3872_v16 = vsub.f32 1.5, %v3871_v56 }
0x11ae   : > { %v3960_v14 = vadd.f32 %v7222_v22, %v3949_v5 }
0x11af   : > { %v3873_v63 = vmul.f32 %v5151_v4, %v3872_v16 }
0x11b1   : > { %v3877_v17 = vsel %vm3876_vm5, %v5151_v4, %v3873_v63 }
0x11b2   : > { %v3939_v31 = vmul.f32 %v3877_v17, %v7156_v3 }
0x11b4   : > { %v3950_v34 = vmul.f32 %v7216_v58, %v3939_v31 }
0x11b6   : > { %v3961_v60 = vadd.f32 %v7222_v22, %v3950_v34 }
0x11b8   : > { %v3968_v59 = vpack.c.bf16 %v3961_v60, %v3960_v14 }
0x11ba   : > { %4527 = vmatmul.msk.bf16.vlgmr.msrb.gmra.mxu1 %vm565_vm0, %v3968_v59 }
0x11d1   : > { %v3826_v49 = vpop.xlane.xlu0 %3825 }
0x11d2   : > { %v3844_v38 = vmul.f32 %v3826_v49, %v5550_v20 }
0x11d4   : > { %v3852_v30 = vadd.f32 1e-05, %v3844_v38 }
0x11d6   : > { %5152 = vrsqrt.f32 %v3852_v30  ;;  %vm3884_vm7 = vweird.f32 %v3852_v30 }
0x11d9   : > { %v3829_v7 = vpop.xlane.xlu2 %3828 }
0x11da   : > { %v3845_v23 = vmul.f32 %v3829_v7, %v5550_v20 }
0x11dc   : > { %v5153_v51 = vpop.eup %5152  ;;  %v3853_v62 = vadd.f32 1e-05, %v3845_v23 }
0x11dd   : > { %v3879_v3 = vmul.f32 %v5153_v51, %v3852_v30  ;;  %vm3885_vm6 = vweird.f32 %v5153_v51 }
0x11de   : > { %5154 = vrsqrt.f32 %v3853_v62  ;;  %vm3886_vm8 = vmor %vm3884_vm7, %vm3885_vm6  ;;  %vm3894_vm10 = vweird.f32 %v3853_v62 }
0x11df   : > { %v3880_v26 = vmul.f32 %v5153_v51, %v3879_v3 }
0x11e1   : > { %v3881_v41 = vmul.f32 0.5, %v3880_v26  ;;  %v3832_v44 = vpop.xlane.xlu1 %3831 }
0x11e2   : > { %v3846_v9 = vmul.f32 %v3832_v44, %v5550_v20 }
0x11e3   : > { %v3882_v25 = vsub.f32 1.5, %v3881_v41 }
0x11e4   : > { %v5155_v46 = vpop.eup %5154  ;;  %v3854_v27 = vadd.f32 1e-05, %v3846_v9 }
0x11e5   : > { %v3883_v55 = vmul.f32 %v5153_v51, %v3882_v25  ;;  %v3889_v32 = vmul.f32 %v5155_v46, %v3853_v62  ;;  %vm3895_vm9 = vweird.f32 %v5155_v46  ;;  %v4609_v25 = vld [vmem:[%s7332_s11 + $0x78] sm:$0xff] }
0x11e6   : > { %5156 = vrsqrt.f32 %v3854_v27  ;;  %vm3896_vm15 = vmor %vm3894_vm10, %vm3895_vm9  ;;  %vm3904_vm2 = vweird.f32 %v3854_v27  ;;  %4181 = vmatpush.bf16.msrb.mxu3 %v4609_v25 }
0x11e7   : > { %v3890_v10 = vmul.f32 %v5155_v46, %v3889_v32  ;;  %v3887_v52 = vsel %vm3886_vm8, %v5153_v51, %v3883_v55 }
0x11e8   : > { %v3940_v36 = vmul.f32 %v3887_v52, %v7165_v45 }
0x11e9   : > { %v3891_v61 = vmul.f32 0.5, %v3890_v10  ;;  %v3835_v53 = vpop.xlane.xlu0 %3834  ;;  %v4607_v10 = vld [vmem:[%s7332_s11 + $0x68] sm:$0xff] }
0x11ea   : > { %v3847_v12 = vmul.f32 %v3835_v53, %v5550_v20  ;;  %v3951_v4 = vmul.f32 %v7216_v58, %v3940_v36  ;;  %v4606_v53 = vld [vmem:[%s7332_s11 + $0x60] sm:$0xff] }
0x11eb   : > { %v3892_v33 = vsub.f32 1.5, %v3891_v61 }
0x11ec   : > { %v5157_v28 = vpop.eup %5156  ;;  %v3855_v40 = vadd.f32 1e-05, %v3847_v12  ;;  %v3962_v56 = vadd.f32 %v7222_v22, %v3951_v4 }
0x11ed   : > { %v3893_v18 = vmul.f32 %v5155_v46, %v3892_v33  ;;  %v3899_v24 = vmul.f32 %v5157_v28, %v3854_v27  ;;  %vm3905_vm1 = vweird.f32 %v5157_v28  ;;  %v4608_v27 = vld [vmem:[%s7332_s11 + $0x70] sm:$0xff] }
0x11ee   : > { %5158 = vrsqrt.f32 %v3855_v40  ;;  %vm3906_vm3 = vmor %vm3904_vm2, %vm3905_vm1  ;;  %vm3914_vm12 = vweird.f32 %v3855_v40  ;;  %4182 = vmatpush.bf16.msrb.mxu3 %v4608_v27 }
0x11ef   : > { %v3897_v19 = vsel %vm3896_vm15, %v5155_v46, %v3893_v18  ;;  %v3900_v57 = vmul.f32 %v5157_v28, %v3899_v24 }
0x11f0   : > { %v3941_v1 = vmul.f32 %v3897_v19, %v7172_v43 }
0x11f1   : > { %v3901_v2 = vmul.f32 0.5, %v3900_v57  ;;  %v3838_v60 = vpop.xlane.xlu2 %3837 }
0x11f2   : > { %v3952_v54 = vmul.f32 %v7216_v58, %v3941_v1  ;;  %v3848_v30 = vmul.f32 %v3838_v60, %v5550_v20  ;;  %4183 = vmatpush.bf16.msrb.mxu3 %v4607_v10  ;;  %v4604_v1 = vld [vmem:[%s7332_s11 + $0x50] sm:$0xff] }
0x11f3   : > { %v3902_v8 = vsub.f32 1.5, %v3901_v2 }
0x11f4   : > { %v5159_v13 = vpop.eup %5158  ;;  %v3963_v45 = vadd.f32 %v7222_v22, %v3952_v54  ;;  %v3856_v62 = vadd.f32 1e-05, %v3848_v30  ;;  %v4603_v54 = vld [vmem:[%s7332_s11 + $0x48] sm:$0xff] }
0x11f5   : > { %v3903_v16 = vmul.f32 %v5157_v28, %v3902_v8  ;;  %v3909_v48 = vmul.f32 %v5159_v13, %v3855_v40  ;;  %vm3915_vm11 = vweird.f32 %v5159_v13  ;;  %v4605_v40 = vld [vmem:[%s7332_s11 + $0x58] sm:$0xff] }
0x11f6   : > { %v3969_v63 = vpack.c.bf16 %v3963_v45, %v3962_v56  ;;  %vm3916_vm13 = vmor %vm3914_vm12, %vm3915_vm11  ;;  %5160 = vrsqrt.f32 %v3856_v62  ;;  %vm3924_vm4 = vweird.f32 %v3856_v62  ;;  %4184 = vmatpush.bf16.msrb.mxu3 %v4606_v53 }
0x11f7   : > { %v3910_v17 = vmul.f32 %v5159_v13, %v3909_v48  ;;  %v3907_v43 = vsel %vm3906_vm3, %v5157_v28, %v3903_v16 }
0x11f8   : > { %4528 = vmatmul.msk.bf16.gmra.mxu1 %vm565_vm0, %v3969_v63  ;;  %v3942_v34 = vmul.f32 %v3907_v43, %v7179_v39 }
0x11f9   : > { %v3911_v5 = vmul.f32 0.5, %v3910_v17 }
0x11fa   : > { %v3953_v38 = vmul.f32 %v7216_v58, %v3942_v34  ;;  %4185 = vmatpush.bf16.msrb.mxu3 %v4605_v40 }
0x11fb   : > { %v3912_v31 = vsub.f32 1.5, %v3911_v5 }
0x11fc   : > { %v3964_v23 = vadd.f32 %v7222_v22, %v3953_v38  ;;  %v5161_v39 = vpop.eup %5160 }
0x11fd   : > { %v3913_v14 = vmul.f32 %v5159_v13, %v3912_v31  ;;  %v3919_v26 = vmul.f32 %v5161_v39, %v3856_v62  ;;  %vm3925_vm14 = vweird.f32 %v5161_v39 }
0x11fe   : > { %vm3926_vm5 = vmor %vm3924_vm4, %vm3925_vm14  ;;  %4186 = vmatpush.bf16.msrb.mxu3 %v4604_v1 }
0x11ff   : > { %v3917_v59 = vsel %vm3916_vm13, %v5159_v13, %v3913_v14  ;;  %v3920_v41 = vmul.f32 %v5161_v39, %v3919_v26  ;;  %v7283_v13 = vld [vmem:[%s7331_s10 + $0x1] ss:$0 sm:$0xff] }
0x1200   : > { %v3943_v49 = vmul.f32 %v3917_v59, %v7186_v50 }
0x1201   : > { %v3921_v46 = vmul.f32 0.5, %v3920_v41 }
0x1202   : > { %v3954_v7 = vmul.f32 %v7216_v58, %v3943_v49  ;;  %4187 = vmatpush.bf16.msrb.mxu3 %v4603_v54 }
0x1203   : > { %v3922_v55 = vsub.f32 1.5, %v3921_v46 }
0x1204   : > { %v3965_v51 = vadd.f32 %v7222_v22, %v3954_v7 }
0x1206   : > { %v3970_v3 = vpack.c.bf16 %v3965_v51, %v3964_v23 }
0x1208   : > { %4529 = vmatmul.msk.bf16.gmra.mxu1 %vm565_vm0, %v3970_v3 }
0x1216   : > { %v3841_v44 = vpop.xlane.xlu1 %3840 }
0x1217   : > { %v3849_v50 = vmul.f32 %v3841_v44, %v5550_v20  ;;  %v3923_v20 = vmul.f32 %v5161_v39, %v3922_v55 }
0x1219   : > { %v3857_v9 = vadd.f32 1e-05, %v3849_v50  ;;  %v3927_v12 = vsel %vm3926_vm5, %v5161_v39, %v3923_v20 }
0x121a   : > { %v3944_v36 = vmul.f32 %v3927_v12, %v7193_v15 }
0x121b   : > { %5162 = vrsqrt.f32 %v3857_v9  ;;  %vm3934_vm7 = vweird.f32 %v3857_v9 }
0x121c   : > { %v3955_v57 = vmul.f32 %v7216_v58, %v3944_v36 }
0x121e   : > { %v3966_v15 = vadd.f32 %v7222_v22, %v3955_v57 }
0x1221   : > { %v5163_v32 = vpop.eup %5162 }
0x1222   : > { %v3929_v52 = vmul.f32 %v5163_v32, %v3857_v9  ;;  %vm3935_vm6 = vweird.f32 %v5163_v32 }
0x1223   : > { %vm3936_vm8 = vmor %vm3934_vm7, %vm3935_vm6 }
0x1224   : > { %v3930_v61 = vmul.f32 %v5163_v32, %v3929_v52 }
0x1226   : > { %v3931_v33 = vmul.f32 0.5, %v3930_v61 }
0x1228   : > { %v3932_v28 = vsub.f32 1.5, %v3931_v33 }
0x122a   : > { %v3933_v18 = vmul.f32 %v5163_v32, %v3932_v28 }
0x122c   : > { %v3937_v24 = vsel %vm3936_vm8, %v5163_v32, %v3933_v18 }
0x122d   : > { %v3945_v19 = vmul.f32 %v3937_v24, %v7208_v29  ;;  %v4602_v29 = vld [vmem:[%s7332_s11 + $0x40] sm:$0xff] }
0x122e   : > { %4188 = vmatpush.bf16.msrb.mxu3 %v4602_v29 }
0x122f   : > { %v3956_v4 = vmul.f32 %v7216_v58, %v3945_v19 }
0x1231   : > { %v3967_v2 = vadd.f32 %v7222_v22, %v3956_v4 }
0x1233   : > { %v3971_v8 = vpack.c.bf16 %v3967_v2, %v3966_v15 }
0x1235   : > { %4530 = vmatmul.msk.bf16.gmra.mxu1 %vm565_vm0, %v3971_v8 }
0x1237   : > { %v4015_v58 = vpop.f32.mrf.mxu1 }
0x1238   : > { %v4016_v22 = vadd.f32 %v7283_v13, %v4015_v58 }
0x123a   : > { %v4043_v56 = vmul.f32 0.044715, %v4016_v22  ;;  %v4035_v30 = vmul.f32 0.5, %v4016_v22 }
0x123c   : > { %v4051_v45 = vmul.f32 %v4043_v56, %v4016_v22 }
0x123e   : > { %v4059_v16 = vmul.f32 %v4051_v45, %v4016_v22 }
0x123f   : > { %v4017_v48 = vpop.f32.mrf.mxu1 }
0x1240   : > { %v4067_v63 = vadd.f32 %v4059_v16, %v4016_v22  ;;  %v4018_v17 = vadd.f32 %v7283_v13, %v4017_v48 }
0x1242   : > { %v4044_v43 = vmul.f32 0.044715, %v4018_v17  ;;  %v4075_v5 = vmul.f32 0.7978846, %v4067_v63  ;;  %v4036_v7 = vmul.f32 0.5, %v4018_v17 }
0x1244   : > { %v4052_v31 = vmul.f32 %v4044_v43, %v4018_v17  ;;  %5164 = vtanh.f32 %v4075_v5 }
0x1246   : > { %v4060_v34 = vmul.f32 %v4052_v31, %v4018_v17 }
0x1248   : > { %v4068_v14 = vadd.f32 %v4060_v34, %v4018_v17 }
0x124a   : > { %v4076_v60 = vmul.f32 0.7978846, %v4068_v14  ;;  %v5165_v59 = vpop.eup %5164 }
0x124b   : > { %v4091_v49 = vadd.f32 1.0, %v5165_v59 }
0x124c   : > { %5166 = vtanh.f32 %v4076_v60 }
0x124d   : > { %v4099_v51 = vmul.f32 %v4091_v49, %v4035_v30 }
0x1252   : > { %v5167_v38 = vpop.eup %5166 }
0x1253   : > { %v4092_v23 = vadd.f32 1.0, %v5167_v38 }
0x1255   : > { %v4100_v62 = vmul.f32 %v4092_v23, %v4036_v7 }
0x1257   : > { %v4107_v3 = vpack.c.bf16 %v4100_v62, %v4099_v51 }
0x1259   : > { %4189 = vmatmul.bf16.vlgmr.msrb.gmra.mxu3 %v4107_v3 }
0x1275   : > { %v4020_v39 = vpop.f32.mrf.mxu1 }
0x1276   : > { %v4021_v26 = vadd.f32 %v7283_v13, %v4020_v39 }
0x1278   : > { %v4045_v41 = vmul.f32 0.044715, %v4021_v26  ;;  %v4037_v4 = vmul.f32 0.5, %v4021_v26 }
0x127a   : > { %v4053_v44 = vmul.f32 %v4045_v41, %v4021_v26 }
0x127c   : > { %v4061_v50 = vmul.f32 %v4053_v44, %v4021_v26 }
0x127d   : > { %v4022_v9 = vpop.f32.mrf.mxu1 }
0x127e   : > { %v4023_v25 = vadd.f32 %v7283_v13, %v4022_v9  ;;  %v4069_v46 = vadd.f32 %v4061_v50, %v4021_v26 }
0x1280   : > { %v4046_v27 = vmul.f32 0.044715, %v4023_v25  ;;  %v4077_v32 = vmul.f32 0.7978846, %v4069_v46  ;;  %v4038_v15 = vmul.f32 0.5, %v4023_v25 }
0x1282   : > { %v4054_v55 = vmul.f32 %v4046_v27, %v4023_v25  ;;  %5168 = vtanh.f32 %v4077_v32 }
0x1284   : > { %v4062_v10 = vmul.f32 %v4054_v55, %v4023_v25 }
0x1285   : > { %v4025_v20 = vpop.f32.mrf.mxu1 }
0x1286   : > { %v4026_v52 = vadd.f32 %v7283_v13, %v4025_v20  ;;  %v4070_v61 = vadd.f32 %v4062_v10, %v4023_v25 }
0x1288   : > { %v4047_v53 = vmul.f32 0.044715, %v4026_v52  ;;  %v4078_v12 = vmul.f32 0.7978846, %v4070_v61  ;;  %v5169_v28 = vpop.eup %5168  ;;  %v4039_v43 = vmul.f32 0.5, %v4026_v52 }
0x1289   : > { %v4093_v19 = vadd.f32 1.0, %v5169_v28 }
0x128a   : > { %v4055_v33 = vmul.f32 %v4047_v53, %v4026_v52  ;;  %5170 = vtanh.f32 %v4078_v12 }
0x128b   : > { %v4101_v29 = vmul.f32 %v4093_v19, %v4037_v4 }
0x128c   : > { %v4063_v36 = vmul.f32 %v4055_v33, %v4026_v52 }
0x128d   : > { %v4027_v40 = vpop.f32.mrf.mxu1 }
0x128e   : > { %v4028_v18 = vadd.f32 %v7283_v13, %v4027_v40  ;;  %v4071_v24 = vadd.f32 %v4063_v36, %v4026_v52 }
0x1290   : > { %v5171_v57 = vpop.eup %5170  ;;  %v4048_v1 = vmul.f32 0.044715, %v4028_v18  ;;  %v4079_v8 = vmul.f32 0.7978846, %v4071_v24  ;;  %v4040_v5 = vmul.f32 0.5, %v4028_v18 }
0x1291   : > { %v4094_v2 = vadd.f32 1.0, %v5171_v57 }
0x1292   : > { %v4056_v54 = vmul.f32 %v4048_v1, %v4028_v18  ;;  %5172 = vtanh.f32 %v4079_v8 }
0x1293   : > { %v4102_v58 = vmul.f32 %v4094_v2, %v4038_v15 }
0x1294   : > { %v4064_v22 = vmul.f32 %v4056_v54, %v4028_v18 }
0x1295   : > { %v4108_v56 = vpack.c.bf16 %v4102_v58, %v4101_v29 }
0x1296   : > { %v4072_v45 = vadd.f32 %v4064_v22, %v4028_v18 }
0x1297   : > { %4194 = vmatmul.bf16.gmra.mxu3 %v4108_v56 }
0x1298   : > { %v4080_v16 = vmul.f32 0.7978846, %v4072_v45  ;;  %v5173_v48 = vpop.eup %5172 }
0x1299   : > { %v4095_v63 = vadd.f32 1.0, %v5173_v48 }
0x129a   : > { %5174 = vtanh.f32 %v4080_v16 }
0x129b   : > { %v4103_v34 = vmul.f32 %v4095_v63, %v4039_v43 }
0x12a0   : > { %v5175_v17 = vpop.eup %5174 }
0x12a1   : > { %v4096_v31 = vadd.f32 1.0, %v5175_v17 }
0x12a3   : > { %v4104_v14 = vmul.f32 %v4096_v31, %v4040_v5 }
0x12a5   : > { %v4109_v60 = vpack.c.bf16 %v4104_v14, %v4103_v34 }
0x12a7   : > { %4199 = vmatmul.bf16.gmra.mxu3 %v4109_v60 }
0x12b2   : > { %v4030_v59 = vpop.f32.mrf.mxu1 }
0x12b3   : > { %v4031_v49 = vadd.f32 %v7283_v13, %v4030_v59 }
0x12b5   : > { %v4049_v38 = vmul.f32 0.044715, %v4031_v49  ;;  %v4041_v27 = vmul.f32 0.5, %v4031_v49 }
0x12b7   : > { %v4057_v30 = vmul.f32 %v4049_v38, %v4031_v49 }
0x12b9   : > { %v4065_v7 = vmul.f32 %v4057_v30, %v4031_v49 }
0x12ba   : > { %v4032_v23 = vpop.f32.mrf.mxu1 }
0x12bb   : > { %v4033_v51 = vadd.f32 %v7283_v13, %v4032_v23  ;;  %v4073_v62 = vadd.f32 %v4065_v7, %v4031_v49  ;;  %v4825_v13 = vld [vmem:[%s7333_s12 + $0x1] ss:$0 sm:$0xff] }
0x12bd   : > { %v4050_v3 = vmul.f32 0.044715, %v4033_v51  ;;  %v4081_v26 = vmul.f32 0.7978846, %v4073_v62  ;;  %v4042_v55 = vmul.f32 0.5, %v4033_v51 }
0x12bf   : > { %v4058_v39 = vmul.f32 %v4050_v3, %v4033_v51  ;;  %5176 = vtanh.f32 %v4081_v26 }
0x12c1   : > { %v4066_v41 = vmul.f32 %v4058_v39, %v4033_v51 }
0x12c3   : > { %v4074_v44 = vadd.f32 %v4066_v41, %v4033_v51 }
0x12c5   : > { %v4082_v50 = vmul.f32 0.7978846, %v4074_v44  ;;  %v5177_v9 = vpop.eup %5176 }
0x12c6   : > { %v4097_v25 = vadd.f32 1.0, %v5177_v9 }
0x12c7   : > { %5178 = vtanh.f32 %v4082_v50 }
0x12c8   : > { %v4105_v10 = vmul.f32 %v4097_v25, %v4041_v27 }
0x12cd   : > { %v5179_v46 = vpop.eup %5178 }
0x12ce   : > { %v4098_v32 = vadd.f32 1.0, %v5179_v46 }
0x12d0   : > { %v4106_v20 = vmul.f32 %v4098_v32, %v4042_v55 }
0x12d2   : > { %v4110_v52 = vpack.c.bf16 %v4106_v20, %v4105_v10 }
0x12d4   : > { %4204 = vmatmul.bf16.gmra.mxu3 %v4110_v52 }
0x12dc   : > { %v4190_v61 = vpop.f32.mrf.mxu3 }
0x12dd   : > { %v4191_v53 = vadd.f32 %v4825_v13, %v4190_v61 }
0x12df   : > { %v4210_v12 = vadd.f32 %v4191_v53, %v7110_v21 }
0x12e1   : > { %4218 = vst.msk [vmem:[%s552_s28] sm:$0xff] %vm565_vm0, %v4210_v12 }
0x12e4   : > { %v4192_v33 = vpop.f32.mrf.mxu3 }
0x12e5   : > { %v4193_v28 = vadd.f32 %v4825_v13, %v4192_v33 }
0x12e7   : > { %v4211_v36 = vadd.f32 %v4193_v28, %v7115_v11 }
0x12e9   : > { %4219 = vst.msk [vmem:[%s552_s28 + $0x8] sm:$0xff] %vm565_vm0, %v4211_v36 }
0x131a   : > { %v4195_v40 = vpop.f32.mrf.mxu3 }
0x131b   : > { %v4196_v18 = vadd.f32 %v4825_v13, %v4195_v40 }
0x131d   : > { %v4212_v24 = vadd.f32 %v4196_v18, %v7120_v0 }
0x131f   : > { %4220 = vst.msk [vmem:[%s552_s28 + $0x10] sm:$0xff] %vm565_vm0, %v4212_v24 }
0x1322   : > { %v4197_v19 = vpop.f32.mrf.mxu3 }
0x1323   : > { %v4198_v57 = vadd.f32 %v4825_v13, %v4197_v19 }
0x1325   : > { %v4213_v1 = vadd.f32 %v4198_v57, %v7125_v42 }
0x1327   : > { %4221 = vst.msk [vmem:[%s552_s28 + $0x18] sm:$0xff] %vm565_vm0, %v4213_v1 }
0x132a   : > { %v4200_v21 = vpop.f32.mrf.mxu3 }
0x132b   : > { %v4201_v4 = vadd.f32 %v4825_v13, %v4200_v21 }
0x132d   : > { %v4214_v15 = vadd.f32 %v4201_v4, %v7130_v6 }
0x132f   : > { %4222 = vst.msk [vmem:[%s552_s28 + $0x20] sm:$0xff] %vm565_vm0, %v4214_v15 }
0x1332   : > { %v4202_v11 = vpop.f32.mrf.mxu3 }
0x1333   : > { %v4203_v2 = vadd.f32 %v4825_v13, %v4202_v11 }
0x1335   : > { %v4215_v54 = vadd.f32 %v4203_v2, %v7135_v35 }
0x1337   : > { %4223 = vst.msk [vmem:[%s552_s28 + $0x28] sm:$0xff] %vm565_vm0, %v4215_v54 }
0x1357   : > { %v4205_v0 = vpop.f32.mrf.mxu3 }
0x1358   : > { %v4206_v8 = vadd.f32 %v4825_v13, %v4205_v0 }
0x135a   : > { %v4216_v29 = vadd.f32 %v4206_v8, %v7140_v47 }
0x135c   : > { %4224 = vst.msk [vmem:[%s552_s28 + $0x30] sm:$0xff] %vm565_vm0, %v4216_v29 }
0x135f   : > { %v4207_v42 = vpop.f32.mrf.mxu3 }
0x1360   : > { %v4208_v58 = vadd.f32 %v4825_v13, %v4207_v42 }
0x1362   : > { %v4217_v22 = vadd.f32 %v4208_v58, %v7153_v37 }
0x1364   : > { %4225 = vst.msk [vmem:[%s552_s28 + $0x38] sm:$0xff] %vm565_vm0, %v4217_v22 }
0x1365 PF: > { %s27_s29 = sadd.s32 1, %s5356_s29  }
0x1366   : > { %p24_p7 = scmp.ge.s32.totalorder %s27_s29, 4  }
0x1368   :  { %26 = sbr.rel (!%p24_p7) target bundleno = 8 (0x8), region = 146 }
0x136d   :  { %4248 = vsyncpa [#allocation3], 1 }
0x136e   :  { %4250 = vsyncpa [#allocation3 + $0x1], 1 }
0x136f   :  { %4251 = vsyncpa [#allocation5], 1 }
0x1370   :  { %4252 = vsyncpa [#allocation8], 1 }

</bundles_post_ra>
